<compile_context>
chip_gen: v6e
topology: v6e:2x2x1
jax: 0.10.0
libtpu: 0.0.40
codegen_flags: <defaults>
</compile_context>

<pallas_src>
import jax
import jax.numpy as jnp
from jax.experimental import pallas as pl
from jax.experimental.pallas import tpu as pltpu

# ---- small, TPU-friendly stand-ins for the OpenImages config ---------------
D            = 256            # representation_size == clsnet feature dim (2048 in cfg)
NUM_GROUPS   = 8              # GroupNorm groups (32 in the original module)
C_CLSNET     = 64             # number of clsnet (OpenImages) classes
NUM_CLASSES  = 32             # cfg.MODEL.ROI_BOX_HEAD.NUM_CLASSES
N_COMMON     = 16             # len(clsnet_inds_common)
NUM_BBOX_CLS = NUM_CLASSES    # cfg.MODEL.CLS_AGNOSTIC_BBOX_REG = False
N_PROPOSALS  = 8
RECONST_W    = 1.0            # cfg.MODEL.ROI_BOX_HEAD.RECONST_W
LEAKY_SLOPE  = 0.01           # nn.LeakyReLU default
GN_EPS       = 1e-5           # nn.GroupNorm default
GSIZE        = D // NUM_GROUPS


def _round_up(n, m):
    return ((n + m - 1) // m) * m


def _full_spec(shape):
    # single-block spec (grid = (1,)) covering the whole array in VMEM
    return pl.BlockSpec(shape, lambda i: (0,) * len(shape))


# ----------------- in-kernel helper: Linear -> GroupNorm -> LeakyReLU -> Linear
def _mlp(v_bf16, w1t_ref, gamma_ref, beta_ref, w2t_ref, b2_ref, s_grp, st_grp):
    # Linear(D, D, bias=False): bf16 MXU operands, f32 accumulation
    h = jnp.dot(v_bf16, w1t_ref[...], preferred_element_type=jnp.float32)      # [C, D] f32
    # GroupNorm over 2-D input: per-row per-group stats (biased variance) in f32
    inv_gsize = jnp.float32(1.0 / GSIZE)
    mean = jnp.dot(jnp.dot(h, s_grp, preferred_element_type=jnp.float32),
                   st_grp, preferred_element_type=jnp.float32) * inv_gsize       # [C, D]
    diff = h - mean
    var = jnp.dot(jnp.dot(diff * diff, s_grp, preferred_element_type=jnp.float32),
                  st_grp, preferred_element_type=jnp.float32) * inv_gsize        # [C, D]
    hn = diff * jax.lax.rsqrt(var + GN_EPS) * gamma_ref[...] + beta_ref[...]
    # LeakyReLU
    hn = jnp.where(hn >= 0, hn, LEAKY_SLOPE * hn)
    # Linear(D, D) with bias
    return (jnp.dot(hn.astype(jnp.bfloat16), w2t_ref[...],
                    preferred_element_type=jnp.float32) + b2_ref[...])


# ----------------- in-kernel helper: classification + bbox heads -------------
def _heads(x_ref, det_bf, sel_ref, hw_ref, hb_ref, hbc_ref, com_out_ref, rest_out_ref):
    x_bf = x_ref[...].astype(jnp.bfloat16)
    # Gather the requested det rows FIRST: small [ncp, C] one-hot @ [C, D] matmul.
    common_w = jnp.dot(sel_ref[...], det_bf, preferred_element_type=jnp.float32)   # [ncp, D]
    # F.linear(x, common_w, common_bias): contract the shared D axis (trans-B matmul).
    com_out_ref[...] = (jax.lax.dot_general(
        x_bf, common_w.astype(jnp.bfloat16), (((1,), (1,)), ((), ())),
        preferred_element_type=jnp.float32) + hbc_ref[...])                        # [N, ncp]
    # cls_score (+ bbox_pred) fused slab: one lane-dense matmul, unmasked store.
    rest_out_ref[...] = (jnp.dot(x_bf, hw_ref[...],
                                 preferred_element_type=jnp.float32) + hb_ref[...])  # [N, krest]


# ----------------- fused TRAIN kernel: enc -> gather -> dec -> L2 -> heads ---
def _train_kernel(cw_ref, e1_ref, eg_ref, eb_ref, e2_ref, e2b_ref,
                  d1_ref, dg_ref, db_ref, d2_ref, d2b_ref,
                  x_ref, sel_ref, hwr_ref, hbr_ref, hbc_ref, sg_ref, sgt_ref,
                  com_ref, rest_ref, loss_ref):
    s_grp = sg_ref[...]
    st_grp = sgt_ref[...]
    cw = cw_ref[...]                                                # f32 (loss needs f32)
    det = _mlp(cw.astype(jnp.bfloat16), e1_ref, eg_ref, eb_ref,
               e2_ref, e2b_ref, s_grp, st_grp)                      # wtn_enc  [C, D] f32
    det_bf = det.astype(jnp.bfloat16)
    rec = _mlp(det_bf, d1_ref, dg_ref, db_ref,
               d2_ref, d2b_ref, s_grp, st_grp)                      # wtn_dec  [C, D] f32
    diff = rec - cw                                                 # L2 loss in f32
    loss_ref[...] = jnp.reshape(jnp.mean(diff * diff), (1, 1))
    _heads(x_ref, det_bf, sel_ref, hwr_ref, hbr_ref, hbc_ref, com_ref, rest_ref)


# ----------------- fused EVAL kernel: enc -> gather -> heads -----------------
def _eval_kernel(cw_ref, e1_ref, eg_ref, eb_ref, e2_ref, e2b_ref,
                 x_ref, sel_ref, hwb_ref, hbb_ref, hbc_ref, sg_ref, sgt_ref,
                 com_ref, bbox_ref):
    s_grp = sg_ref[...]
    st_grp = sgt_ref[...]
    det = _mlp(cw_ref[...].astype(jnp.bfloat16), e1_ref, eg_ref, eb_ref,
               e2_ref, e2b_ref, s_grp, st_grp)                      # wtn_enc
    _heads(x_ref, det.astype(jnp.bfloat16), sel_ref, hwb_ref, hbb_ref, hbc_ref,
           com_ref, bbox_ref)


# ---------------- parameter construction (deterministic, synthetic) ---------
def init_params(key):
    ks = jax.random.split(key, 8)
    bias_value = float(-jnp.log((1.0 - 0.01) / 0.01))

    # clsnet_weights: synthesized (the original loads a .pth), then normalized
    # exactly as in __init__: subtract column mean, divide by column std (unbiased).
    raw = jax.random.normal(ks[0], (C_CLSNET, D), jnp.float32)
    cw = raw - raw.mean(axis=0, keepdims=True)
    cw = cw / jnp.std(cw, axis=0, ddof=1, keepdims=True)

    return dict(
        clsnet_weights=cw,
        clsnet_inds=jnp.arange(0, C_CLSNET, C_CLSNET // N_COMMON, dtype=jnp.int32),
        # wtn_enc: Linear(no bias), GroupNorm(w=0, b=0), LeakyReLU, Linear(bias=0)
        # (enc GN weight==0 is intentional: it matches the original module's init)
        enc_lin1_w=jax.random.normal(ks[1], (D, D), jnp.float32) / jnp.sqrt(D),
        enc_gn_gamma=jnp.zeros((D,), jnp.float32),
        enc_gn_beta=jnp.zeros((D,), jnp.float32),
        enc_lin2_w=jax.random.normal(ks[2], (D, D), jnp.float32) / jnp.sqrt(D),
        enc_lin2_b=jnp.zeros((D,), jnp.float32),
        # wtn_dec: Linear(no bias), GroupNorm(w=1, b=0), LeakyReLU, Linear(std=1e-3, bias=0)
        dec_lin1_w=jax.random.normal(ks[3], (D, D), jnp.float32) / jnp.sqrt(D),
        dec_gn_gamma=jnp.ones((D,), jnp.float32),
        dec_gn_beta=jnp.zeros((D,), jnp.float32),
        dec_lin2_w=jax.random.normal(ks[4], (D, D), jnp.float32) * 1e-3,
        dec_lin2_b=jnp.zeros((D,), jnp.float32),
        # cls_score / bbox_pred / common_bias
        cls_w=jax.random.normal(ks[5], (NUM_CLASSES - N_COMMON, D), jnp.float32) * 1e-3,
        cls_b=jnp.full((NUM_CLASSES - N_COMMON,), bias_value, jnp.float32),
        bbox_w=jax.random.normal(ks[6], (NUM_BBOX_CLS * 4, D), jnp.float32) * 1e-3,
        bbox_b=jnp.zeros((NUM_BBOX_CLS * 4,), jnp.float32),
        common_bias=jnp.array(bias_value, jnp.float32),
    )


# ---------------- one-time layout / dtype packing (hoisted out of forward) --
def prepack_params(p):
    ncommon = int(p['clsnet_inds'].shape[0])
    ncp = _round_up(ncommon, 128)                 # common-scores slab width (lane aligned)
    n_cls_rest = NUM_CLASSES - ncommon
    nbbox = 4 * NUM_BBOX_CLS
    krest = _round_up(n_cls_rest + nbbox, 128)    # cls+bbox slab width
    nbb_pad = _round_up(nbbox, 128)               # bbox-only slab width (eval branch)

    # one-hot gather matrix for the common clsnet rows (zero rows in the padding)
    sel = jax.nn.one_hot(p['clsnet_inds'], C_CLSNET, dtype=jnp.float32)
    sel = jnp.pad(sel, ((0, ncp - ncommon), (0, 0))).astype(jnp.bfloat16)

    # fused cls_score + bbox_pred weight slab, pre-transposed and lane-padded
    hw_rest = jnp.zeros((D, krest), jnp.float32)
    hw_rest = hw_rest.at[:, :n_cls_rest].set(p['cls_w'].T)
    hw_rest = hw_rest.at[:, n_cls_rest:n_cls_rest + nbbox].set(p['bbox_w'].T)
    hb_rest = jnp.zeros((1, krest), jnp.float32)
    hb_rest = hb_rest.at[0, :n_cls_rest].set(p['cls_b'])
    hb_rest = hb_rest.at[0, n_cls_rest:n_cls_rest + nbbox].set(p['bbox_b'])

    # bbox-only slab for the eval branch
    hw_bbox = jnp.zeros((D, nbb_pad), jnp.float32).at[:, :nbbox].set(p['bbox_w'].T)
    hb_bbox = jnp.zeros((1, nbb_pad), jnp.float32).at[0, :nbbox].set(p['bbox_b'])

    # GroupNorm group-sum matrix [D, G] and its transpose [G, D]
    grp_of_ch = jnp.arange(D) // GSIZE
    s_grp = (grp_of_ch[:, None] == jnp.arange(NUM_GROUPS)[None, :]).astype(jnp.float32)

    return dict(
        clsnet_weights=p['clsnet_weights'],                        # f32 (loss + GN in f32)
        enc_w1t=p['enc_lin1_w'].T.astype(jnp.bfloat16),
        enc_gamma=p['enc_gn_gamma'][None, :], enc_beta=p['enc_gn_beta'][None, :],
        enc_w2t=p['enc_lin2_w'].T.astype(jnp.bfloat16),
        enc_b2=p['enc_lin2_b'][None, :],
        dec_w1t=p['dec_lin1_w'].T.astype(jnp.bfloat16),
        dec_gamma=p['dec_gn_gamma'][None, :], dec_beta=p['dec_gn_beta'][None, :],
        dec_w2t=p['dec_lin2_w'].T.astype(jnp.bfloat16),
        dec_b2=p['dec_lin2_b'][None, :],
        sel_common=sel,
        hw_rest=hw_rest.astype(jnp.bfloat16), hb_rest=hb_rest,
        hw_bbox=hw_bbox.astype(jnp.bfloat16), hb_bbox=hb_bbox,
        hb_common=jnp.full((1, ncp), p['common_bias'], jnp.float32),
        s_grp=s_grp, st_grp=s_grp.T,
        common_bias=p['common_bias'],
    )


_COMPILER_PARAMS = pltpu.CompilerParams(
    dimension_semantics=("arbitrary",),
    vmem_limit_bytes=48 * 1024 * 1024,
)


# ---------------- forward passes (both branches of FPNPredictor.forward) ----
def fpn_predictor_forward_train(x, pp):
    """training / (clsnet_inds is None) branch — one fused pallas_call."""
    N = x.shape[0]
    n_pad = _round_up(N, 8)
    if n_pad != N:                                 # sublane-aligned output rows
        x = jnp.pad(x, ((0, n_pad - N), (0, 0)))

    ncp = pp['sel_common'].shape[0]
    krest = pp['hw_rest'].shape[1]
    n_cls_rest = NUM_CLASSES - N_COMMON
    nbbox = 4 * NUM_BBOX_CLS

    args = (pp['clsnet_weights'],
            pp['enc_w1t'], pp['enc_gamma'], pp['enc_beta'], pp['enc_w2t'], pp['enc_b2'],
            pp['dec_w1t'], pp['dec_gamma'], pp['dec_beta'], pp['dec_w2t'], pp['dec_b2'],
            x, pp['sel_common'], pp['hw_rest'], pp['hb_rest'], pp['hb_common'],
            pp['s_grp'], pp['st_grp'])

    com, rest, loss = pl.pallas_call(
        _train_kernel,
        out_shape=(jax.ShapeDtypeStruct((n_pad, ncp), jnp.float32),
                   jax.ShapeDtypeStruct((n_pad, krest), jnp.float32),
                   jax.ShapeDtypeStruct((1, 1), jnp.float32)),
        grid=(1,),
        in_specs=[_full_spec(a.shape) for a in args],
        out_specs=(_full_spec((n_pad, ncp)), _full_spec((n_pad, krest)),
                   _full_spec((1, 1))),
        compiler_params=_COMPILER_PARAMS,
    )(*args)

    scores = jnp.concatenate([com[:N, :N_COMMON], rest[:N, :n_cls_rest]], axis=1)
    bbox_deltas = rest[:N, n_cls_rest:n_cls_rest + nbbox]
    return scores, bbox_deltas, loss[0, 0] * RECONST_W


def fpn_predictor_forward_eval(x, pp, clsnet_inds):
    """inference branch (clsnet_inds is not None) — one fused pallas_call."""
    N = x.shape[0]
    n_pad = _round_up(N, 8)
    if n_pad != N:
        x = jnp.pad(x, ((0, n_pad - N), (0, 0)))

    k_eval = clsnet_inds.shape[0]
    kcp = _round_up(k_eval, 128)
    nbbox = 4 * NUM_BBOX_CLS
    nbb_pad = pp['hw_bbox'].shape[1]

    # runtime index set -> one-hot gather matrix (tiny, built per call by XLA)
    sel = jax.nn.one_hot(clsnet_inds, C_CLSNET, dtype=jnp.float32)
    sel = jnp.pad(sel, ((0, kcp - k_eval), (0, 0))).astype(jnp.bfloat16)
    hb_common = jnp.full((1, kcp), pp['common_bias'], jnp.float32)

    args = (pp['clsnet_weights'],
            pp['enc_w1t'], pp['enc_gamma'], pp['enc_beta'], pp['enc_w2t'], pp['enc_b2'],
            x, sel, pp['hw_bbox'], pp['hb_bbox'], hb_common,
            pp['s_grp'], pp['st_grp'])

    com, bbox = pl.pallas_call(
        _eval_kernel,
        out_shape=(jax.ShapeDtypeStruct((n_pad, kcp), jnp.float32),
                   jax.ShapeDtypeStruct((n_pad, nbb_pad), jnp.float32)),
        grid=(1,),
        in_specs=[_full_spec(a.shape) for a in args],
        out_specs=(_full_spec((n_pad, kcp)), _full_spec((n_pad, nbb_pad))),
        compiler_params=_COMPILER_PARAMS,
    )(*args)

    scores = com[:N, :k_eval]
    bbox_deltas = bbox[:N, :nbbox]
    return scores, bbox_deltas, None


if __name__ == "__main__":
    key = jax.random.PRNGKey(0)
    pkey, xkey = jax.random.split(key)
    params = init_params(pkey)
    pp = prepack_params(params)          # one-time layout/dtype packing (hoisted)
    x = jax.random.normal(xkey, (N_PROPOSALS, D), jnp.float32)

    scores, bbox, loss = jax.jit(fpn_predictor_forward_train)(x, pp)
    jax.block_until_ready((scores, bbox, loss))
    assert scores.shape == (N_PROPOSALS, NUM_CLASSES)
    assert bbox.shape == (N_PROPOSALS, NUM_BBOX_CLS * 4)
    assert loss.shape == ()

    e_scores, e_bbox, _ = jax.jit(fpn_predictor_forward_eval)(
        x, pp, params['clsnet_inds'])
    jax.block_until_ready((e_scores, e_bbox))
    assert e_scores.shape == (N_PROPOSALS, N_COMMON)
    assert e_bbox.shape == (N_PROPOSALS, NUM_BBOX_CLS * 4)

    print("KERNEL_OK")
</pallas_src>

<mosaic_0001>
module attributes {stable_mosaic.version = 11 : i64} {
  func.func @_train_kernel(%arg0: i32, %arg1: memref<64x256xf32, #tpu.memory_space<vmem>>, %arg2: memref<256x256xbf16, #tpu.memory_space<vmem>>, %arg3: memref<1x256xf32, #tpu.memory_space<vmem>>, %arg4: memref<1x256xf32, #tpu.memory_space<vmem>>, %arg5: memref<256x256xbf16, #tpu.memory_space<vmem>>, %arg6: memref<1x256xf32, #tpu.memory_space<vmem>>, %arg7: memref<256x256xbf16, #tpu.memory_space<vmem>>, %arg8: memref<1x256xf32, #tpu.memory_space<vmem>>, %arg9: memref<1x256xf32, #tpu.memory_space<vmem>>, %arg10: memref<256x256xbf16, #tpu.memory_space<vmem>>, %arg11: memref<1x256xf32, #tpu.memory_space<vmem>>, %arg12: memref<8x256xf32, #tpu.memory_space<vmem>>, %arg13: memref<128x64xbf16, #tpu.memory_space<vmem>>, %arg14: memref<256x256xbf16, #tpu.memory_space<vmem>>, %arg15: memref<1x256xf32, #tpu.memory_space<vmem>>, %arg16: memref<1x128xf32, #tpu.memory_space<vmem>>, %arg17: memref<256x8xf32, #tpu.memory_space<vmem>>, %arg18: memref<8x256xf32, #tpu.memory_space<vmem>>, %arg19: memref<8x128xf32, #tpu.memory_space<vmem>>, %arg20: memref<8x256xf32, #tpu.memory_space<vmem>>, %arg21: memref<1x1xf32, #tpu.memory_space<vmem>>) attributes {dimension_semantics = [#tpu.dimension_semantics<arbitrary>], iteration_bounds = array<i64: 1>, scalar_prefetch = 0 : i64, scratch_operands = 0 : i64, tpu.core_type = #tpu.core_type<tc>, window_params = [{pipeline_mode = #tpu.pipeline_mode<synchronous>, transform_indices = @transform_0, window_bounds = array<i64: 64, 256>}, {pipeline_mode = #tpu.pipeline_mode<synchronous>, transform_indices = @transform_1, window_bounds = array<i64: 256, 256>}, {pipeline_mode = #tpu.pipeline_mode<synchronous>, transform_indices = @transform_2, window_bounds = array<i64: 1, 256>}, {pipeline_mode = #tpu.pipeline_mode<synchronous>, transform_indices = @transform_3, window_bounds = array<i64: 1, 256>}, {pipeline_mode = #tpu.pipeline_mode<synchronous>, transform_indices = @transform_4, window_bounds = array<i64: 256, 256>}, {pipeline_mode = #tpu.pipeline_mode<synchronous>, transform_indices = @transform_5, window_bounds = array<i64: 1, 256>}, {pipeline_mode = #tpu.pipeline_mode<synchronous>, transform_indices = @transform_6, window_bounds = array<i64: 256, 256>}, {pipeline_mode = #tpu.pipeline_mode<synchronous>, transform_indices = @transform_7, window_bounds = array<i64: 1, 256>}, {pipeline_mode = #tpu.pipeline_mode<synchronous>, transform_indices = @transform_8, window_bounds = array<i64: 1, 256>}, {pipeline_mode = #tpu.pipeline_mode<synchronous>, transform_indices = @transform_9, window_bounds = array<i64: 256, 256>}, {pipeline_mode = #tpu.pipeline_mode<synchronous>, transform_indices = @transform_10, window_bounds = array<i64: 1, 256>}, {pipeline_mode = #tpu.pipeline_mode<synchronous>, transform_indices = @transform_11, window_bounds = array<i64: 8, 256>}, {pipeline_mode = #tpu.pipeline_mode<synchronous>, transform_indices = @transform_12, window_bounds = array<i64: 128, 64>}, {pipeline_mode = #tpu.pipeline_mode<synchronous>, transform_indices = @transform_13, window_bounds = array<i64: 256, 256>}, {pipeline_mode = #tpu.pipeline_mode<synchronous>, transform_indices = @transform_14, window_bounds = array<i64: 1, 256>}, {pipeline_mode = #tpu.pipeline_mode<synchronous>, transform_indices = @transform_15, window_bounds = array<i64: 1, 128>}, {pipeline_mode = #tpu.pipeline_mode<synchronous>, transform_indices = @transform_16, window_bounds = array<i64: 256, 8>}, {pipeline_mode = #tpu.pipeline_mode<synchronous>, transform_indices = @transform_17, window_bounds = array<i64: 8, 256>}, {pipeline_mode = #tpu.pipeline_mode<synchronous>, transform_indices = @transform_18, window_bounds = array<i64: 8, 128>}, {pipeline_mode = #tpu.pipeline_mode<synchronous>, transform_indices = @transform_19, window_bounds = array<i64: 8, 256>}, {pipeline_mode = #tpu.pipeline_mode<synchronous>, transform_indices = @transform_20, window_bounds = array<i64: 1, 1>}]} {
    %c0 = arith.constant 0 : index
    %c0_0 = arith.constant 0 : index
    %0 = vector.load %arg17[%c0, %c0_0] : memref<256x8xf32, #tpu.memory_space<vmem>>, vector<256x8xf32>
    %c0_1 = arith.constant 0 : index
    %c0_2 = arith.constant 0 : index
    %1 = vector.load %arg18[%c0_1, %c0_2] : memref<8x256xf32, #tpu.memory_space<vmem>>, vector<8x256xf32>
    %c0_3 = arith.constant 0 : index
    %c0_4 = arith.constant 0 : index
    %2 = vector.load %arg1[%c0_3, %c0_4] : memref<64x256xf32, #tpu.memory_space<vmem>>, vector<64x256xf32>
    %3 = arith.truncf %2 : vector<64x256xf32> to vector<64x256xbf16>
    %c0_5 = arith.constant 0 : index
    %c0_6 = arith.constant 0 : index
    %4 = vector.load %arg2[%c0_5, %c0_6] : memref<256x256xbf16, #tpu.memory_space<vmem>>, vector<256x256xbf16>
    %cst = arith.constant dense<0.000000e+00> : vector<64x256xf32>
    %5 = tpu.matmul %3, %4, %cst {dimension_numbers = #tpu.dot_dimension_numbers<[1], [0], [0], [1], [0, 0, 1, 1], [], []>} : vector<64x256xbf16>, vector<256x256xbf16>, vector<64x256xf32> -> vector<64x256xf32>
    %cst_7 = arith.constant dense<0.000000e+00> : vector<64x8xf32>
    %6 = tpu.matmul %5, %0, %cst_7 {dimension_numbers = #tpu.dot_dimension_numbers<[1], [0], [0], [1], [0, 0, 1, 1], [], []>} : vector<64x256xf32>, vector<256x8xf32>, vector<64x8xf32> -> vector<64x8xf32>
    %cst_8 = arith.constant dense<0.000000e+00> : vector<64x256xf32>
    %7 = tpu.matmul %6, %1, %cst_8 {dimension_numbers = #tpu.dot_dimension_numbers<[1], [0], [0], [1], [0, 0, 1, 1], [], []>} : vector<64x8xf32>, vector<8x256xf32>, vector<64x256xf32> -> vector<64x256xf32>
    %cst_9 = arith.constant 3.125000e-02 : f32
    %8 = vector.broadcast %cst_9 : f32 to vector<64x256xf32>
    %9 = arith.mulf %7, %8 : vector<64x256xf32>
    %10 = arith.subf %5, %9 : vector<64x256xf32>
    %11 = arith.mulf %10, %10 : vector<64x256xf32>
    %cst_10 = arith.constant dense<0.000000e+00> : vector<64x8xf32>
    %12 = tpu.matmul %11, %0, %cst_10 {dimension_numbers = #tpu.dot_dimension_numbers<[1], [0], [0], [1], [0, 0, 1, 1], [], []>} : vector<64x256xf32>, vector<256x8xf32>, vector<64x8xf32> -> vector<64x8xf32>
    %cst_11 = arith.constant dense<0.000000e+00> : vector<64x256xf32>
    %13 = tpu.matmul %12, %1, %cst_11 {dimension_numbers = #tpu.dot_dimension_numbers<[1], [0], [0], [1], [0, 0, 1, 1], [], []>} : vector<64x8xf32>, vector<8x256xf32>, vector<64x256xf32> -> vector<64x256xf32>
    %cst_12 = arith.constant 3.125000e-02 : f32
    %14 = vector.broadcast %cst_12 : f32 to vector<64x256xf32>
    %15 = arith.mulf %13, %14 : vector<64x256xf32>
    %cst_13 = arith.constant 9.99999974E-6 : f32
    %16 = vector.broadcast %cst_13 : f32 to vector<64x256xf32>
    %17 = arith.addf %15, %16 : vector<64x256xf32>
    %18 = math.rsqrt %17 : vector<64x256xf32>
    %19 = arith.mulf %10, %18 : vector<64x256xf32>
    %c0_14 = arith.constant 0 : index
    %c0_15 = arith.constant 0 : index
    %20 = vector.load %arg3[%c0_14, %c0_15] : memref<1x256xf32, #tpu.memory_space<vmem>>, vector<1x256xf32>
    %21 = vector.broadcast %20 : vector<1x256xf32> to vector<64x256xf32>
    %22 = arith.mulf %19, %21 : vector<64x256xf32>
    %c0_16 = arith.constant 0 : index
    %c0_17 = arith.constant 0 : index
    %23 = vector.load %arg4[%c0_16, %c0_17] : memref<1x256xf32, #tpu.memory_space<vmem>>, vector<1x256xf32>
    %24 = vector.broadcast %23 : vector<1x256xf32> to vector<64x256xf32>
    %25 = arith.addf %22, %24 : vector<64x256xf32>
    %cst_18 = arith.constant 0.000000e+00 : f32
    %26 = vector.broadcast %cst_18 : f32 to vector<64x256xf32>
    %27 = arith.cmpf oge, %25, %26 : vector<64x256xf32>
    %cst_19 = arith.constant 0.00999999977 : f32
    %28 = vector.broadcast %cst_19 : f32 to vector<64x256xf32>
    %29 = arith.mulf %28, %25 : vector<64x256xf32>
    %30 = arith.select %27, %25, %29 : vector<64x256xi1>, vector<64x256xf32>
    %31 = arith.truncf %30 : vector<64x256xf32> to vector<64x256xbf16>
    %c0_20 = arith.constant 0 : index
    %c0_21 = arith.constant 0 : index
    %32 = vector.load %arg5[%c0_20, %c0_21] : memref<256x256xbf16, #tpu.memory_space<vmem>>, vector<256x256xbf16>
    %cst_22 = arith.constant dense<0.000000e+00> : vector<64x256xf32>
    %33 = tpu.matmul %31, %32, %cst_22 {dimension_numbers = #tpu.dot_dimension_numbers<[1], [0], [0], [1], [0, 0, 1, 1], [], []>} : vector<64x256xbf16>, vector<256x256xbf16>, vector<64x256xf32> -> vector<64x256xf32>
    %c0_23 = arith.constant 0 : index
    %c0_24 = arith.constant 0 : index
    %34 = vector.load %arg6[%c0_23, %c0_24] : memref<1x256xf32, #tpu.memory_space<vmem>>, vector<1x256xf32>
    %35 = vector.broadcast %34 : vector<1x256xf32> to vector<64x256xf32>
    %36 = arith.addf %33, %35 : vector<64x256xf32>
    %37 = arith.truncf %36 : vector<64x256xf32> to vector<64x256xbf16>
    %c0_25 = arith.constant 0 : index
    %c0_26 = arith.constant 0 : index
    %38 = vector.load %arg7[%c0_25, %c0_26] : memref<256x256xbf16, #tpu.memory_space<vmem>>, vector<256x256xbf16>
    %cst_27 = arith.constant dense<0.000000e+00> : vector<64x256xf32>
    %39 = tpu.matmul %37, %38, %cst_27 {dimension_numbers = #tpu.dot_dimension_numbers<[1], [0], [0], [1], [0, 0, 1, 1], [], []>} : vector<64x256xbf16>, vector<256x256xbf16>, vector<64x256xf32> -> vector<64x256xf32>
    %cst_28 = arith.constant dense<0.000000e+00> : vector<64x8xf32>
    %40 = tpu.matmul %39, %0, %cst_28 {dimension_numbers = #tpu.dot_dimension_numbers<[1], [0], [0], [1], [0, 0, 1, 1], [], []>} : vector<64x256xf32>, vector<256x8xf32>, vector<64x8xf32> -> vector<64x8xf32>
    %cst_29 = arith.constant dense<0.000000e+00> : vector<64x256xf32>
    %41 = tpu.matmul %40, %1, %cst_29 {dimension_numbers = #tpu.dot_dimension_numbers<[1], [0], [0], [1], [0, 0, 1, 1], [], []>} : vector<64x8xf32>, vector<8x256xf32>, vector<64x256xf32> -> vector<64x256xf32>
    %cst_30 = arith.constant 3.125000e-02 : f32
    %42 = vector.broadcast %cst_30 : f32 to vector<64x256xf32>
    %43 = arith.mulf %41, %42 : vector<64x256xf32>
    %44 = arith.subf %39, %43 : vector<64x256xf32>
    %45 = arith.mulf %44, %44 : vector<64x256xf32>
    %cst_31 = arith.constant dense<0.000000e+00> : vector<64x8xf32>
    %46 = tpu.matmul %45, %0, %cst_31 {dimension_numbers = #tpu.dot_dimension_numbers<[1], [0], [0], [1], [0, 0, 1, 1], [], []>} : vector<64x256xf32>, vector<256x8xf32>, vector<64x8xf32> -> vector<64x8xf32>
    %cst_32 = arith.constant dense<0.000000e+00> : vector<64x256xf32>
    %47 = tpu.matmul %46, %1, %cst_32 {dimension_numbers = #tpu.dot_dimension_numbers<[1], [0], [0], [1], [0, 0, 1, 1], [], []>} : vector<64x8xf32>, vector<8x256xf32>, vector<64x256xf32> -> vector<64x256xf32>
    %cst_33 = arith.constant 3.125000e-02 : f32
    %48 = vector.broadcast %cst_33 : f32 to vector<64x256xf32>
    %49 = arith.mulf %47, %48 : vector<64x256xf32>
    %cst_34 = arith.constant 9.99999974E-6 : f32
    %50 = vector.broadcast %cst_34 : f32 to vector<64x256xf32>
    %51 = arith.addf %49, %50 : vector<64x256xf32>
    %52 = math.rsqrt %51 : vector<64x256xf32>
    %53 = arith.mulf %44, %52 : vector<64x256xf32>
    %c0_35 = arith.constant 0 : index
    %c0_36 = arith.constant 0 : index
    %54 = vector.load %arg8[%c0_35, %c0_36] : memref<1x256xf32, #tpu.memory_space<vmem>>, vector<1x256xf32>
    %55 = vector.broadcast %54 : vector<1x256xf32> to vector<64x256xf32>
    %56 = arith.mulf %53, %55 : vector<64x256xf32>
    %c0_37 = arith.constant 0 : index
    %c0_38 = arith.constant 0 : index
    %57 = vector.load %arg9[%c0_37, %c0_38] : memref<1x256xf32, #tpu.memory_space<vmem>>, vector<1x256xf32>
    %58 = vector.broadcast %57 : vector<1x256xf32> to vector<64x256xf32>
    %59 = arith.addf %56, %58 : vector<64x256xf32>
    %cst_39 = arith.constant 0.000000e+00 : f32
    %60 = vector.broadcast %cst_39 : f32 to vector<64x256xf32>
    %61 = arith.cmpf oge, %59, %60 : vector<64x256xf32>
    %cst_40 = arith.constant 0.00999999977 : f32
    %62 = vector.broadcast %cst_40 : f32 to vector<64x256xf32>
    %63 = arith.mulf %62, %59 : vector<64x256xf32>
    %64 = arith.select %61, %59, %63 : vector<64x256xi1>, vector<64x256xf32>
    %65 = arith.truncf %64 : vector<64x256xf32> to vector<64x256xbf16>
    %c0_41 = arith.constant 0 : index
    %c0_42 = arith.constant 0 : index
    %66 = vector.load %arg10[%c0_41, %c0_42] : memref<256x256xbf16, #tpu.memory_space<vmem>>, vector<256x256xbf16>
    %cst_43 = arith.constant dense<0.000000e+00> : vector<64x256xf32>
    %67 = tpu.matmul %65, %66, %cst_43 {dimension_numbers = #tpu.dot_dimension_numbers<[1], [0], [0], [1], [0, 0, 1, 1], [], []>} : vector<64x256xbf16>, vector<256x256xbf16>, vector<64x256xf32> -> vector<64x256xf32>
    %c0_44 = arith.constant 0 : index
    %c0_45 = arith.constant 0 : index
    %68 = vector.load %arg11[%c0_44, %c0_45] : memref<1x256xf32, #tpu.memory_space<vmem>>, vector<1x256xf32>
    %69 = vector.broadcast %68 : vector<1x256xf32> to vector<64x256xf32>
    %70 = arith.addf %67, %69 : vector<64x256xf32>
    %71 = arith.subf %70, %2 : vector<64x256xf32>
    %72 = arith.mulf %71, %71 : vector<64x256xf32>
    %73 = vector.shape_cast %72 : vector<64x256xf32> to vector<1x64x256xf32>
    %cst_46 = arith.constant dense<0.000000e+00> : vector<1xf32>
    %74 = vector.multi_reduction <add>, %73, %cst_46 [1, 2] : vector<1x64x256xf32> to vector<1xf32>
    %75 = vector.shape_cast %74 : vector<1xf32> to vector<1x1x1xf32>
    %76 = vector.extract %75[0, 0, 0] : f32 from vector<1x1x1xf32>
    %cst_47 = arith.constant 1.638400e+04 : f32
    %77 = arith.divf %76, %cst_47 : f32
    %78 = vector.broadcast %77 : f32 to vector<1x1xf32>
    %c0_48 = arith.constant 0 : index
    %c0_49 = arith.constant 0 : index
    %79 = vector.load %arg21[%c0_48, %c0_49] : memref<1x1xf32, #tpu.memory_space<vmem>>, vector<1x1xf32>
    tpu.vector_store %arg21[%c0_48, %c0_49], %78 {strides = array<i32>} : memref<1x1xf32, #tpu.memory_space<vmem>>, vector<1x1xf32>,
    %c0_50 = arith.constant 0 : index
    %c0_51 = arith.constant 0 : index
    %80 = vector.load %arg12[%c0_50, %c0_51] : memref<8x256xf32, #tpu.memory_space<vmem>>, vector<8x256xf32>
    %81 = arith.truncf %80 : vector<8x256xf32> to vector<8x256xbf16>
    %c0_52 = arith.constant 0 : index
    %c0_53 = arith.constant 0 : index
    %82 = vector.load %arg13[%c0_52, %c0_53] : memref<128x64xbf16, #tpu.memory_space<vmem>>, vector<128x64xbf16>
    %cst_54 = arith.constant dense<0.000000e+00> : vector<128x256xf32>
    %83 = tpu.matmul %82, %37, %cst_54 {dimension_numbers = #tpu.dot_dimension_numbers<[1], [0], [0], [1], [0, 0, 1, 1], [], []>} : vector<128x64xbf16>, vector<64x256xbf16>, vector<128x256xf32> -> vector<128x256xf32>
    %84 = arith.truncf %83 : vector<128x256xf32> to vector<128x256xbf16>
    %cst_55 = arith.constant dense<0.000000e+00> : vector<8x128xf32>
    %85 = tpu.matmul %81, %84, %cst_55 {dimension_numbers = #tpu.dot_dimension_numbers<[1], [1], [0], [0], [0, 0, 1, 0], [], []>} : vector<8x256xbf16>, vector<128x256xbf16>, vector<8x128xf32> -> vector<8x128xf32>
    %c0_56 = arith.constant 0 : index
    %c0_57 = arith.constant 0 : index
    %86 = vector.load %arg16[%c0_56, %c0_57] : memref<1x128xf32, #tpu.memory_space<vmem>>, vector<1x128xf32>
    %87 = vector.broadcast %86 : vector<1x128xf32> to vector<8x128xf32>
    %88 = arith.addf %85, %87 : vector<8x128xf32>
    %c0_58 = arith.constant 0 : index
    %c0_59 = arith.constant 0 : index
    %89 = vector.load %arg19[%c0_58, %c0_59] : memref<8x128xf32, #tpu.memory_space<vmem>>, vector<8x128xf32>
    tpu.vector_store %arg19[%c0_58, %c0_59], %88 {strides = array<i32>} : memref<8x128xf32, #tpu.memory_space<vmem>>, vector<8x128xf32>,
    %c0_60 = arith.constant 0 : index
    %c0_61 = arith.constant 0 : index
    %90 = vector.load %arg14[%c0_60, %c0_61] : memref<256x256xbf16, #tpu.memory_space<vmem>>, vector<256x256xbf16>
    %cst_62 = arith.constant dense<0.000000e+00> : vector<8x256xf32>
    %91 = tpu.matmul %81, %90, %cst_62 {dimension_numbers = #tpu.dot_dimension_numbers<[1], [0], [0], [1], [0, 0, 1, 1], [], []>} : vector<8x256xbf16>, vector<256x256xbf16>, vector<8x256xf32> -> vector<8x256xf32>
    %c0_63 = arith.constant 0 : index
    %c0_64 = arith.constant 0 : index
    %92 = vector.load %arg15[%c0_63, %c0_64] : memref<1x256xf32, #tpu.memory_space<vmem>>, vector<1x256xf32>
    %93 = vector.broadcast %92 : vector<1x256xf32> to vector<8x256xf32>
    %94 = arith.addf %91, %93 : vector<8x256xf32>
    %c0_65 = arith.constant 0 : index
    %c0_66 = arith.constant 0 : index
    %95 = vector.load %arg20[%c0_65, %c0_66] : memref<8x256xf32, #tpu.memory_space<vmem>>, vector<8x256xf32>
    tpu.vector_store %arg20[%c0_65, %c0_66], %94 {strides = array<i32>} : memref<8x256xf32, #tpu.memory_space<vmem>>, vector<8x256xf32>,
    return
  }
  func.func @transform_0(%arg0: i32) -> (i32, i32) {
    %c0_i32 = arith.constant 0 : i32
    %c0_i32_0 = arith.constant 0 : i32
    %c0_i32_1 = arith.constant 0 : i32
    return %c0_i32, %c0_i32_0 : i32, i32
  }
  func.func @transform_1(%arg0: i32) -> (i32, i32) {
    %c0_i32 = arith.constant 0 : i32
    %c0_i32_0 = arith.constant 0 : i32
    %c0_i32_1 = arith.constant 0 : i32
    return %c0_i32, %c0_i32_0 : i32, i32
  }
  func.func @transform_2(%arg0: i32) -> (i32, i32) {
    %c0_i32 = arith.constant 0 : i32
    %c0_i32_0 = arith.constant 0 : i32
    %c0_i32_1 = arith.constant 0 : i32
    return %c0_i32, %c0_i32_0 : i32, i32
  }
  func.func @transform_3(%arg0: i32) -> (i32, i32) {
    %c0_i32 = arith.constant 0 : i32
    %c0_i32_0 = arith.constant 0 : i32
    %c0_i32_1 = arith.constant 0 : i32
    return %c0_i32, %c0_i32_0 : i32, i32
  }
  func.func @transform_4(%arg0: i32) -> (i32, i32) {
    %c0_i32 = arith.constant 0 : i32
    %c0_i32_0 = arith.constant 0 : i32
    %c0_i32_1 = arith.constant 0 : i32
    return %c0_i32, %c0_i32_0 : i32, i32
  }
  func.func @transform_5(%arg0: i32) -> (i32, i32) {
    %c0_i32 = arith.constant 0 : i32
    %c0_i32_0 = arith.constant 0 : i32
    %c0_i32_1 = arith.constant 0 : i32
    return %c0_i32, %c0_i32_0 : i32, i32
  }
  func.func @transform_6(%arg0: i32) -> (i32, i32) {
    %c0_i32 = arith.constant 0 : i32
    %c0_i32_0 = arith.constant 0 : i32
    %c0_i32_1 = arith.constant 0 : i32
    return %c0_i32, %c0_i32_0 : i32, i32
  }
  func.func @transform_7(%arg0: i32) -> (i32, i32) {
    %c0_i32 = arith.constant 0 : i32
    %c0_i32_0 = arith.constant 0 : i32
    %c0_i32_1 = arith.constant 0 : i32
    return %c0_i32, %c0_i32_0 : i32, i32
  }
  func.func @transform_8(%arg0: i32) -> (i32, i32) {
    %c0_i32 = arith.constant 0 : i32
    %c0_i32_0 = arith.constant 0 : i32
    %c0_i32_1 = arith.constant 0 : i32
    return %c0_i32, %c0_i32_0 : i32, i32
  }
  func.func @transform_9(%arg0: i32) -> (i32, i32) {
    %c0_i32 = arith.constant 0 : i32
    %c0_i32_0 = arith.constant 0 : i32
    %c0_i32_1 = arith.constant 0 : i32
    return %c0_i32, %c0_i32_0 : i32, i32
  }
  func.func @transform_10(%arg0: i32) -> (i32, i32) {
    %c0_i32 = arith.constant 0 : i32
    %c0_i32_0 = arith.constant 0 : i32
    %c0_i32_1 = arith.constant 0 : i32
    return %c0_i32, %c0_i32_0 : i32, i32
  }
  func.func @transform_11(%arg0: i32) -> (i32, i32) {
    %c0_i32 = arith.constant 0 : i32
    %c0_i32_0 = arith.constant 0 : i32
    %c0_i32_1 = arith.constant 0 : i32
    return %c0_i32, %c0_i32_0 : i32, i32
  }
  func.func @transform_12(%arg0: i32) -> (i32, i32) {
    %c0_i32 = arith.constant 0 : i32
    %c0_i32_0 = arith.constant 0 : i32
    %c0_i32_1 = arith.constant 0 : i32
    return %c0_i32, %c0_i32_0 : i32, i32
  }
  func.func @transform_13(%arg0: i32) -> (i32, i32) {
    %c0_i32 = arith.constant 0 : i32
    %c0_i32_0 = arith.constant 0 : i32
    %c0_i32_1 = arith.constant 0 : i32
    return %c0_i32, %c0_i32_0 : i32, i32
  }
  func.func @transform_14(%arg0: i32) -> (i32, i32) {
    %c0_i32 = arith.constant 0 : i32
    %c0_i32_0 = arith.constant 0 : i32
    %c0_i32_1 = arith.constant 0 : i32
    return %c0_i32, %c0_i32_0 : i32, i32
  }
  func.func @transform_15(%arg0: i32) -> (i32, i32) {
    %c0_i32 = arith.constant 0 : i32
    %c0_i32_0 = arith.constant 0 : i32
    %c0_i32_1 = arith.constant 0 : i32
    return %c0_i32, %c0_i32_0 : i32, i32
  }
  func.func @transform_16(%arg0: i32) -> (i32, i32) {
    %c0_i32 = arith.constant 0 : i32
    %c0_i32_0 = arith.constant 0 : i32
    %c0_i32_1 = arith.constant 0 : i32
    return %c0_i32, %c0_i32_0 : i32, i32
  }
  func.func @transform_17(%arg0: i32) -> (i32, i32) {
    %c0_i32 = arith.constant 0 : i32
    %c0_i32_0 = arith.constant 0 : i32
    %c0_i32_1 = arith.constant 0 : i32
    return %c0_i32, %c0_i32_0 : i32, i32
  }
  func.func @transform_18(%arg0: i32) -> (i32, i32) {
    %c0_i32 = arith.constant 0 : i32
    %c0_i32_0 = arith.constant 0 : i32
    %c0_i32_1 = arith.constant 0 : i32
    return %c0_i32, %c0_i32_0 : i32, i32
  }
  func.func @transform_19(%arg0: i32) -> (i32, i32) {
    %c0_i32 = arith.constant 0 : i32
    %c0_i32_0 = arith.constant 0 : i32
    %c0_i32_1 = arith.constant 0 : i32
    return %c0_i32, %c0_i32_0 : i32, i32
  }
  func.func @transform_20(%arg0: i32) -> (i32, i32) {
    %c0_i32 = arith.constant 0 : i32
    %c0_i32_0 = arith.constant 0 : i32
    %c0_i32_1 = arith.constant 0 : i32
    return %c0_i32, %c0_i32_0 : i32, i32
  }
}

</mosaic_0001>

<bundles_post_ra>
// kernel: fpn_predictor_forward_train.1
= control target key start
LH: loop header
LB: loop body
LE: loop exit
PB: predicated region body
PF: predicated region fallthrough
CT: control target
= control target key end

     0   :  { %s5852_s0 = inlined_call_operand.vmem [shape: f32[64,256], index: 0, kind: input, shape index: {}]   ;;  %s5853_s1 = inlined_call_operand.vmem [shape: bf16[256,256], index: 1, kind: input, shape index: {}]   ;;  %s5854_s2 = inlined_call_operand.vmem [shape: f32[1,256], index: 2, kind: input, shape index: {}]   ;;  %s5855_s3 = inlined_call_operand.hbm [shape: f32[1,256], index: 3, kind: input, shape index: {}]   ;;  %s5856_s4 = inlined_call_operand.hbm [shape: bf16[256,256], index: 4, kind: input, shape index: {}]   ;;  %s5857_s5 = inlined_call_operand.hbm [shape: f32[1,256], index: 5, kind: input, shape index: {}]   ;;  %s5858_s6 = inlined_call_operand.hbm [shape: bf16[256,256], index: 6, kind: input, shape index: {}]   ;;  %s5859_s7 = inlined_call_operand.hbm [shape: f32[1,256], index: 7, kind: input, shape index: {}]   ;;  %s5860_s8 = inlined_call_operand.hbm [shape: f32[1,256], index: 8, kind: input, shape index: {}]   ;;  %s5861_s9 = inlined_call_operand.hbm [shape: bf16[256,256], index: 9, kind: input, shape index: {}]   ;;  %s5862_s10 = inlined_call_operand.hbm [shape: f32[1,256], index: 10, kind: input, shape index: {}]   ;;  %s5863_s11 = inlined_call_operand.hbm [shape: f32[8,256], index: 11, kind: input, shape index: {}]   ;;  %s5864_s12 = inlined_call_operand.vmem [shape: bf16[128,64], index: 12, kind: input, shape index: {}]   ;;  %s5865_s13 = inlined_call_operand.hbm [shape: bf16[256,256], index: 13, kind: input, shape index: {}]   ;;  %s5866_s14 = inlined_call_operand.vmem [shape: f32[1,256], index: 14, kind: input, shape index: {}]   ;;  %s5867_s15 = inlined_call_operand.vmem [shape: f32[1,128], index: 15, kind: input, shape index: {}]   ;;  %s5868_s16 = inlined_call_operand.vmem [shape: f32[256,8], index: 16, kind: input, shape index: {}]   ;;  %s5869_s17 = inlined_call_operand.hbm [shape: f32[8,256], index: 17, kind: input, shape index: {}]   ;;  %s5870_s18 = inlined_call_operand.vmem [shape: f32[8,128], index: 18, kind: output, shape index: {0}]   ;;  %s5871_s19 = inlined_call_operand.vmem [shape: f32[8,256], index: 19, kind: output, shape index: {1}]   ;;  %s5872_s20 = inlined_call_operand.hbm [shape: f32[1,1], index: 20, kind: output, shape index: {2}]  }
   0x1   :  { %5875 = sst [smem:[#allocation28_spill]] %s5852_s0 }
   0x2   :  { %5876 = sst [smem:[#allocation29_spill]] %s5853_s1 }
   0x3   :  { %5877 = sst [smem:[#allocation30_spill]] %s5854_s2 }
   0x4   :  { %5878 = sst [smem:[#allocation31_spill]] %s5855_s3 }
   0x5   :  { %5879 = sst [smem:[#allocation32_spill]] %s5856_s4 }
   0x6   :  { %26 = vsyncpa [#allocation3], 0 }
   0x7   :  { %27 = vsyncpa [#allocation6], 0 }
   0x8   :  { %28 = vsyncpa [#allocation9], 0 }
   0x9   :  { %29 = vsyncpa [#allocation12], 0 }
   0xa   :  { %30 = vsyncpa [#allocation15], 0 }
   0xb   :  { %31 = vsyncpa [#allocation18], 0 }
   0xc   :  { %32 = vsyncpa [#allocation4], 0  ;;  %s4432_s1 = smov [#allocation5]  }
   0xd   :  { %s54_s22 = sshll.u32 %s4432_s1, 4  ;;  %s55_s22 = int_to_ptr.vmem [resolvable:$true] %s54_s22 }
   0xe   :  { %s4186_s23 = scalar_lea.vmem %s55_s22, 4096  ;;  %p4191_p1 = scmp.lt.s32.totalorder %s55_s22, %s55_s22 }
   0xf   :  { %p4187_p0 = scmp.ne.s32.totalorder %s55_s22, %s4186_s23  ;;  %p4192_p2 = scmp.lt.s32.totalorder %s4186_s23, %s4186_s23 }
  0x11   :  { %p4193_p3 = por %p4192_p2, %p4191_p1 }
  0x13   :  { %p4194_p4 = pnand %p4193_p3, %p4187_p0 }
  0x15   :  { %4197 = shalt.err (!%p4194_p4)
}
  0x16   :  { %s4433_s24 = smov 128   ;;  %s4434_s2 = smov 8  }
  0x17   :  { %s5880_s26 = sld [smem:[#allocation32_spill]]  ;;  %s4435_s27 = smov [#allocation8]  }
  0x18   :  { %s76_s28 = sshll.u32 %s4435_s27, 4  ;;  %s4436_s4 = smov [#allocation11]   ;;  %s77_s28 = int_to_ptr.vmem [resolvable:$true] %s76_s28 }
  0x19   :  { %s99_s29 = sshll.u32 %s4436_s4, 4  ;;  %s4206_s30 = scalar_lea.vmem %s77_s28, 4096  ;;  %s100_s29 = int_to_ptr.vmem [resolvable:$true] %s99_s29 }
  0x1a   :  { %p4207_p5 = scmp.ne.s32.totalorder %s77_s28, %s4206_s30  ;;  %p4211_p6 = scmp.lt.s32.totalorder %s77_s28, %s77_s28 }
  0x1b   :  { %p4212_p7 = scmp.lt.s32.totalorder %s4206_s30, %s4206_s30 }
  0x1d   :  { %60 = dma.hbm_to_vmem [thread:$0]  %s5880_s26, 4096, %s55_s22, [#allocation6], %s4433_s24, %s4433_s24, %s4434_s2  }
  0x1e   :  { %p4213_p8 = por %p4212_p7, %p4211_p6 }
  0x20   :  { %p4214_p9 = pnand %p4213_p8, %p4207_p5 }
  0x22   :  { %4217 = shalt.err (!%p4214_p9)
}
  0x23   :  { %82 = dma.hbm_to_vmem [thread:$0]  %s5858_s6, 4096, %s77_s28, [#allocation9], %s4433_s24, %s4433_s24, %s4434_s2  }
  0x24   :  { %s4226_s1 = scalar_lea.vmem %s100_s29, 32  ;;  %p4231_p11 = scmp.lt.s32.totalorder %s100_s29, %s100_s29 }
  0x25   :  { %p4227_p10 = scmp.ne.s32.totalorder %s100_s29, %s4226_s1  ;;  %p4232_p12 = scmp.lt.s32.totalorder %s4226_s1, %s4226_s1 }
  0x27   :  { %p4233_p13 = por %p4232_p12, %p4231_p11 }
  0x29   :  { %p4234_p0 = pnand %p4233_p13, %p4227_p10 }
  0x2b   :  { %4237 = shalt.err (!%p4234_p0)
}
  0x2c   :  { %102 = dma.hbm_to_vmem [thread:$0]  %s5860_s8, 32, %s100_s29, [#allocation12]  }
  0x2d   :  { %s4437_s25 = smov [#allocation14]   ;;  %s4438_s26 = smov [#allocation17]  }
  0x2e   :  { %s121_s3 = sshll.u32 %s4437_s25, 4  ;;  %s142_s27 = sshll.u32 %s4438_s26, 4  ;;  %s122_s3 = int_to_ptr.vmem [resolvable:$true] %s121_s3  ;;  %s143_s27 = int_to_ptr.vmem [resolvable:$true] %s142_s27 }
  0x2f   :  { %s4246_s4 = scalar_lea.vmem %s122_s3, 32  ;;  %p4251_p2 = scmp.lt.s32.totalorder %s122_s3, %s122_s3 }
  0x30   :  { %p4247_p1 = scmp.ne.s32.totalorder %s122_s3, %s4246_s4  ;;  %p4252_p3 = scmp.lt.s32.totalorder %s4246_s4, %s4246_s4 }
  0x32   :  { %p4253_p4 = por %p4252_p3, %p4251_p2 }
  0x34   :  { %p4254_p5 = pnand %p4253_p4, %p4247_p1 }
  0x36   :  { %4257 = shalt.err (!%p4254_p5)
}
  0x37   :  { %124 = dma.hbm_to_vmem [thread:$0]  %s5862_s10, 32, %s122_s3, [#allocation15]  }
  0x38   :  { %s4266_s30 = scalar_lea.vmem %s143_s27, 4096  ;;  %p4271_p7 = scmp.lt.s32.totalorder %s143_s27, %s143_s27 }
  0x39   :  { %p4267_p6 = scmp.ne.s32.totalorder %s143_s27, %s4266_s30  ;;  %p4272_p8 = scmp.lt.s32.totalorder %s4266_s30, %s4266_s30 }
  0x3b   :  { %p4273_p9 = por %p4272_p8, %p4271_p7 }
  0x3d   :  { %p4274_p10 = pnand %p4273_p9, %p4267_p6 }
  0x3f   :  { %4277 = shalt.err (!%p4274_p10)
}
  0x40   :  { %148 = dma.hbm_to_vmem [thread:$0]  %s5865_s13, 4096, %s143_s27, [#allocation18], %s4433_s24, %s4433_s24, %s4434_s2  }
  0x41   :  { %s4439_s0 = smov [#allocation2]   ;;  %s4440_s1 = smov [#allocation7]  }
  0x42   :  { %s45_s21 = sshll.u32 %s4439_s0, 4  ;;  %s67_s10 = sshll.u32 %s4440_s1, 4  ;;  %s46_s21 = int_to_ptr.vmem [resolvable:$true] %s45_s21  ;;  %s68_s10 = int_to_ptr.vmem [resolvable:$true] %s67_s10 }
  0x43   :  { %s4286_s22 = scalar_lea.vmem %s46_s21, 32  ;;  %p4291_p12 = scmp.lt.s32.totalorder %s46_s21, %s46_s21 }
  0x44   :  { %p4287_p11 = scmp.ne.s32.totalorder %s46_s21, %s4286_s22  ;;  %p4292_p13 = scmp.lt.s32.totalorder %s4286_s22, %s4286_s22 }
  0x46   :  { %p4293_p0 = por %p4292_p13, %p4291_p12 }
  0x48   :  { %p4294_p1 = pnand %p4293_p0, %p4287_p11 }
  0x4a   :  { %4297 = shalt.err (!%p4294_p1)
}
  0x4b   :  { %s5881_s3 = sld [smem:[#allocation31_spill]]  ;;  %s4306_s26 = scalar_lea.vmem %s68_s10, 32 }
  0x4c   :  { %p4307_p2 = scmp.ne.s32.totalorder %s68_s10, %s4306_s26  ;;  %p4311_p3 = scmp.lt.s32.totalorder %s68_s10, %s68_s10 }
  0x4d   :  { %p4312_p4 = scmp.lt.s32.totalorder %s4306_s26, %s4306_s26 }
  0x4f   :  { %p4313_p5 = por %p4312_p4, %p4311_p3 }
  0x51   :  { %48 = dma.hbm_to_vmem [thread:$0]  %s5881_s3, 32, %s46_s21, [#allocation3]  }
  0x52   :  { %p4314_p6 = pnand %p4313_p5, %p4307_p2 }
  0x54   :  { %4317 = shalt.err (!%p4314_p6)
}
  0x55   :  { %70 = dma.hbm_to_vmem [thread:$0]  %s5857_s5, 32, %s68_s10, [#allocation6]  }
  0x56   :  { %s4441_s4 = smov [#allocation10]   ;;  %s4442_s28 = smov [#allocation13]  }
  0x57   :  { %s89_s6 = sshll.u32 %s4441_s4, 4  ;;  %s108_s30 = sshll.u32 %s4442_s28, 4  ;;  %s90_s6 = int_to_ptr.vmem [resolvable:$true] %s89_s6  ;;  %s109_s30 = int_to_ptr.vmem [resolvable:$true] %s108_s30 }
  0x58   :  { %s4326_s8 = scalar_lea.vmem %s90_s6, 32  ;;  %p4331_p8 = scmp.lt.s32.totalorder %s90_s6, %s90_s6 }
  0x59   :  { %p4327_p7 = scmp.ne.s32.totalorder %s90_s6, %s4326_s8  ;;  %p4332_p9 = scmp.lt.s32.totalorder %s4326_s8, %s4326_s8 }
  0x5b   :  { %p4333_p10 = por %p4332_p9, %p4331_p8 }
  0x5d   :  { %p4334_p11 = pnand %p4333_p10, %p4327_p7 }
  0x5f   :  { %4337 = shalt.err (!%p4334_p11)
}
  0x60   :  { %92 = dma.hbm_to_vmem [thread:$0]  %s5859_s7, 32, %s90_s6, [#allocation9]  }
  0x61   :  { %s4346_s21 = scalar_lea.vmem %s109_s30, 4096  ;;  %p4351_p13 = scmp.lt.s32.totalorder %s109_s30, %s109_s30 }
  0x62   :  { %p4347_p12 = scmp.ne.s32.totalorder %s109_s30, %s4346_s21  ;;  %p4352_p0 = scmp.lt.s32.totalorder %s4346_s21, %s4346_s21 }
  0x64   :  { %p4353_p1 = por %p4352_p0, %p4351_p13 }
  0x66   :  { %p4354_p2 = pnand %p4353_p1, %p4347_p12 }
  0x68   :  { %4357 = shalt.err (!%p4354_p2)
}
  0x69   :  { %114 = dma.hbm_to_vmem [thread:$0]  %s5861_s9, 4096, %s109_s30, [#allocation12], %s4433_s24, %s4433_s24, %s4434_s2  }
  0x6a   :  { %s4443_s10 = smov [#allocation16]   ;;  %s4444_s23 = smov [#allocation19]  }
  0x6b   :  { %s131_s22 = sshll.u32 %s4443_s10, 4  ;;  %s161_s7 = sshll.u32 %s4444_s23, 4  ;;  %s132_s22 = int_to_ptr.vmem [resolvable:$true] %s131_s22  ;;  %s162_s7 = int_to_ptr.vmem [resolvable:$true] %s161_s7 }
  0x6c   :  { %s4366_s25 = scalar_lea.vmem %s132_s22, 256  ;;  %p4371_p4 = scmp.lt.s32.totalorder %s132_s22, %s132_s22 }
  0x6d   :  { %p4367_p3 = scmp.ne.s32.totalorder %s132_s22, %s4366_s25  ;;  %p4372_p5 = scmp.lt.s32.totalorder %s4366_s25, %s4366_s25 }
  0x6f   :  { %p4373_p6 = por %p4372_p5, %p4371_p4 }
  0x71   :  { %p4374_p7 = pnand %p4373_p6, %p4367_p3 }
  0x73   :  { %4377 = shalt.err (!%p4374_p7)
}
  0x74   :  { %134 = dma.hbm_to_vmem [thread:$0]  %s5863_s11, 256, %s132_s22, [#allocation15]  }
  0x75   :  { %s4386_s13 = scalar_lea.vmem %s162_s7, 256  ;;  %p4391_p9 = scmp.lt.s32.totalorder %s162_s7, %s162_s7 }
  0x76   :  { %p4387_p8 = scmp.ne.s32.totalorder %s162_s7, %s4386_s13  ;;  %p4392_p10 = scmp.lt.s32.totalorder %s4386_s13, %s4386_s13 }
  0x78   :  { %p4393_p11 = por %p4392_p10, %p4391_p9 }
  0x7a   :  { %p4394_p12 = pnand %p4393_p11, %p4387_p8 }
  0x7c   :  { %4397 = shalt.err (!%p4394_p12)
}
  0x7d   :  { %164 = dma.hbm_to_vmem [thread:$0]  %s5869_s17, 256, %s162_s7, [#allocation18]  }
  0x7e   :  { %4418 = dma.done.wait [#allocation3], 32  }
  0x7f   :  { %4419 = vsyncadd [#allocation3], 4294967264 }
  0x80   :  { %4420 = dma.done.wait [#allocation6], 4128  }
  0x81   :  { %4421 = vsyncadd [#allocation6], 4294963168 }
  0x82   :  { %4422 = dma.done.wait [#allocation9], 4128  }
  0x83   :  { %4423 = vsyncadd [#allocation9], 4294963168 }
  0x84   :  { %4424 = dma.done.wait [#allocation12], 4128  }
  0x85   :  { %4425 = vsyncadd [#allocation12], 4294963168 }
  0x86   :  { %4426 = dma.done.wait [#allocation15], 288  }
  0x87   :  { %4427 = vsyncadd [#allocation15], 4294967008 }
  0x88   :  { %4428 = dma.done.wait [#allocation18], 4352  }
  0x89   :  { %4429 = vsyncadd [#allocation18], 4294962944  ;;  %s5882_s27 = sld [smem:[#allocation29_spill]]  ;;  %v4655_v19 = vld [vmem:[%s5868_s16 + $0xf8] sm:$0xff]  ;;  %v4666_v21 = vld [vmem:[%s5868_s16 + $0xf0] sm:$0xff]  ;;  %vm627_vm0 = vcmask 64512  }
  0x8a   :  { %s5883_s28 = sld [smem:[#allocation28_spill]]  ;;  %3574 = vmatprep.subr.mxu1 %v4655_v19  ;;  %v4661_v20 = vld [vmem:[%s5868_s16 + $0x78] sm:$0xff]  ;;  %v4671_v22 = vld [vmem:[%s5868_s16 + $0x70] sm:$0xff]  ;;  %v4680_v24 = vld [vmem:[%s5868_s16 + $0xe8] sm:$0xff] }
  0x8b   :  { %3575 = vmatpush3.msra.mxu1 %v4661_v20  ;;  %v4686_v25 = vld [vmem:[%s5868_s16 + $0x68] sm:$0xff]  ;;  %v4692_v26 = vld [vmem:[%s5868_s16 + $0xe0] sm:$0xff]  ;;  %v4710_v30 = vld [vmem:[%s5868_s16 + $0xd8] sm:$0xff]  ;;  %s5884_s29 = sld [smem:[#allocation30_spill]] }
  0x8c   :  { %3576 = vmatprep.subr.mxu1 %v4666_v21  ;;  %v4701_v28 = vld [vmem:[%s5868_s16 + $0x60] sm:$0xff]  ;;  %v4716_v31 = vld [vmem:[%s5868_s16 + $0x58] sm:$0xff]  ;;  %v4728_v34 = vld [vmem:[%s5868_s16 + $0xd0] sm:$0xff] }
  0x8d   :  { %3577 = vmatpush3.msra.mxu1 %v4671_v22  ;;  %v4734_v35 = vld [vmem:[%s5868_s16 + $0x50] sm:$0xff]  ;;  %v4739_v36 = vld [vmem:[%s5868_s16 + $0xc8] sm:$0xff]  ;;  %v4750_v38 = vld [vmem:[%s5868_s16 + $0xc0] sm:$0xff] }
  0x8e   :  { %3578 = vmatprep.subr.mxu1 %v4680_v24  ;;  %v4744_v37 = vld [vmem:[%s5868_s16 + $0x48] sm:$0xff]  ;;  %v4759_v40 = vld [vmem:[%s5868_s16 + $0x40] sm:$0xff]  ;;  %v4768_v42 = vld [vmem:[%s5868_s16 + $0xb8] sm:$0xff] }
  0x8f   :  { %v3816_v0 = vld [vmem:[%s5882_s27 + $0x74] ss:$8 sps:$4 sm:$0xff]   ;;  %v3818_v1 = vld [vmem:[%s5882_s27 + $0x70] ss:$8 sps:$4 sm:$0xff]   ;;  %v3819_v2 = vld [vmem:[%s5882_s27 + $0x64] ss:$8 sps:$4 sm:$0xff]   ;;  %3579 = vmatpush3.msra.mxu1 %v4686_v25 }
  0x90   :  { %449 = vmatprep.subr.bf16.mxu0 %v3816_v0  ;;  %v3821_v3 = vld [vmem:[%s5882_s27 + $0x60] ss:$8 sps:$4 sm:$0xff]   ;;  %v3822_v4 = vld [vmem:[%s5882_s27 + $0x54] ss:$8 sps:$4 sm:$0xff]   ;;  %v3824_v5 = vld [vmem:[%s5882_s27 + $0x50] ss:$8 sps:$4 sm:$0xff]   ;;  %3580 = vmatprep.subr.mxu1 %v4692_v26 }
  0x91   :  { %450 = vmatpush1.bf16.msra.mxu0 %v3818_v1  ;;  %v3825_v6 = vld [vmem:[%s5882_s27 + $0x44] ss:$8 sps:$4 sm:$0xff]   ;;  %v3827_v7 = vld [vmem:[%s5882_s27 + $0x40] ss:$8 sps:$4 sm:$0xff]   ;;  %v3828_v8 = vld [vmem:[%s5882_s27 + $0x34] ss:$8 sps:$4 sm:$0xff]   ;;  %3581 = vmatpush3.msra.mxu1 %v4701_v28 }
  0x92   :  { %451 = vmatprep.subr.bf16.mxu0 %v3819_v2  ;;  %v3830_v9 = vld [vmem:[%s5882_s27 + $0x30] ss:$8 sps:$4 sm:$0xff]   ;;  %v3831_v10 = vld [vmem:[%s5882_s27 + $0x24] ss:$8 sps:$4 sm:$0xff]   ;;  %v3833_v11 = vld [vmem:[%s5882_s27 + $0x20] ss:$8 sps:$4 sm:$0xff]   ;;  %3582 = vmatprep.subr.mxu1 %v4710_v30 }
  0x93   :  { %v3834_v12 = vld [vmem:[%s5882_s27 + $0x14] ss:$8 sps:$4 sm:$0xff]   ;;  %v234_v13 = vld [vmem:[%s5883_s28 + $0x8] sm:$0xff]  ;;  %v3836_v16 = vld [vmem:[%s5882_s27 + $0x10] ss:$8 sps:$4 sm:$0xff]   ;;  %3583 = vmatpush3.msra.mxu1 %v4716_v31 }
  0x94   :  { %v236_v14 = vld [vmem:[%s5883_s28 + $0x18] sm:$0xff]  ;;  %v3837_v17 = vld [vmem:[%s5882_s27 + $0x4] ss:$8 sps:$4 sm:$0xff]   ;;  %v3839_v18 = vld [vmem:[%s5882_s27] ss:$8 sps:$4 sm:$0xff]   ;;  %3584 = vmatprep.subr.mxu1 %v4728_v34 }
  0x95   :  { %452 = vmatpush1.bf16.msra.mxu0 %v3821_v3  ;;  %v250_v15 = vpack.c.bf16 %v236_v14, %v234_v13  ;;  %v3840_v23 = vld [vmem:[%s5882_s27 + $0xf4] ss:$8 sps:$4 sm:$0xff]   ;;  %v3842_v27 = vld [vmem:[%s5882_s27 + $0xf0] ss:$8 sps:$4 sm:$0xff]   ;;  %v3843_v29 = vld [vmem:[%s5882_s27 + $0xe4] ss:$8 sps:$4 sm:$0xff]   ;;  %3585 = vmatpush3.msra.mxu1 %v4734_v35 }
  0x96   :  { %453 = vmatprep.subr.bf16.mxu0 %v3822_v4  ;;  %v3845_v32 = vld [vmem:[%s5882_s27 + $0xe0] ss:$8 sps:$4 sm:$0xff]   ;;  %v3846_v33 = vld [vmem:[%s5882_s27 + $0xd4] ss:$8 sps:$4 sm:$0xff]   ;;  %v3848_v39 = vld [vmem:[%s5882_s27 + $0xd0] ss:$8 sps:$4 sm:$0xff]   ;;  %3586 = vmatprep.subr.mxu1 %v4739_v36 }
  0x97   :  { %481 = vmatprep.mubr.bf16.mxu0 %v250_v15  ;;  %v3849_v41 = vld [vmem:[%s5882_s27 + $0xc4] ss:$8 sps:$4 sm:$0xff]   ;;  %v4774_v43 = vld [vmem:[%s5868_s16 + $0x38] sm:$0xff]  ;;  %3587 = vmatpush3.msra.mxu1 %v4744_v37  ;;  %v4780_v44 = vld [vmem:[%s5868_s16 + $0xb0] sm:$0xff] }
  0x98   :  { %v3851_v45 = vld [vmem:[%s5882_s27 + $0xc0] ss:$8 sps:$4 sm:$0xff]   ;;  %3588 = vmatprep.subr.mxu1 %v4750_v38  ;;  %v4789_v46 = vld [vmem:[%s5868_s16 + $0x30] sm:$0xff]  ;;  %v3855_v53 = vld [vmem:[%s5882_s27 + $0xa4] ss:$8 sps:$4 sm:$0xff]  }
  0x99   :  { %454 = vmatpush1.bf16.msra.mxu0 %v3824_v5  ;;  %v3852_v47 = vld [vmem:[%s5882_s27 + $0xb4] ss:$8 sps:$4 sm:$0xff]   ;;  %3589 = vmatpush3.msra.mxu1 %v4759_v40  ;;  %v4798_v48 = vld [vmem:[%s5868_s16 + $0xa8] sm:$0xff]  ;;  %v4810_v50 = vld [vmem:[%s5868_s16 + $0xa0] sm:$0xff] }
  0x9a   :  { %455 = vmatprep.subr.bf16.mxu0 %v3825_v6  ;;  %3590 = vmatprep.subr.mxu1 %v4768_v42  ;;  %v4804_v49 = vld [vmem:[%s5868_s16 + $0x28] sm:$0xff]  ;;  %v3854_v51 = vld [vmem:[%s5882_s27 + $0xb0] ss:$8 sps:$4 sm:$0xff]   ;;  %v4819_v52 = vld [vmem:[%s5868_s16 + $0x20] sm:$0xff] }
  0x9b   :  { %3591 = vmatpush3.msra.mxu1 %v4774_v43  ;;  %v4828_v54 = vld [vmem:[%s5868_s16 + $0x98] sm:$0xff]  ;;  %v4840_v56 = vld [vmem:[%s5868_s16 + $0x90] sm:$0xff]  ;;  %v3857_v57 = vld [vmem:[%s5882_s27 + $0xa0] ss:$8 sps:$4 sm:$0xff]  }
  0x9c   :  { %3592 = vmatprep.subr.mxu1 %v4780_v44  ;;  %v4834_v55 = vld [vmem:[%s5868_s16 + $0x18] sm:$0xff]  ;;  %v4849_v58 = vld [vmem:[%s5868_s16 + $0x10] sm:$0xff]  ;;  %v3861_v61 = vld [vmem:[%s5882_s27 + $0x84] ss:$8 sps:$4 sm:$0xff]  }
  0x9d   :  { %456 = vmatpush1.bf16.msra.mxu0 %v3827_v7  ;;  %3593 = vmatpush3.msra.mxu1 %v4789_v46  ;;  %v3858_v59 = vld [vmem:[%s5882_s27 + $0x94] ss:$8 sps:$4 sm:$0xff]   ;;  %v3860_v60 = vld [vmem:[%s5882_s27 + $0x90] ss:$8 sps:$4 sm:$0xff]   ;;  %v3863_v62 = vld [vmem:[%s5882_s27 + $0x80] ss:$8 sps:$4 sm:$0xff]  }
  0x9e   :  { %457 = vmatprep.subr.bf16.mxu0 %v3828_v8  ;;  %3594 = vmatprep.subr.mxu1 %v4798_v48  ;;  %v233_v63 = vld [vmem:[%s5883_s28] sm:$0xff]  ;;  %v235_v0 = vld [vmem:[%s5883_s28 + $0x10] sm:$0xff]  ;;  %v238_v1 = vld [vmem:[%s5883_s28 + $0x28] sm:$0xff] }
  0x9f   :  { %3595 = vmatpush3.msra.mxu1 %v4804_v49  ;;  %v240_v2 = vld [vmem:[%s5883_s28 + $0x38] sm:$0xff]  ;;  %v249_v3 = vpack.c.bf16 %v235_v0, %v233_v63  ;;  %v237_v5 = vld [vmem:[%s5883_s28 + $0x20] sm:$0xff]  ;;  %v239_v6 = vld [vmem:[%s5883_s28 + $0x30] sm:$0xff] }
  0xa0   :  { %3596 = vmatprep.subr.mxu1 %v4810_v50  ;;  %v252_v4 = vpack.c.bf16 %v240_v2, %v238_v1  ;;  %v242_v7 = vld [vmem:[%s5883_s28 + $0x48] sm:$0xff]  ;;  %v244_v8 = vld [vmem:[%s5883_s28 + $0x58] sm:$0xff] }
  0xa1   :  { %458 = vmatpush1.bf16.msra.mxu0 %v3830_v9  ;;  %3597 = vmatpush3.msra.mxu1 %v4819_v52  ;;  %v251_v9 = vpack.c.bf16 %v239_v6, %v237_v5  ;;  %v246_v13 = vld [vmem:[%s5883_s28 + $0x68] sm:$0xff]  ;;  %v248_v14 = vld [vmem:[%s5883_s28 + $0x78] sm:$0xff] }
  0xa2   :  { %459 = vmatprep.subr.bf16.mxu0 %v3831_v10  ;;  %3598 = vmatprep.subr.mxu1 %v4828_v54  ;;  %v254_v10 = vpack.c.bf16 %v244_v8, %v242_v7 }
  0xa3   :  { %3599 = vmatpush3.msra.mxu1 %v4834_v55 }
  0xa4   :  { %3600 = vmatprep.subr.mxu1 %v4840_v56 }
  0xa5   :  { %460 = vmatpush1.bf16.msra.mxu0 %v3833_v11  ;;  %3601 = vmatpush3.msra.mxu1 %v4849_v58  ;;  %v241_v11 = vld [vmem:[%s5883_s28 + $0x40] sm:$0xff] }
  0xa6   :  { %461 = vmatprep.subr.bf16.mxu0 %v3834_v12  ;;  %v243_v12 = vld [vmem:[%s5883_s28 + $0x50] sm:$0xff] }
  0xa7   :  { %v253_v15 = vpack.c.bf16 %v243_v12, %v241_v11 }
  0xa9   :  { %462 = vmatpush1.bf16.msra.mxu0 %v3836_v16  ;;  %v256_v16 = vpack.c.bf16 %v248_v14, %v246_v13 }
  0xaa   :  { %463 = vmatprep.subr.bf16.mxu0 %v3837_v17  ;;  %v245_v17 = vld [vmem:[%s5883_s28 + $0x60] sm:$0xff] }
  0xad   :  { %464 = vmatpush1.bf16.msra.mxu0 %v3839_v18  ;;  %v247_v18 = vld [vmem:[%s5883_s28 + $0x70] sm:$0xff] }
  0xae   :  { %465 = vmatprep.subr.bf16.mxu0 %v3840_v23  ;;  %v199_v23 = vld [vmem:[%s5868_s16] sm:$0xff] }
  0xb1   :  { %466 = vmatpush2.bf16.msra.mxu0 %v3842_v27  ;;  %v231_v27 = vld [vmem:[#allocation19] sm:$0xff] }
  0xb2   :  { %467 = vmatprep.subr.bf16.mxu0 %v3843_v29 }
  0xb5   :  { %468 = vmatpush2.bf16.msra.mxu0 %v3845_v32 }
  0xb6   :  { %469 = vmatprep.subr.bf16.mxu0 %v3846_v33 }
  0xb9   :  { %470 = vmatpush2.bf16.msra.mxu0 %v3848_v39 }
  0xba   :  { %471 = vmatprep.subr.bf16.mxu0 %v3849_v41 }
  0xbd   :  { %472 = vmatpush2.bf16.msra.mxu0 %v3851_v45 }
  0xbe   :  { %473 = vmatprep.subr.bf16.mxu0 %v3852_v47 }
  0xc1   :  { %474 = vmatpush2.bf16.msra.mxu0 %v3854_v51 }
  0xc2   :  { %475 = vmatprep.subr.bf16.mxu0 %v3855_v53 }
  0xc5   :  { %476 = vmatpush2.bf16.msra.mxu0 %v3857_v57 }
  0xc6   :  { %477 = vmatprep.subr.bf16.mxu0 %v3858_v59 }
  0xc9   :  { %478 = vmatpush2.bf16.msra.mxu0 %v3860_v60 }
  0xca   :  { %479 = vmatprep.subr.bf16.mxu0 %v3861_v61 }
  0xcd   :  { %480 = vmatpush2.bf16.msra.mxu0 %v3863_v62 }
  0xce   :  { %3630 = vmatprep.subr.mxu0 %v4655_v19  ;;  %v255_v19 = vpack.c.bf16 %v247_v18, %v245_v17 }
  0xd0   :  { %482 = vmatmul.mubr.bf16.vlgmr.msra.gmra.mxu0 %v249_v3 }
  0xd1   :  { %491 = vmatprep.mubr.bf16.mxu0 %v252_v4  ;;  %3631 = vmatpush3.msra.mxu0 %v4661_v20  ;;  %v216_v20 = vld [vmem:[%s5868_s16 + $0x88] sm:$0xff] }
  0xd2   :  { %3632 = vmatprep.subr.mxu0 %v4666_v21  ;;  %3602 = vmatprep.subr.mxu1 %v216_v20  ;;  %v200_v21 = vld [vmem:[%s5868_s16 + $0x8] sm:$0xff] }
  0xd3   :  { %3633 = vmatpush3.msra.mxu0 %v4671_v22  ;;  %3603 = vmatpush3.msra.mxu1 %v200_v21  ;;  %v215_v22 = vld [vmem:[%s5868_s16 + $0x80] sm:$0xff] }
  0xd4   :  { %3634 = vmatprep.subr.mxu0 %v4680_v24  ;;  %3604 = vmatprep.subr.mxu1 %v215_v22  ;;  %v232_v24 = vld [vmem:[#allocation19 + $0x8] sm:$0xff] }
  0xd5   :  { %3635 = vmatpush3.msra.mxu0 %v4686_v25  ;;  %3605 = vmatpush3.msra.mxu1 %v199_v23 }
  0xd6   :  { %3636 = vmatprep.subr.mxu0 %v4692_v26  ;;  %682 = vmatprep.subr.mxu1 %v232_v24 }
  0xd7   :  { %3637 = vmatpush3.msra.mxu0 %v4701_v28 }
  0xd8   :  { %492 = vmatmul.mubr.bf16.gmra.mxu0 %v251_v9  ;;  %3638 = vmatprep.subr.mxu0 %v4710_v30 }
  0xd9   :  { %501 = vmatprep.mubr.bf16.mxu0 %v254_v10  ;;  %3639 = vmatpush3.msra.mxu0 %v4716_v31 }
  0xda   :  { %3640 = vmatprep.subr.mxu0 %v4728_v34 }
  0xdb   :  { %3641 = vmatpush3.msra.mxu0 %v4734_v35 }
  0xdc   :  { %3642 = vmatprep.subr.mxu0 %v4739_v36 }
  0xdd   :  { %3643 = vmatpush3.msra.mxu0 %v4744_v37 }
  0xde   :  { %3644 = vmatprep.subr.mxu0 %v4750_v38 }
  0xdf   :  { %3645 = vmatpush3.msra.mxu0 %v4759_v40 }
  0xe0   :  { %502 = vmatmul.mubr.bf16.gmra.mxu0 %v253_v15  ;;  %3646 = vmatprep.subr.mxu0 %v4768_v42  ;;  %v4445_v42 = vmov 0.0  }
  0xe1   :  { %511 = vmatprep.mubr.bf16.mxu0 %v256_v16  ;;  %3647 = vmatpush3.msra.mxu0 %v4774_v43 }
  0xe2   :  { %3648 = vmatprep.subr.mxu0 %v4780_v44 }
  0xe3   :  { %3649 = vmatpush3.msra.mxu0 %v4789_v46 }
  0xe4   :  { %3650 = vmatprep.subr.mxu0 %v4798_v48 }
  0xe5   :  { %3651 = vmatpush3.msra.mxu0 %v4804_v49 }
  0xe6   :  { %3652 = vmatprep.subr.mxu0 %v4810_v50 }
  0xe7   :  { %3653 = vmatpush3.msra.mxu0 %v4819_v52 }
  0xe8   :  { %512 = vmatmul.mubr.bf16.gmra.mxu0 %v255_v19  ;;  %3654 = vmatprep.subr.mxu0 %v4828_v54 }
  0xe9   :  { %3655 = vmatpush3.msra.mxu0 %v4834_v55 }
  0xea   :  { %3656 = vmatprep.subr.mxu0 %v4840_v56 }
  0xeb   :  { %3657 = vmatpush3.msra.mxu0 %v4849_v58 }
  0xec   :  { %3658 = vmatprep.subr.mxu0 %v216_v20 }
  0xed   :  { %3659 = vmatpush3.msra.mxu0 %v200_v21 }
  0xee   :  { %3660 = vmatprep.subr.mxu0 %v215_v22 }
  0xef   :  { %3661 = vmatpush3.msra.mxu0 %v199_v23 }
 0x190   :  { %v4950_v25 = vpop.f32.mrf.mxu0 }
 0x192   :  { %v4952_v26 = vpop.f32.mrf.mxu0 }
 0x193   :  { %586 = vmatprep.mubr.f32.mxu1 %v4952_v26 }
 0x194   :  { %v4955_v28 = vpop.f32.mrf.mxu0  ;;  %587 = vmatmul.mubr.f32.vlgmr.msra.gmra.mxu1 %v4950_v25 }
 0x195   :  { %683 = vmatpush1.msra.mxu1 %v231_v27 }
 0x196   :  { %v4958_v29 = vpop.f32.mrf.mxu0  ;;  %972 = vmatprep.subr.mxu1 %v232_v24 }
 0x197   :  { %591 = vmatprep.mubr.f32.mxu1 %v4958_v29 }
 0x198   :  { %v4961_v30 = vpop.f32.mrf.mxu0  ;;  %592 = vmatmul.mubr.f32.gmra.mxu1 %v4955_v28 }
 0x19a   :  { %v4964_v31 = vpop.f32.mrf.mxu0 }
 0x19b   :  { %596 = vmatprep.mubr.f32.mxu1 %v4964_v31 }
 0x19c   :  { %v4967_v32 = vpop.f32.mrf.mxu0  ;;  %597 = vmatmul.mubr.f32.gmra.mxu1 %v4961_v30 }
 0x19e   :  { %v4970_v33 = vpop.f32.mrf.mxu0 }
 0x19f   :  { %601 = vmatprep.mubr.f32.mxu1 %v4970_v33 }
 0x1a0   :  { %v4973_v34 = vpop.f32.mrf.mxu0  ;;  %602 = vmatmul.mubr.f32.gmra.mxu1 %v4967_v32 }
 0x1a2   :  { %v4976_v35 = vpop.f32.mrf.mxu0 }
 0x1a3   :  { %606 = vmatprep.mubr.f32.mxu1 %v4976_v35 }
 0x1a4   :  { %v4979_v36 = vpop.f32.mrf.mxu0  ;;  %607 = vmatmul.mubr.f32.gmra.mxu1 %v4973_v34 }
 0x1a6   :  { %v4982_v37 = vpop.f32.mrf.mxu0 }
 0x1a7   :  { %611 = vmatprep.mubr.f32.mxu1 %v4982_v37 }
 0x1a8   :  { %v4985_v38 = vpop.f32.mrf.mxu0  ;;  %612 = vmatmul.mubr.f32.gmra.mxu1 %v4979_v36 }
 0x1aa   :  { %v4988_v39 = vpop.f32.mrf.mxu0 }
 0x1ab   :  { %616 = vmatprep.mubr.f32.mxu1 %v4988_v39 }
 0x1ac   :  { %v4991_v40 = vpop.f32.mrf.mxu0  ;;  %617 = vmatmul.mubr.f32.gmra.mxu1 %v4985_v38 }
 0x1ae   :  { %v4994_v41 = vpop.f32.mrf.mxu0 }
 0x1af   :  { %621 = vmatprep.mubr.f32.mxu1 %v4994_v41 }
 0x1b0   :  { %622 = vmatmul.mubr.f32.gmra.mxu1 %v4991_v40 }
 0x1b1   :  { %716 = vmatprep.mubr.f32.mxu1 %v4445_v42 }
 0x254   :  { %v3606_v43 = vpop.f32.mrf.mxu1 }
 0x256   :  { %v3607_v44 = vpop.f32.mrf.mxu1 }
 0x257   :  { %v3608_v45 = vadd.f32 %v3607_v44, %v3606_v43 }
 0x258   :  { %v3609_v46 = vpop.f32.mrf.mxu1 }
 0x259   :  { %3397 = vmatmul.mubr.msk.f32.vlgmr.msra.gmra.mxu1 %vm627_vm0, %v3608_v45 }
 0x25a   :  { %v3610_v47 = vpop.f32.mrf.mxu1  ;;  %722 = vmatprep.mubr.f32.mxu1 %v4445_v42  ;;  %973 = vmatpush1.msra.mxu1 %v231_v27 }
 0x25b   :  { %v3611_v48 = vadd.f32 %v3610_v47, %v3609_v46 }
 0x25c   :  { %v3612_v49 = vpop.f32.mrf.mxu1 }
 0x25d   :  { %3398 = vmatmul.mubr.msk.f32.gmra.mxu1 %vm627_vm0, %v3611_v48 }
 0x25e   :  { %v3613_v50 = vpop.f32.mrf.mxu1  ;;  %728 = vmatprep.mubr.f32.mxu1 %v4445_v42 }
 0x25f   :  { %v3614_v51 = vadd.f32 %v3613_v50, %v3612_v49 }
 0x260   :  { %v3615_v52 = vpop.f32.mrf.mxu1 }
 0x261   :  { %3399 = vmatmul.mubr.msk.f32.gmra.mxu1 %vm627_vm0, %v3614_v51 }
 0x262   :  { %v3616_v53 = vpop.f32.mrf.mxu1  ;;  %734 = vmatprep.mubr.f32.mxu1 %v4445_v42 }
 0x263   :  { %v3617_v54 = vadd.f32 %v3616_v53, %v3615_v52 }
 0x264   :  { %v3618_v55 = vpop.f32.mrf.mxu1 }
 0x265   :  { %3400 = vmatmul.mubr.msk.f32.gmra.mxu1 %vm627_vm0, %v3617_v54 }
 0x266   :  { %v3619_v56 = vpop.f32.mrf.mxu1  ;;  %740 = vmatprep.mubr.f32.mxu1 %v4445_v42 }
 0x267   :  { %v3620_v57 = vadd.f32 %v3619_v56, %v3618_v55 }
 0x268   :  { %v3621_v58 = vpop.f32.mrf.mxu1 }
 0x269   :  { %3401 = vmatmul.mubr.msk.f32.gmra.mxu1 %vm627_vm0, %v3620_v57 }
 0x26a   :  { %v3622_v59 = vpop.f32.mrf.mxu1  ;;  %746 = vmatprep.mubr.f32.mxu1 %v4445_v42 }
 0x26b   :  { %v3623_v60 = vadd.f32 %v3622_v59, %v3621_v58 }
 0x26c   :  { %v3624_v61 = vpop.f32.mrf.mxu1 }
 0x26d   :  { %3402 = vmatmul.mubr.msk.f32.gmra.mxu1 %vm627_vm0, %v3623_v60 }
 0x26e   :  { %v3625_v62 = vpop.f32.mrf.mxu1  ;;  %752 = vmatprep.mubr.f32.mxu1 %v4445_v42 }
 0x26f   :  { %v3626_v63 = vadd.f32 %v3625_v62, %v3624_v61 }
 0x270   :  { %v3627_v0 = vpop.f32.mrf.mxu1 }
 0x271   :  { %3403 = vmatmul.mubr.msk.f32.gmra.mxu1 %vm627_vm0, %v3626_v63 }
 0x272   :  { %v3628_v1 = vpop.f32.mrf.mxu1  ;;  %758 = vmatprep.mubr.f32.mxu1 %v4445_v42 }
 0x273   :  { %v3629_v2 = vadd.f32 %v3628_v1, %v3627_v0 }
 0x275   :  { %3404 = vmatmul.mubr.msk.f32.gmra.mxu1 %vm627_vm0, %v3629_v2 }
 0x276   :  { %1006 = vmatprep.mubr.f32.mxu1 %v4445_v42 }
 0x319   :  { %v718_v3 = vpop.f32.mrf.mxu1 }
 0x31a   :  { %v765_v4 = vmul.f32 0.03125, %v718_v3 }
 0x31b   :  { %v720_v5 = vpop.f32.mrf.mxu1 }
 0x31c   :  { %v766_v6 = vmul.f32 0.03125, %v720_v5  ;;  %v5016_v7 = vsub.f32 %v4950_v25, %v765_v4 }
 0x31d   :  { %v724_v8 = vpop.f32.mrf.mxu1 }
 0x31e   :  { %v5019_v9 = vsub.f32 %v4952_v26, %v766_v6  ;;  %v767_v10 = vmul.f32 0.03125, %v724_v8  ;;  %v797_v14 = vmul.f32 %v5016_v7, %v5016_v7  ;;  %v3864_v6 = vld [vmem:[#allocation5 + $0x70] ss:$8 sps:$4 sm:$0xff]   ;;  %v3866_v8 = vld [vmem:[#allocation5 + $0x74] ss:$8 sps:$4 sm:$0xff]  }
 0x31f   :  { %v726_v11 = vpop.f32.mrf.mxu1  ;;  %1435 = vmatprep.subr.bf16.mxu0 %v3866_v8  ;;  %v3902_v8 = vld [vmem:[#allocation5 + $0xb4] ss:$8 sps:$4 sm:$0xff]  }
 0x320   :  { %v768_v12 = vmul.f32 0.03125, %v726_v11  ;;  %v798_v13 = vmul.f32 %v5019_v9, %v5019_v9  ;;  %v5026_v15 = vsub.f32 %v4955_v28, %v767_v10  ;;  %v3867_v10 = vld [vmem:[#allocation5 + $0x60] ss:$8 sps:$4 sm:$0xff]   ;;  %v3872_v11 = vld [vmem:[#allocation5 + $0x54] ss:$8 sps:$4 sm:$0xff]  }
 0x321   :  { %v730_v16 = vpop.f32.mrf.mxu1 }
 0x322   :  { %v5029_v17 = vsub.f32 %v4958_v29, %v768_v12  ;;  %v769_v18 = vmul.f32 0.03125, %v730_v16  ;;  %877 = vmatprep.mubr.f32.mxu0 %v798_v13  ;;  %v799_v24 = vmul.f32 %v5026_v15, %v5026_v15  ;;  %v3875_v12 = vld [vmem:[#allocation5 + $0x44] ss:$8 sps:$4 sm:$0xff]   ;;  %v3873_v13 = vld [vmem:[#allocation5 + $0x40] ss:$8 sps:$4 sm:$0xff]  }
 0x323   :  { %v732_v19 = vpop.f32.mrf.mxu1  ;;  %878 = vmatmul.mubr.f32.vlgmr.msra.gmra.mxu0 %v797_v14  ;;  %v3878_v14 = vld [vmem:[#allocation5 + $0x34] ss:$8 sps:$4 sm:$0xff]   ;;  %v3876_v16 = vld [vmem:[#allocation5 + $0x30] ss:$8 sps:$4 sm:$0xff]  }
 0x324   :  { %v770_v20 = vmul.f32 0.03125, %v732_v19  ;;  %v800_v21 = vmul.f32 %v5029_v17, %v5029_v17  ;;  %v5034_v22 = vsub.f32 %v4961_v30, %v769_v18  ;;  %1436 = vmatpush1.bf16.msra.mxu0 %v3864_v6  ;;  %v3881_v18 = vld [vmem:[#allocation5 + $0x24] ss:$8 sps:$4 sm:$0xff]   ;;  %v3879_v19 = vld [vmem:[#allocation5 + $0x20] ss:$8 sps:$4 sm:$0xff]  }
 0x325   :  { %v736_v23 = vpop.f32.mrf.mxu1  ;;  %v3897_v6 = vld [vmem:[#allocation5 + $0xc0] ss:$8 sps:$4 sm:$0xff]  }
 0x326   :  { %v5039_v25 = vsub.f32 %v4964_v31, %v770_v20  ;;  %v771_v26 = vmul.f32 0.03125, %v736_v23  ;;  %882 = vmatprep.mubr.f32.mxu0 %v800_v21  ;;  %v801_v44 = vmul.f32 %v5034_v22, %v5034_v22  ;;  %v3884_v20 = vld [vmem:[#allocation5 + $0x14] ss:$8 sps:$4 sm:$0xff]   ;;  %v3882_v21 = vld [vmem:[#allocation5 + $0x10] ss:$8 sps:$4 sm:$0xff]  }
 0x327   :  { %v738_v27 = vpop.f32.mrf.mxu1  ;;  %883 = vmatmul.mubr.f32.gmra.mxu0 %v799_v24 }
 0x328   :  { %v772_v28 = vmul.f32 0.03125, %v738_v27  ;;  %v802_v29 = vmul.f32 %v5039_v25, %v5039_v25  ;;  %v5044_v43 = vsub.f32 %v4967_v32, %v771_v26 }
 0x329   :  { %v742_v30 = vpop.f32.mrf.mxu1 }
 0x32a   :  { %v5049_v45 = vsub.f32 %v4970_v33, %v772_v28  ;;  %v773_v31 = vmul.f32 0.03125, %v742_v30  ;;  %887 = vmatprep.mubr.f32.mxu0 %v802_v29  ;;  %v803_v50 = vmul.f32 %v5044_v43, %v5044_v43 }
 0x32b   :  { %v744_v46 = vpop.f32.mrf.mxu1  ;;  %888 = vmatmul.mubr.f32.gmra.mxu0 %v801_v44 }
 0x32c   :  { %v774_v47 = vmul.f32 0.03125, %v744_v46  ;;  %v804_v48 = vmul.f32 %v5049_v45, %v5049_v45  ;;  %v5054_v49 = vsub.f32 %v4973_v34, %v773_v31 }
 0x32d   :  { %v748_v32 = vpop.f32.mrf.mxu1 }
 0x32e   :  { %v5059_v51 = vsub.f32 %v4976_v35, %v774_v47  ;;  %v775_v33 = vmul.f32 0.03125, %v748_v32  ;;  %892 = vmatprep.mubr.f32.mxu0 %v804_v48  ;;  %v805_v56 = vmul.f32 %v5054_v49, %v5054_v49 }
 0x32f   :  { %v750_v52 = vpop.f32.mrf.mxu1  ;;  %893 = vmatmul.mubr.f32.gmra.mxu0 %v803_v50 }
 0x330   :  { %v776_v53 = vmul.f32 0.03125, %v750_v52  ;;  %v806_v54 = vmul.f32 %v5059_v51, %v5059_v51  ;;  %v5064_v55 = vsub.f32 %v4979_v36, %v775_v33 }
 0x331   :  { %v754_v34 = vpop.f32.mrf.mxu1 }
 0x332   :  { %v5069_v57 = vsub.f32 %v4982_v37, %v776_v53  ;;  %v777_v35 = vmul.f32 0.03125, %v754_v34  ;;  %897 = vmatprep.mubr.f32.mxu0 %v806_v54  ;;  %v807_v62 = vmul.f32 %v5064_v55, %v5064_v55 }
 0x333   :  { %v756_v58 = vpop.f32.mrf.mxu1  ;;  %898 = vmatmul.mubr.f32.gmra.mxu0 %v805_v56 }
 0x334   :  { %v778_v59 = vmul.f32 0.03125, %v756_v58  ;;  %v808_v60 = vmul.f32 %v5069_v57, %v5069_v57  ;;  %v5074_v61 = vsub.f32 %v4985_v38, %v777_v35 }
 0x335   :  { %v760_v36 = vpop.f32.mrf.mxu1 }
 0x336   :  { %v5079_v63 = vsub.f32 %v4988_v39, %v778_v59  ;;  %v779_v37 = vmul.f32 0.03125, %v760_v36  ;;  %902 = vmatprep.mubr.f32.mxu0 %v808_v60  ;;  %v809_v38 = vmul.f32 %v5074_v61, %v5074_v61  ;;  %v3887_v36 = vld [vmem:[#allocation5 + $0x4] ss:$8 sps:$4 sm:$0xff]  }
 0x337   :  { %v762_v0 = vpop.f32.mrf.mxu1  ;;  %903 = vmatmul.mubr.f32.gmra.mxu0 %v807_v62  ;;  %v3885_v62 = vld [vmem:[#allocation5] ss:$8 sps:$4 sm:$0xff]  }
 0x338   :  { %v780_v1 = vmul.f32 0.03125, %v762_v0  ;;  %v810_v2 = vmul.f32 %v5079_v63, %v5079_v63  ;;  %v5084_v3 = vsub.f32 %v4991_v40, %v779_v37  ;;  %v3869_v40 = vld [vmem:[#allocation5 + $0x64] ss:$8 sps:$4 sm:$0xff]   ;;  %v3890_v37 = vld [vmem:[#allocation5 + $0xf4] ss:$8 sps:$4 sm:$0xff]  }
 0x339   :  { %1437 = vmatprep.subr.bf16.mxu0 %v3869_v40  ;;  %v3888_v0 = vld [vmem:[#allocation5 + $0xf0] ss:$8 sps:$4 sm:$0xff]  }
 0x33a   :  { %v5089_v4 = vsub.f32 %v4994_v41, %v780_v1  ;;  %907 = vmatprep.mubr.f32.mxu0 %v810_v2  ;;  %v811_v5 = vmul.f32 %v5084_v3, %v5084_v3  ;;  %1438 = vmatpush1.bf16.msra.mxu0 %v3867_v10  ;;  %v3870_v41 = vld [vmem:[#allocation5 + $0x50] ss:$8 sps:$4 sm:$0xff]   ;;  %v3893_v1 = vld [vmem:[#allocation5 + $0xe4] ss:$8 sps:$4 sm:$0xff]   ;;  %v3891_v2 = vld [vmem:[#allocation5 + $0xe0] ss:$8 sps:$4 sm:$0xff]  }
 0x33b   :  { %908 = vmatmul.mubr.f32.gmra.mxu0 %v809_v38  ;;  %1439 = vmatprep.subr.bf16.mxu0 %v3872_v11  ;;  %v3896_v38 = vld [vmem:[#allocation5 + $0xd4] ss:$8 sps:$4 sm:$0xff]   ;;  %v3900_v40 = vld [vmem:[#allocation5 + $0xb0] ss:$8 sps:$4 sm:$0xff]   ;;  %v3905_v10 = vld [vmem:[#allocation5 + $0xa4] ss:$8 sps:$4 sm:$0xff]  }
 0x33c   :  { %v812_v39 = vmul.f32 %v5089_v4, %v5089_v4  ;;  %v3903_v11 = vld [vmem:[#allocation5 + $0xa0] ss:$8 sps:$4 sm:$0xff]  }
 0x33e   :  { %912 = vmatprep.mubr.f32.mxu0 %v812_v39  ;;  %1440 = vmatpush1.bf16.msra.mxu0 %v3870_v41  ;;  %v3894_v39 = vld [vmem:[#allocation5 + $0xd0] ss:$8 sps:$4 sm:$0xff]   ;;  %v3908_v41 = vld [vmem:[#allocation5 + $0x94] ss:$8 sps:$4 sm:$0xff]  }
 0x33f   :  { %913 = vmatmul.mubr.f32.gmra.mxu0 %v811_v5  ;;  %1441 = vmatprep.subr.bf16.mxu0 %v3875_v12  ;;  %v3899_v5 = vld [vmem:[#allocation5 + $0xc4] ss:$8 sps:$4 sm:$0xff]   ;;  %v3906_v12 = vld [vmem:[#allocation5 + $0x90] ss:$8 sps:$4 sm:$0xff]  }
 0x342   :  { %1442 = vmatpush1.bf16.msra.mxu0 %v3873_v13  ;;  %v3911_v13 = vld [vmem:[#allocation5 + $0x84] ss:$8 sps:$4 sm:$0xff]  }
 0x343   :  { %1443 = vmatprep.subr.bf16.mxu0 %v3878_v14  ;;  %v3909_v14 = vld [vmem:[#allocation5 + $0x80] ss:$8 sps:$4 sm:$0xff]  }
 0x346   :  { %1444 = vmatpush1.bf16.msra.mxu0 %v3876_v16  ;;  %v5113_v16 = vld [vmem:[%s5868_s16 + $0xf8] sm:$0xff] }
 0x347   :  { %1445 = vmatprep.subr.bf16.mxu0 %v3881_v18  ;;  %v3912_v18 = vld [vmem:[#allocation8 + $0x70] ss:$8 sps:$4 sm:$0xff]  }
 0x34a   :  { %1446 = vmatpush1.bf16.msra.mxu0 %v3879_v19  ;;  %v3914_v19 = vld [vmem:[#allocation8 + $0x74] ss:$8 sps:$4 sm:$0xff]  }
 0x34b   :  { %1447 = vmatprep.subr.bf16.mxu0 %v3884_v20  ;;  %v3917_v20 = vld [vmem:[#allocation8 + $0x64] ss:$8 sps:$4 sm:$0xff]   ;;  %1708 = vmatprep.subr.bf16.mxu1 %v3914_v19 }
 0x34e   :  { %1448 = vmatpush1.bf16.msra.mxu0 %v3882_v21  ;;  %v3915_v21 = vld [vmem:[#allocation8 + $0x60] ss:$8 sps:$4 sm:$0xff]  }
 0x34f   :  { %1449 = vmatprep.subr.bf16.mxu0 %v3887_v36 }
 0x352   :  { %1450 = vmatpush1.bf16.msra.mxu0 %v3885_v62 }
 0x353   :  { %1451 = vmatprep.subr.bf16.mxu0 %v3890_v37 }
 0x356   :  { %1452 = vmatpush2.bf16.msra.mxu0 %v3888_v0 }
 0x357   :  { %1453 = vmatprep.subr.bf16.mxu0 %v3893_v1  ;;  %v1121_v1 = vlaneseq }
 0x35a   :  { %1454 = vmatpush2.bf16.msra.mxu0 %v3891_v2 }
 0x35b   :  { %1455 = vmatprep.subr.bf16.mxu0 %v3896_v38 }
 0x35e   :  { %1456 = vmatpush2.bf16.msra.mxu0 %v3894_v39 }
 0x35f   :  { %1457 = vmatprep.subr.bf16.mxu0 %v3899_v5 }
 0x362   :  { %1458 = vmatpush2.bf16.msra.mxu0 %v3897_v6 }
 0x363   :  { %1459 = vmatprep.subr.bf16.mxu0 %v3902_v8 }
 0x366   :  { %1460 = vmatpush2.bf16.msra.mxu0 %v3900_v40  ;;  %v1122_v40 = vshrl.u32 %v1121_v1, 7 }
 0x367   :  { %1461 = vmatprep.subr.bf16.mxu0 %v3905_v10 }
 0x36a   :  { %1462 = vmatpush2.bf16.msra.mxu0 %v3903_v11 }
 0x36b   :  { %1463 = vmatprep.subr.bf16.mxu0 %v3908_v41 }
 0x36e   :  { %1464 = vmatpush2.bf16.msra.mxu0 %v3906_v12 }
 0x36f   :  { %1465 = vmatprep.subr.bf16.mxu0 %v3911_v13 }
 0x372   :  { %1466 = vmatpush2.bf16.msra.mxu0 %v3909_v14 }
 0x373   :  { %3686 = vmatprep.subr.mxu0 %v5113_v16 }
 0x3e3   :  { %v3662_v23 = vpop.f32.mrf.mxu0 }
 0x3e5   :  { %v3663_v24 = vpop.f32.mrf.mxu0 }
 0x3e6   :  { %v3664_v26 = vadd.f32 %v3663_v24, %v3662_v23  ;;  %v3920_v23 = vld [vmem:[#allocation8 + $0x54] ss:$8 sps:$4 sm:$0xff]   ;;  %v3918_v24 = vld [vmem:[#allocation8 + $0x50] ss:$8 sps:$4 sm:$0xff]  }
 0x3e7   :  { %v3665_v27 = vpop.f32.mrf.mxu0 }
 0x3e8   :  { %3405 = vmatmul.mubr.msk.f32.vlgmr.msra.gmra.mxu1 %vm627_vm0, %v3664_v26  ;;  %v3923_v26 = vld [vmem:[#allocation8 + $0x44] ss:$8 sps:$4 sm:$0xff]  }
 0x3e9   :  { %v3666_v28 = vpop.f32.mrf.mxu0  ;;  %1012 = vmatprep.mubr.f32.mxu1 %v4445_v42  ;;  %1709 = vmatpush1.bf16.msra.mxu1 %v3912_v18  ;;  %v5116_v18 = vsub.s32 0, %v1122_v40 }
 0x3ea   :  { %v3667_v29 = vadd.f32 %v3666_v28, %v3665_v27  ;;  %1710 = vmatprep.subr.bf16.mxu1 %v3917_v20  ;;  %v3921_v27 = vld [vmem:[#allocation8 + $0x40] ss:$8 sps:$4 sm:$0xff]   ;;  %v3926_v28 = vld [vmem:[#allocation8 + $0x34] ss:$8 sps:$4 sm:$0xff]  }
 0x3eb   :  { %v3668_v30 = vpop.f32.mrf.mxu0 }
 0x3ec   :  { %3406 = vmatmul.mubr.msk.f32.gmra.mxu1 %vm627_vm0, %v3667_v29  ;;  %v3924_v29 = vld [vmem:[#allocation8 + $0x30] ss:$8 sps:$4 sm:$0xff]  }
 0x3ed   :  { %v3669_v44 = vpop.f32.mrf.mxu0  ;;  %1018 = vmatprep.mubr.f32.mxu1 %v4445_v42  ;;  %1711 = vmatpush1.bf16.msra.mxu1 %v3915_v21  ;;  %v1119_v21 = vld [vmem:[%s5884_s29] sm:$0x3] }
 0x3ee   :  { %v3670_v31 = vadd.f32 %v3669_v44, %v3668_v30  ;;  %1712 = vmatprep.subr.bf16.mxu1 %v3920_v23  ;;  %v3929_v30 = vld [vmem:[#allocation8 + $0x24] ss:$8 sps:$4 sm:$0xff]   ;;  %v3927_v44 = vld [vmem:[#allocation8 + $0x20] ss:$8 sps:$4 sm:$0xff]  }
 0x3ef   :  { %v3671_v46 = vpop.f32.mrf.mxu0 }
 0x3f0   :  { %3407 = vmatmul.mubr.msk.f32.gmra.mxu1 %vm627_vm0, %v3670_v31  ;;  %v3932_v31 = vld [vmem:[#allocation8 + $0x14] ss:$8 sps:$4 sm:$0xff]  }
 0x3f1   :  { %v3672_v47 = vpop.f32.mrf.mxu0  ;;  %1024 = vmatprep.mubr.f32.mxu1 %v4445_v42  ;;  %1713 = vmatpush1.bf16.msra.mxu1 %v3918_v24 }
 0x3f2   :  { %v3673_v48 = vadd.f32 %v3672_v47, %v3671_v46  ;;  %1714 = vmatprep.subr.bf16.mxu1 %v3923_v26  ;;  %v3930_v46 = vld [vmem:[#allocation8 + $0x10] ss:$8 sps:$4 sm:$0xff]   ;;  %v3935_v47 = vld [vmem:[#allocation8 + $0x4] ss:$8 sps:$4 sm:$0xff]  }
 0x3f3   :  { %v3674_v32 = vpop.f32.mrf.mxu0 }
 0x3f4   :  { %3408 = vmatmul.mubr.msk.f32.gmra.mxu1 %vm627_vm0, %v3673_v48  ;;  %v3933_v48 = vld [vmem:[#allocation8] ss:$8 sps:$4 sm:$0xff]  }
 0x3f5   :  { %v3675_v50 = vpop.f32.mrf.mxu0  ;;  %1030 = vmatprep.mubr.f32.mxu1 %v4445_v42  ;;  %1715 = vmatpush1.bf16.msra.mxu1 %v3921_v27 }
 0x3f6   :  { %v3676_v33 = vadd.f32 %v3675_v50, %v3674_v32  ;;  %1716 = vmatprep.subr.bf16.mxu1 %v3926_v28  ;;  %v3938_v32 = vld [vmem:[#allocation8 + $0xf4] ss:$8 sps:$4 sm:$0xff]   ;;  %v3936_v50 = vld [vmem:[#allocation8 + $0xf0] ss:$8 sps:$4 sm:$0xff]   ;;  %v5121_v28 = vsub.s32 1, %v1122_v40 }
 0x3f7   :  { %v3677_v52 = vpop.f32.mrf.mxu0 }
 0x3f8   :  { %3409 = vmatmul.mubr.msk.f32.gmra.mxu1 %vm627_vm0, %v3676_v33  ;;  %v3941_v33 = vld [vmem:[#allocation8 + $0xe4] ss:$8 sps:$4 sm:$0xff]  }
 0x3f9   :  { %v3678_v53 = vpop.f32.mrf.mxu0  ;;  %1036 = vmatprep.mubr.f32.mxu1 %v4445_v42  ;;  %1717 = vmatpush1.bf16.msra.mxu1 %v3924_v29  ;;  %v5124_v29 = vrot.slane %v1119_v21, %v5116_v18 }
 0x3fa   :  { %v3679_v54 = vadd.f32 %v3678_v53, %v3677_v52  ;;  %1718 = vmatprep.subr.bf16.mxu1 %v3929_v30  ;;  %v3939_v52 = vld [vmem:[#allocation8 + $0xe0] ss:$8 sps:$4 sm:$0xff]   ;;  %v3944_v53 = vld [vmem:[#allocation8 + $0xd4] ss:$8 sps:$4 sm:$0xff]  }
 0x3fb   :  { %v3680_v34 = vpop.f32.mrf.mxu0 }
 0x3fc   :  { %3410 = vmatmul.mubr.msk.f32.gmra.mxu1 %vm627_vm0, %v3679_v54  ;;  %v3942_v54 = vld [vmem:[#allocation8 + $0xd0] ss:$8 sps:$4 sm:$0xff]  }
 0x3fd   :  { %v3681_v56 = vpop.f32.mrf.mxu0  ;;  %1042 = vmatprep.mubr.f32.mxu1 %v4445_v42  ;;  %1719 = vmatpush1.bf16.msra.mxu1 %v3927_v44 }
 0x3fe   :  { %v3682_v35 = vadd.f32 %v3681_v56, %v3680_v34  ;;  %1720 = vmatprep.subr.bf16.mxu1 %v3932_v31  ;;  %v3947_v34 = vld [vmem:[#allocation8 + $0xc4] ss:$8 sps:$4 sm:$0xff]   ;;  %v3945_v56 = vld [vmem:[#allocation8 + $0xc0] ss:$8 sps:$4 sm:$0xff]   ;;  %v1147_v31 = vld [vmem:[#allocation2] sm:$0x3] }
 0x3ff   :  { %v3683_v58 = vpop.f32.mrf.mxu0 }
 0x400   :  { %3411 = vmatmul.mubr.msk.f32.gmra.mxu1 %vm627_vm0, %v3682_v35  ;;  %v3950_v35 = vld [vmem:[#allocation8 + $0xb4] ss:$8 sps:$4 sm:$0xff]  }
 0x401   :  { %v3684_v59 = vpop.f32.mrf.mxu0  ;;  %1048 = vmatprep.mubr.f32.mxu1 %v4445_v42  ;;  %1721 = vmatpush1.bf16.msra.mxu1 %v3930_v46 }
 0x402   :  { %v3685_v60 = vadd.f32 %v3684_v59, %v3683_v58  ;;  %1722 = vmatprep.subr.bf16.mxu1 %v3935_v47  ;;  %v3948_v58 = vld [vmem:[#allocation8 + $0xb0] ss:$8 sps:$4 sm:$0xff]  }
 0x404   :  { %3412 = vmatmul.mubr.msk.f32.gmra.mxu1 %vm627_vm0, %v3685_v60 }
 0x405   :  { %1723 = vmatpush1.bf16.msra.mxu1 %v3933_v48 }
 0x406   :  { %1724 = vmatprep.subr.bf16.mxu1 %v3938_v32 }
 0x409   :  { %1725 = vmatpush2.bf16.msra.mxu1 %v3936_v50 }
 0x40a   :  { %1726 = vmatprep.subr.bf16.mxu1 %v3941_v33 }
 0x40d   :  { %1727 = vmatpush2.bf16.msra.mxu1 %v3939_v52 }
 0x40e   :  { %1728 = vmatprep.subr.bf16.mxu1 %v3944_v53  ;;  %v5128_v53 = vrot.slane %v1119_v21, %v5121_v28 }
 0x411   :  { %1729 = vmatpush2.bf16.msra.mxu1 %v3942_v54  ;;  %v5131_v54 = vrot.slane %v1147_v31, %v5116_v18 }
 0x412   :  { %1730 = vmatprep.subr.bf16.mxu1 %v3947_v34 }
 0x415   :  { %1731 = vmatpush2.bf16.msra.mxu1 %v3945_v56 }
 0x416   :  { %1732 = vmatprep.subr.bf16.mxu1 %v3950_v35 }
 0x419   :  { %1733 = vmatpush2.bf16.msra.mxu1 %v3948_v58 }
 0x4a8   :  { %v1008_v59 = vpop.f32.mrf.mxu1 }
 0x4a9   :  { %v1055_v60 = vmul.f32 0.03125, %v1008_v59 }
 0x4aa   :  { %v1010_v36 = vpop.f32.mrf.mxu1 }
 0x4ab   :  { %v1071_v62 = vadd.f32 1e-05, %v1055_v60  ;;  %v1056_v37 = vmul.f32 0.03125, %v1010_v36  ;;  %v5136_v60 = vrot.slane %v1147_v31, %v5121_v28 }
 0x4ac   :  { %v1014_v0 = vpop.f32.mrf.mxu1 }
 0x4ad   :  { %4064 = vrsqrt.f32 %v1071_v62  ;;  %v1072_v2 = vadd.f32 1e-05, %v1056_v37  ;;  %v1057_v38 = vmul.f32 0.03125, %v1014_v0 }
 0x4ae   :  { %v1016_v39 = vpop.f32.mrf.mxu1 }
 0x4af   :  { %4066 = vrsqrt.f32 %v1072_v2  ;;  %v1073_v5 = vadd.f32 1e-05, %v1057_v38  ;;  %v1058_v6 = vmul.f32 0.03125, %v1016_v39 }
 0x4b0   :  { %v1020_v8 = vpop.f32.mrf.mxu1 }
 0x4b1   :  { %4068 = vrsqrt.f32 %v1073_v5  ;;  %v1074_v10 = vadd.f32 1e-05, %v1058_v6  ;;  %v1059_v11 = vmul.f32 0.03125, %v1020_v8 }
 0x4b2   :  { %v1022_v41 = vpop.f32.mrf.mxu1 }
 0x4b3   :  { %4070 = vrsqrt.f32 %v1074_v10  ;;  %v1075_v12 = vadd.f32 1e-05, %v1059_v11  ;;  %v1060_v13 = vmul.f32 0.03125, %v1022_v41 }
 0x4b4   :  { %v1026_v14 = vpop.f32.mrf.mxu1 }
 0x4b5   :  { %v1076_v19 = vadd.f32 1e-05, %v1060_v13  ;;  %v1061_v20 = vmul.f32 0.03125, %v1026_v14  ;;  %4072 = vrsqrt.f32 %v1075_v12 }
 0x4b6   :  { %v1028_v23 = vpop.f32.mrf.mxu1 }
 0x4b7   :  { %4074 = vrsqrt.f32 %v1076_v19  ;;  %v1077_v24 = vadd.f32 1e-05, %v1061_v20  ;;  %v1062_v26 = vmul.f32 0.03125, %v1028_v23 }
 0x4b8   :  { %v1032_v27 = vpop.f32.mrf.mxu1 }
 0x4b9   :  { %v1078_v30 = vadd.f32 1e-05, %v1062_v26  ;;  %v1063_v44 = vmul.f32 0.03125, %v1032_v27  ;;  %4076 = vrsqrt.f32 %v1077_v24 }
 0x4ba   :  { %v4065_v46 = vpop.eup %4064  ;;  %v1034_v47 = vpop.f32.mrf.mxu1 }
 0x4bb   :  { %v1103_v48 = vmul.f32 %v4065_v46, %v5016_v7  ;;  %4078 = vrsqrt.f32 %v1078_v30  ;;  %v1079_v32 = vadd.f32 1e-05, %v1063_v44  ;;  %v1064_v50 = vmul.f32 0.03125, %v1034_v47 }
 0x4bc   :  { %v4067_v33 = vpop.eup %4066  ;;  %v1038_v52 = vpop.f32.mrf.mxu1 }
 0x4bd   :  { %v1131_v34 = vmul.f32 %v5124_v29, %v1103_v48  ;;  %4080 = vrsqrt.f32 %v1079_v32  ;;  %v1080_v56 = vadd.f32 1e-05, %v1064_v50  ;;  %v1065_v35 = vmul.f32 0.03125, %v1038_v52 }
 0x4be   :  { %v4069_v58 = vpop.eup %4068  ;;  %v1040_v59 = vpop.f32.mrf.mxu1  ;;  %v1104_v7 = vmul.f32 %v4067_v33, %v5019_v9 }
 0x4bf   :  { %v1105_v36 = vmul.f32 %v4069_v58, %v5026_v15  ;;  %4082 = vrsqrt.f32 %v1080_v56  ;;  %v1081_v62 = vadd.f32 1e-05, %v1065_v35  ;;  %v1066_v37 = vmul.f32 0.03125, %v1040_v59 }
 0x4c0   :  { %v4071_v0 = vpop.eup %4070  ;;  %v1044_v1 = vpop.f32.mrf.mxu1  ;;  %v1132_v2 = vmul.f32 %v5128_v53, %v1104_v7  ;;  %v1159_v38 = vadd.f32 %v5131_v54, %v1131_v34 }
 0x4c1   :  { %v1133_v39 = vmul.f32 %v5124_v29, %v1105_v36  ;;  %4084 = vrsqrt.f32 %v1081_v62  ;;  %v1082_v5 = vadd.f32 1e-05, %v1066_v37  ;;  %v1067_v6 = vmul.f32 0.03125, %v1044_v1 }
 0x4c2   :  { %v1046_v9 = vpop.f32.mrf.mxu1  ;;  %v1106_v8 = vmul.f32 %v4071_v0, %v5029_v17  ;;  %v1160_v40 = vadd.f32 %v5136_v60, %v1132_v2  ;;  %vm1175_vm1 = vcmp.ge.f32.partialorder %v1159_v38, 0.0  ;;  %v1191_v15 = vmul.f32 0.01, %v1159_v38  ;;  %v4073_v10 = vpop.eup %4072 }
 0x4c3   :  { %4086 = vrsqrt.f32 %v1082_v5  ;;  %v1083_v11 = vadd.f32 1e-05, %v1067_v6  ;;  %v1068_v41 = vmul.f32 0.03125, %v1046_v9  ;;  %v1161_v12 = vadd.f32 %v5131_v54, %v1133_v39 }
 0x4c4   :  { %v4075_v13 = vpop.eup %4074  ;;  %v1050_v14 = vpop.f32.mrf.mxu1  ;;  %v1134_v19 = vmul.f32 %v5128_v53, %v1106_v8  ;;  %vm1176_vm2 = vcmp.ge.f32.partialorder %v1160_v40, 0.0  ;;  %v1192_v20 = vmul.f32 0.01, %v1160_v40  ;;  %v1207_v17 = vsel %vm1175_vm1, %v1159_v38, %v1191_v15  ;;  %v5168_v15 = vld [vmem:[%s5868_s16 + $0x78] sm:$0xff] }
 0x4c5   :  { %4088 = vrsqrt.f32 %v1083_v11  ;;  %v1084_v21 = vadd.f32 1e-05, %v1068_v41  ;;  %v1069_v23 = vmul.f32 0.03125, %v1050_v14  ;;  %vm1177_vm3 = vcmp.ge.f32.partialorder %v1161_v12, 0.0  ;;  %v5174_v41 = vld [vmem:[%s5868_s16 + $0xf0] sm:$0xff] }
 0x4c6   :  { %v1052_v24 = vpop.f32.mrf.mxu1  ;;  %v1162_v26 = vadd.f32 %v5136_v60, %v1134_v19  ;;  %v1193_v27 = vmul.f32 0.01, %v1161_v12  ;;  %v1108_v30 = vmul.f32 %v4075_v13, %v5039_v25  ;;  %v4077_v44 = vpop.eup %4076  ;;  %v1107_v47 = vmul.f32 %v4073_v10, %v5034_v22  ;;  %v5183_v19 = vld [vmem:[%s5868_s16 + $0x70] sm:$0xff] }
 0x4c7   :  { %4090 = vrsqrt.f32 %v1084_v21  ;;  %v1085_v31 = vadd.f32 1e-05, %v1069_v23  ;;  %v1070_v46 = vmul.f32 0.03125, %v1052_v24  ;;  %v1208_v50 = vsel %vm1176_vm2, %v1160_v40, %v1192_v20 }
 0x4c8   :  { %v4079_v48 = vpop.eup %4078  ;;  %vm1178_vm4 = vcmp.ge.f32.partialorder %v1162_v26, 0.0  ;;  %v1194_v32 = vmul.f32 0.01, %v1162_v26  ;;  %v1136_v33 = vmul.f32 %v5128_v53, %v1108_v30  ;;  %v1209_v34 = vsel %vm1177_vm3, %v1161_v12, %v1193_v27  ;;  %v5198_v27 = vld [vmem:[%s5868_s16 + $0x68] sm:$0xff] }
 0x4c9   :  { %4092 = vrsqrt.f32 %v1085_v31  ;;  %v1086_v52 = vadd.f32 1e-05, %v1070_v46  ;;  %v1110_v56 = vmul.f32 %v4079_v48, %v5049_v45  ;;  %v1109_v59 = vmul.f32 %v4077_v44, %v5044_v43  ;;  %v5206_v48 = vld [vmem:[%s5868_s16 + $0xe0] sm:$0xff] }
 0x4ca   :  { %v4081_v35 = vpop.eup %4080  ;;  %v1210_v25 = vsel %vm1178_vm4, %v1162_v26, %v1194_v32  ;;  %v1164_v58 = vadd.f32 %v5136_v60, %v1136_v33  ;;  %v1135_v22 = vmul.f32 %v5124_v29, %v1107_v47  ;;  %v1223_v0 = vpack.c.bf16 %v1209_v34, %v1207_v17  ;;  %v5214_v33 = vld [vmem:[%s5868_s16 + $0x60] sm:$0xff] }
 0x4cb   :  { %4094 = vrsqrt.f32 %v1086_v52  ;;  %v1224_v7 = vpack.c.bf16 %v1210_v25, %v1208_v50  ;;  %v1138_v36 = vmul.f32 %v5128_v53, %v1110_v56  ;;  %v1111_v62 = vmul.f32 %v4081_v35, %v5054_v49  ;;  %v5221_v35 = vld [vmem:[%s5868_s16 + $0xd8] sm:$0xff] }
 0x4cc   :  { %v4083_v37 = vpop.eup %4082  ;;  %v1196_v1 = vmul.f32 0.01, %v1164_v58  ;;  %v1137_v2 = vmul.f32 %v5124_v29, %v1109_v59  ;;  %v1163_v45 = vadd.f32 %v5131_v54, %v1135_v22  ;;  %vm1180_vm5 = vcmp.ge.f32.partialorder %v1164_v58, 0.0  ;;  %v5229_v59 = vld [vmem:[%s5868_s16 + $0x58] sm:$0xff] }
 0x4cd   :  { %1467 = vmatprep.mubr.bf16.mxu0 %v1224_v7  ;;  %v1166_v38 = vadd.f32 %v5136_v60, %v1138_v36  ;;  %v1112_v43 = vmul.f32 %v4083_v37, %v5059_v51  ;;  %v1139_v49 = vmul.f32 %v5124_v29, %v1111_v62  ;;  %v5236_v36 = vld [vmem:[%s5868_s16 + $0xd0] sm:$0xff]  ;;  %vm2888_vm2 = vcmask 523264  }
 0x4ce   :  { %v4085_v39 = vpop.eup %4084  ;;  %1468 = vmatmul.mubr.bf16.vlgmr.msra.gmra.mxu0 %v1223_v0  ;;  %v1165_v5 = vadd.f32 %v5131_v54, %v1137_v2  ;;  %v1195_v6 = vmul.f32 0.01, %v1163_v45  ;;  %v1212_v10 = vsel %vm1180_vm5, %v1164_v58, %v1196_v1  ;;  %vm1179_vm7 = vcmp.ge.f32.partialorder %v1163_v45, 0.0  ;;  %v5245_v1 = vld [vmem:[%s5868_s16 + $0x50] sm:$0xff] }
 0x4cf   :  { %vm1182_vm6 = vcmp.ge.f32.partialorder %v1166_v38, 0.0  ;;  %v1198_v9 = vmul.f32 0.01, %v1166_v38  ;;  %v1140_v8 = vmul.f32 %v5128_v53, %v1112_v43  ;;  %v1113_v40 = vmul.f32 %v4085_v39, %v5064_v55  ;;  %3687 = vmatpush3.msra.mxu0 %v5168_v15 }
 0x4d0   :  { %v4087_v51 = vpop.eup %4086  ;;  %vm1181_vm8 = vcmp.ge.f32.partialorder %v1165_v5, 0.0  ;;  %v1197_v11 = vmul.f32 0.01, %v1165_v5  ;;  %3688 = vmatprep.subr.mxu0 %v5174_v41  ;;  %v1167_v17 = vadd.f32 %v5131_v54, %v1139_v49  ;;  %v1211_v24 = vsel %vm1179_vm7, %v1163_v45, %v1195_v6  ;;  %v5267_v49 = vld [vmem:[%s5868_s16 + $0xc0] sm:$0xff] }
 0x4d1   :  { %v1214_v55 = vsel %vm1182_vm6, %v1166_v38, %v1198_v9  ;;  %v1114_v12 = vmul.f32 %v4087_v51, %v5069_v57  ;;  %v1168_v13 = vadd.f32 %v5136_v60, %v1140_v8  ;;  %v1141_v14 = vmul.f32 %v5124_v29, %v1113_v40  ;;  %3689 = vmatpush3.msra.mxu0 %v5183_v19  ;;  %v5190_v57 = vld [vmem:[%s5868_s16 + $0xe8] sm:$0xff]  ;;  %v5274_v8 = vld [vmem:[%s5868_s16 + $0x40] sm:$0xff]  ;;  %v5280_v40 = vld [vmem:[%s5868_s16 + $0xb8] sm:$0xff] }
 0x4d2   :  { %v4089_v20 = vpop.eup %4088  ;;  %v1226_v21 = vpack.c.bf16 %v1214_v55, %v1212_v10  ;;  %v1213_v23 = vsel %vm1181_vm8, %v1165_v5, %v1197_v11  ;;  %3690 = vmatprep.subr.mxu0 %v5190_v57  ;;  %v1199_v52 = vmul.f32 0.01, %v1167_v17  ;;  %vm1183_vm12 = vcmp.ge.f32.partialorder %v1167_v17, 0.0  ;;  %v5252_v38 = vld [vmem:[%s5868_s16 + $0xc8] sm:$0xff]  ;;  %v5286_v10 = vld [vmem:[%s5868_s16 + $0x38] sm:$0xff]  ;;  %v5292_v11 = vld [vmem:[%s5868_s16 + $0xb0] sm:$0xff] }
 0x4d3   :  { %v1142_v26 = vmul.f32 %v5128_v53, %v1114_v12  ;;  %3691 = vmatpush3.msra.mxu0 %v5198_v27  ;;  %v1225_v44 = vpack.c.bf16 %v1213_v23, %v1211_v24  ;;  %v1200_v31 = vmul.f32 0.01, %v1168_v13  ;;  %v1169_v46 = vadd.f32 %v5131_v54, %v1141_v14  ;;  %v5260_v5 = vld [vmem:[%s5868_s16 + $0x48] sm:$0xff]  ;;  %v5298_v14 = vld [vmem:[%s5868_s16 + $0x30] sm:$0xff] }
 0x4d4   :  { %v4091_v30 = vpop.eup %4090  ;;  %1477 = vmatprep.mubr.bf16.mxu0 %v1226_v21  ;;  %v1115_v47 = vmul.f32 %v4089_v20, %v5074_v61  ;;  %3692 = vmatprep.subr.mxu0 %v5206_v48  ;;  %vm1184_vm9 = vcmp.ge.f32.partialorder %v1168_v13, 0.0  ;;  %v5304_v21 = vld [vmem:[%s5868_s16 + $0xa8] sm:$0xff] }
 0x4d5   :  { %v1170_v32 = vadd.f32 %v5136_v60, %v1142_v26  ;;  %v1116_v50 = vmul.f32 %v4091_v30, %v5079_v63  ;;  %3693 = vmatpush3.msra.mxu0 %v5214_v33  ;;  %vm1185_vm10 = vcmp.ge.f32.partialorder %v1169_v46, 0.0  ;;  %v1201_v34 = vmul.f32 0.01, %v1169_v46  ;;  %v5316_v26 = vld [vmem:[%s5868_s16 + $0xa0] sm:$0xff] }
 0x4d6   :  { %v4093_v61 = vpop.eup %4092  ;;  %1478 = vmatmul.mubr.bf16.gmra.mxu0 %v1225_v44  ;;  %v1143_v56 = vmul.f32 %v5124_v29, %v1115_v47  ;;  %3694 = vmatprep.subr.mxu0 %v5221_v35  ;;  %v1216_v7 = vsel %vm1184_vm9, %v1168_v13, %v1200_v31  ;;  %v5322_v30 = vld [vmem:[%s5868_s16 + $0x20] sm:$0xff]  ;;  %v5328_v44 = vld [vmem:[%s5868_s16 + $0x98] sm:$0xff]  ;;  %v5346_v47 = vld [vmem:[%s5868_s16 + $0x10] sm:$0xff] }
 0x4d7   :  { %vm1186_vm11 = vcmp.ge.f32.partialorder %v1170_v32, 0.0  ;;  %v1202_v63 = vmul.f32 0.01, %v1170_v32  ;;  %v1144_v25 = vmul.f32 %v5128_v53, %v1116_v50  ;;  %v1117_v58 = vmul.f32 %v4093_v61, %v5084_v3  ;;  %3695 = vmatpush3.msra.mxu0 %v5229_v59  ;;  %v5334_v31 = vld [vmem:[%s5868_s16 + $0x18] sm:$0xff]  ;;  %v5358_v50 = vld [vmem:[%s5868_s16 + $0x8] sm:$0xff]  ;;  %v5364_v61 = vld [vmem:[%s5868_s16 + $0x80] sm:$0xff] }
 0x4d8   :  { %v4095_v22 = vpop.eup %4094  ;;  %3696 = vmatprep.subr.mxu0 %v5236_v36  ;;  %v1217_v3 = vsel %vm1185_vm10, %v1169_v46, %v1201_v34  ;;  %v1171_v39 = vadd.f32 %v5131_v54, %v1143_v56  ;;  %v5340_v46 = vld [vmem:[%s5868_s16 + $0x90] sm:$0xff]  ;;  %v3951_v34 = vld [vmem:[#allocation8 + $0xa0] ss:$8 sps:$4 sm:$0xff]  }
 0x4d9   :  { %v1218_v62 = vsel %vm1186_vm11, %v1170_v32, %v1202_v63  ;;  %v1118_v37 = vmul.f32 %v4095_v22, %v5089_v4  ;;  %v1172_v0 = vadd.f32 %v5136_v60, %v1144_v25  ;;  %3697 = vmatpush3.msra.mxu0 %v5245_v1  ;;  %v1145_v45 = vmul.f32 %v5124_v29, %v1117_v58  ;;  %v5352_v32 = vld [vmem:[%s5868_s16 + $0x88] sm:$0xff]  ;;  %v3956_v63 = vld [vmem:[#allocation8 + $0x94] ss:$8 sps:$4 sm:$0xff]   ;;  %v3954_v25 = vld [vmem:[#allocation8 + $0x90] ss:$8 sps:$4 sm:$0xff]  }
 0x4da   :  { %v1228_v2 = vpack.c.bf16 %v1218_v62, %v1216_v7  ;;  %3698 = vmatprep.subr.mxu0 %v5252_v38  ;;  %v1215_v4 = vsel %vm1183_vm12, %v1167_v17, %v1199_v52  ;;  %v1203_v51 = vmul.f32 0.01, %v1171_v39  ;;  %vm1187_vm1 = vcmp.ge.f32.partialorder %v1171_v39, 0.0  ;;  %v5310_v17 = vld [vmem:[%s5868_s16 + $0x28] sm:$0xff]  ;;  %v5370_v52 = vld [vmem:[%s5868_s16] sm:$0xff] }
 0x4db   :  { %v1146_v43 = vmul.f32 %v5128_v53, %v1118_v37  ;;  %3699 = vmatpush3.msra.mxu0 %v5260_v5  ;;  %v1227_v29 = vpack.c.bf16 %v1217_v3, %v1215_v4  ;;  %v1173_v6 = vadd.f32 %v5131_v54, %v1145_v45  ;;  %v1204_v9 = vmul.f32 0.01, %v1172_v0  ;;  %v3953_v56 = vld [vmem:[#allocation8 + $0xa4] ss:$8 sps:$4 sm:$0xff]   ;;  %v3957_v58 = vld [vmem:[#allocation8 + $0x80] ss:$8 sps:$4 sm:$0xff]  }
 0x4dc   :  { %1487 = vmatprep.mubr.bf16.mxu0 %v1228_v2  ;;  %3700 = vmatprep.subr.mxu0 %v5267_v49  ;;  %vm1188_vm13 = vcmp.ge.f32.partialorder %v1172_v0, 0.0  ;;  %v1219_v23 = vsel %vm1187_vm1, %v1171_v39, %v1203_v51  ;;  %v3959_v22 = vld [vmem:[#allocation8 + $0x84] ss:$8 sps:$4 sm:$0xff]   ;;  %v1263_v3 = vld [vmem:[#allocation7] sm:$0x3]  ;;  %v5382_v51 = vld [vmem:[#allocation19] sm:$0xff] }
 0x4dd   :  { %v1174_v53 = vadd.f32 %v5136_v60, %v1146_v43  ;;  %3701 = vmatpush3.msra.mxu0 %v5274_v8  ;;  %vm1189_vm14 = vcmp.ge.f32.partialorder %v1173_v6, 0.0  ;;  %v1205_v54 = vmul.f32 0.01, %v1173_v6  ;;  %v1220_v55 = vsel %vm1188_vm13, %v1172_v0, %v1204_v9  ;;  %1734 = vmatprep.subr.bf16.mxu1 %v3953_v56  ;;  %v4160_v7 = vld [vmem:[#allocation19 + $0x8] sm:$0xff] }
 0x4de   :  { %1488 = vmatmul.mubr.bf16.gmra.mxu0 %v1227_v29  ;;  %3702 = vmatprep.subr.mxu0 %v5280_v40  ;;  %v1272_v0 = vrot.slane %v1263_v3, %v5121_v28 }
 0x4df   :  { %vm1190_vm15 = vcmp.ge.f32.partialorder %v1174_v53, 0.0  ;;  %v1206_v60 = vmul.f32 0.01, %v1174_v53  ;;  %3703 = vmatpush3.msra.mxu0 %v5286_v10  ;;  %v1221_v13 = vsel %vm1189_vm14, %v1173_v6, %v1205_v54  ;;  %1735 = vmatpush2.bf16.msra.mxu1 %v3951_v34 }
 0x4e0   :  { %3704 = vmatprep.subr.mxu0 %v5292_v11  ;;  %v1229_v24 = vpack.c.bf16 %v1221_v13, %v1219_v23  ;;  %1736 = vmatprep.subr.bf16.mxu1 %v3956_v63 }
 0x4e1   :  { %v1222_v12 = vsel %vm1190_vm15, %v1174_v53, %v1206_v60  ;;  %3705 = vmatpush3.msra.mxu0 %v5298_v14 }
 0x4e2   :  { %v1230_v20 = vpack.c.bf16 %v1222_v12, %v1220_v55  ;;  %3706 = vmatprep.subr.mxu0 %v5304_v21 }
 0x4e3   :  { %3707 = vmatpush3.msra.mxu0 %v5310_v17  ;;  %1737 = vmatpush2.bf16.msra.mxu1 %v3954_v25 }
 0x4e4   :  { %1497 = vmatprep.mubr.bf16.mxu0 %v1230_v20  ;;  %3708 = vmatprep.subr.mxu0 %v5316_v26 }
 0x4e5   :  { %3709 = vmatpush3.msra.mxu0 %v5322_v30  ;;  %1738 = vmatprep.subr.bf16.mxu1 %v3959_v22 }
 0x4e6   :  { %1498 = vmatmul.mubr.bf16.gmra.mxu0 %v1229_v24  ;;  %3710 = vmatprep.subr.mxu0 %v5328_v44 }
 0x4e7   :  { %3711 = vmatpush3.msra.mxu0 %v5334_v31  ;;  %1739 = vmatpush2.bf16.msra.mxu1 %v3957_v58 }
 0x4e8   :  { %3712 = vmatprep.subr.mxu0 %v5340_v46  ;;  %1940 = vmatprep.subr.mxu1 %v4160_v7 }
 0x4e9   :  { %3713 = vmatpush3.msra.mxu0 %v5346_v47 }
 0x4ea   :  { %3714 = vmatprep.subr.mxu0 %v5352_v32 }
 0x4eb   :  { %3715 = vmatpush3.msra.mxu0 %v5358_v50 }
 0x4ec   :  { %3716 = vmatprep.subr.mxu0 %v5364_v61 }
 0x4ed   :  { %3717 = vmatpush3.msra.mxu0 %v5370_v52 }
 0x4ee   :  { %3742 = vmatprep.subr.mxu0 %v5113_v16  ;;  %v1268_v16 = vrot.slane %v1263_v3, %v5116_v18 }
 0x58e   :  { %v1469_v62 = vpop.f32.mrf.mxu0 }
 0x58f   :  { %v1470_v29 = vadd.f32 %v1469_v62, %v1268_v16 }
 0x590   :  { %v1471_v37 = vpop.f32.mrf.mxu0 }
 0x591   :  { %v1472_v43 = vadd.f32 %v1471_v37, %v1272_v0 }
 0x592   :  { %v1473_v2 = vpop.f32.mrf.mxu0 }
 0x593   :  { %v1474_v45 = vadd.f32 %v1473_v2, %v1268_v16 }
 0x594   :  { %v1475_v4 = vpop.f32.mrf.mxu0 }
 0x595   :  { %v1476_v39 = vadd.f32 %v1475_v4, %v1272_v0  ;;  %v5378_v9 = vpack.c.bf16 %v1474_v45, %v1470_v29 }
 0x596   :  { %v1479_v6 = vpop.f32.mrf.mxu0 }
 0x597   :  { %v5376_v53 = vpack.c.bf16 %v1476_v39, %v1472_v43  ;;  %v1480_v23 = vadd.f32 %v1479_v6, %v1268_v16 }
 0x598   :  { %v1481_v54 = vpop.f32.mrf.mxu0 }
 0x599   :  { %1740 = vmatprep.mubr.bf16.mxu1 %v5376_v53  ;;  %v1482_v13 = vadd.f32 %v1481_v54, %v1272_v0 }
 0x59a   :  { %v1483_v60 = vpop.f32.mrf.mxu0  ;;  %1741 = vmatmul.mubr.bf16.vlgmr.msra.gmra.mxu1 %v5378_v9 }
 0x59b   :  { %1941 = vmatpush1.msra.mxu1 %v5382_v51  ;;  %v1484_v55 = vadd.f32 %v1483_v60, %v1268_v16 }
 0x59c   :  { %v1485_v12 = vpop.f32.mrf.mxu0  ;;  %2230 = vmatprep.subr.mxu1 %v4160_v7 }
 0x59d   :  { %v1486_v20 = vadd.f32 %v1485_v12, %v1272_v0  ;;  %v5387_v56 = vpack.c.bf16 %v1484_v55, %v1480_v23 }
 0x59e   :  { %v1489_v24 = vpop.f32.mrf.mxu0 }
 0x59f   :  { %v5385_v34 = vpack.c.bf16 %v1486_v20, %v1482_v13  ;;  %v1490_v37 = vadd.f32 %v1489_v24, %v1268_v16 }
 0x5a0   :  { %v1491_v63 = vpop.f32.mrf.mxu0 }
 0x5a1   :  { %1750 = vmatprep.mubr.bf16.mxu1 %v5385_v34  ;;  %v1492_v62 = vadd.f32 %v1491_v63, %v1272_v0 }
 0x5a2   :  { %v1493_v25 = vpop.f32.mrf.mxu0  ;;  %1751 = vmatmul.mubr.bf16.gmra.mxu1 %v5387_v56 }
 0x5a3   :  { %v1494_v58 = vadd.f32 %v1493_v25, %v1268_v16 }
 0x5a4   :  { %v1495_v22 = vpop.f32.mrf.mxu0 }
 0x5a5   :  { %v1496_v3 = vadd.f32 %v1495_v22, %v1272_v0  ;;  %v5393_v45 = vpack.c.bf16 %v1494_v58, %v1490_v37 }
 0x5a6   :  { %v1499_v7 = vpop.f32.mrf.mxu0 }
 0x5a7   :  { %v5391_v2 = vpack.c.bf16 %v1496_v3, %v1492_v62  ;;  %v1500_v60 = vadd.f32 %v1499_v7, %v1268_v16 }
 0x5a8   :  { %v1501_v4 = vpop.f32.mrf.mxu0 }
 0x5a9   :  { %1760 = vmatprep.mubr.bf16.mxu1 %v5391_v2  ;;  %v1502_v6 = vadd.f32 %v1501_v4, %v1272_v0 }
 0x5aa   :  { %v1503_v43 = vpop.f32.mrf.mxu0  ;;  %1761 = vmatmul.mubr.bf16.gmra.mxu1 %v5393_v45 }
 0x5ab   :  { %v1504_v39 = vadd.f32 %v1503_v43, %v1268_v16 }
 0x5ac   :  { %v1505_v29 = vpop.f32.mrf.mxu0 }
 0x5ad   :  { %v1506_v54 = vadd.f32 %v1505_v29, %v1272_v0  ;;  %v5399_v12 = vpack.c.bf16 %v1504_v39, %v1500_v60 }
 0x5af   :  { %v5397_v55 = vpack.c.bf16 %v1506_v54, %v1502_v6 }
 0x5b1   :  { %1770 = vmatprep.mubr.bf16.mxu1 %v5397_v55 }
 0x5b2   :  { %1771 = vmatmul.mubr.bf16.gmra.mxu1 %v5399_v12 }
 0x5b3   :  { %1974 = vmatprep.mubr.f32.mxu1 %v4445_v42 }
 0x65a   :  { %v5404_v13 = vpop.f32.mrf.mxu1 }
 0x65c   :  { %v5406_v20 = vpop.f32.mrf.mxu1 }
 0x65d   :  { %1845 = vmatprep.mubr.f32.mxu0 %v5406_v20 }
 0x65e   :  { %v5409_v23 = vpop.f32.mrf.mxu1  ;;  %1846 = vmatmul.mubr.f32.vlgmr.msra.gmra.mxu0 %v5404_v13 }
 0x65f   :  { %3743 = vmatpush3.msra.mxu0 %v5168_v15 }
 0x660   :  { %v5413_v0 = vpop.f32.mrf.mxu1  ;;  %3744 = vmatprep.subr.mxu0 %v5174_v41 }
 0x661   :  { %1850 = vmatprep.mubr.f32.mxu0 %v5413_v0  ;;  %3745 = vmatpush3.msra.mxu0 %v5183_v19 }
 0x662   :  { %v5418_v16 = vpop.f32.mrf.mxu1  ;;  %1851 = vmatmul.mubr.f32.gmra.mxu0 %v5409_v23  ;;  %3746 = vmatprep.subr.mxu0 %v5190_v57 }
 0x663   :  { %3747 = vmatpush3.msra.mxu0 %v5198_v27 }
 0x664   :  { %v5423_v24 = vpop.f32.mrf.mxu1  ;;  %3748 = vmatprep.subr.mxu0 %v5206_v48 }
 0x665   :  { %1855 = vmatprep.mubr.f32.mxu0 %v5423_v24  ;;  %3749 = vmatpush3.msra.mxu0 %v5214_v33 }
 0x666   :  { %v5428_v15 = vpop.f32.mrf.mxu1  ;;  %1856 = vmatmul.mubr.f32.gmra.mxu0 %v5418_v16  ;;  %3750 = vmatprep.subr.mxu0 %v5221_v35 }
 0x667   :  { %3751 = vmatpush3.msra.mxu0 %v5229_v59 }
 0x668   :  { %v5433_v41 = vpop.f32.mrf.mxu1  ;;  %3752 = vmatprep.subr.mxu0 %v5236_v36 }
 0x669   :  { %1860 = vmatprep.mubr.f32.mxu0 %v5433_v41  ;;  %3753 = vmatpush3.msra.mxu0 %v5245_v1 }
 0x66a   :  { %v5438_v19 = vpop.f32.mrf.mxu1  ;;  %1861 = vmatmul.mubr.f32.gmra.mxu0 %v5428_v15  ;;  %3754 = vmatprep.subr.mxu0 %v5252_v38 }
 0x66b   :  { %3755 = vmatpush3.msra.mxu0 %v5260_v5 }
 0x66c   :  { %v5443_v57 = vpop.f32.mrf.mxu1  ;;  %3756 = vmatprep.subr.mxu0 %v5267_v49 }
 0x66d   :  { %1865 = vmatprep.mubr.f32.mxu0 %v5443_v57  ;;  %3757 = vmatpush3.msra.mxu0 %v5274_v8 }
 0x66e   :  { %v5448_v27 = vpop.f32.mrf.mxu1  ;;  %1866 = vmatmul.mubr.f32.gmra.mxu0 %v5438_v19  ;;  %3758 = vmatprep.subr.mxu0 %v5280_v40 }
 0x66f   :  { %3759 = vmatpush3.msra.mxu0 %v5286_v10 }
 0x670   :  { %v5453_v48 = vpop.f32.mrf.mxu1  ;;  %3760 = vmatprep.subr.mxu0 %v5292_v11 }
 0x671   :  { %1870 = vmatprep.mubr.f32.mxu0 %v5453_v48  ;;  %3761 = vmatpush3.msra.mxu0 %v5298_v14 }
 0x672   :  { %v5458_v33 = vpop.f32.mrf.mxu1  ;;  %1871 = vmatmul.mubr.f32.gmra.mxu0 %v5448_v27  ;;  %3762 = vmatprep.subr.mxu0 %v5304_v21 }
 0x673   :  { %3763 = vmatpush3.msra.mxu0 %v5310_v17 }
 0x674   :  { %v5463_v35 = vpop.f32.mrf.mxu1  ;;  %3764 = vmatprep.subr.mxu0 %v5316_v26 }
 0x675   :  { %1875 = vmatprep.mubr.f32.mxu0 %v5463_v35  ;;  %3765 = vmatpush3.msra.mxu0 %v5322_v30 }
 0x676   :  { %v5468_v59 = vpop.f32.mrf.mxu1  ;;  %1876 = vmatmul.mubr.f32.gmra.mxu0 %v5458_v33  ;;  %3766 = vmatprep.subr.mxu0 %v5328_v44 }
 0x677   :  { %3767 = vmatpush3.msra.mxu0 %v5334_v31 }
 0x678   :  { %v5473_v36 = vpop.f32.mrf.mxu1  ;;  %3768 = vmatprep.subr.mxu0 %v5340_v46 }
 0x679   :  { %1880 = vmatprep.mubr.f32.mxu0 %v5473_v36  ;;  %3769 = vmatpush3.msra.mxu0 %v5346_v47 }
 0x67a   :  { %1881 = vmatmul.mubr.f32.gmra.mxu0 %v5468_v59  ;;  %3770 = vmatprep.subr.mxu0 %v5352_v32 }
 0x67b   :  { %3771 = vmatpush3.msra.mxu0 %v5358_v50 }
 0x67c   :  { %3772 = vmatprep.subr.mxu0 %v5364_v61 }
 0x67d   :  { %3773 = vmatpush3.msra.mxu0 %v5370_v52 }
 0x71e   :  { %v3718_v1 = vpop.f32.mrf.mxu0 }
 0x720   :  { %v3719_v38 = vpop.f32.mrf.mxu0 }
 0x721   :  { %v3720_v5 = vadd.f32 %v3719_v38, %v3718_v1 }
 0x722   :  { %v3721_v49 = vpop.f32.mrf.mxu0 }
 0x723   :  { %3477 = vmatmul.mubr.msk.f32.vlgmr.msra.gmra.mxu1 %vm627_vm0, %v3720_v5 }
 0x724   :  { %2231 = vmatpush1.msra.mxu1 %v5382_v51  ;;  %v3722_v8 = vpop.f32.mrf.mxu0  ;;  %1980 = vmatprep.mubr.f32.mxu1 %v4445_v42 }
 0x725   :  { %v3723_v40 = vadd.f32 %v3722_v8, %v3721_v49  ;;  %2921 = vmatprep.subr.bf16.mxu1 %v5397_v55 }
 0x726   :  { %v3724_v10 = vpop.f32.mrf.mxu0 }
 0x727   :  { %3478 = vmatmul.mubr.msk.f32.gmra.mxu1 %vm627_vm0, %v3723_v40 }
 0x728   :  { %v3725_v11 = vpop.f32.mrf.mxu0  ;;  %1986 = vmatprep.mubr.f32.mxu1 %v4445_v42 }
 0x729   :  { %v3726_v14 = vadd.f32 %v3725_v11, %v3724_v10 }
 0x72a   :  { %v3727_v21 = vpop.f32.mrf.mxu0 }
 0x72b   :  { %3479 = vmatmul.mubr.msk.f32.gmra.mxu1 %vm627_vm0, %v3726_v14 }
 0x72c   :  { %v3728_v17 = vpop.f32.mrf.mxu0  ;;  %1992 = vmatprep.mubr.f32.mxu1 %v4445_v42 }
 0x72d   :  { %v3729_v26 = vadd.f32 %v3728_v17, %v3727_v21 }
 0x72e   :  { %v3730_v30 = vpop.f32.mrf.mxu0 }
 0x72f   :  { %3480 = vmatmul.mubr.msk.f32.gmra.mxu1 %vm627_vm0, %v3729_v26 }
 0x730   :  { %v3731_v44 = vpop.f32.mrf.mxu0  ;;  %1998 = vmatprep.mubr.f32.mxu1 %v4445_v42 }
 0x731   :  { %v3732_v31 = vadd.f32 %v3731_v44, %v3730_v30 }
 0x732   :  { %v3733_v46 = vpop.f32.mrf.mxu0 }
 0x733   :  { %3481 = vmatmul.mubr.msk.f32.gmra.mxu1 %vm627_vm0, %v3732_v31 }
 0x734   :  { %v3734_v47 = vpop.f32.mrf.mxu0  ;;  %2004 = vmatprep.mubr.f32.mxu1 %v4445_v42 }
 0x735   :  { %v3735_v32 = vadd.f32 %v3734_v47, %v3733_v46 }
 0x736   :  { %v3736_v50 = vpop.f32.mrf.mxu0 }
 0x737   :  { %3482 = vmatmul.mubr.msk.f32.gmra.mxu1 %vm627_vm0, %v3735_v32 }
 0x738   :  { %v3737_v61 = vpop.f32.mrf.mxu0  ;;  %2010 = vmatprep.mubr.f32.mxu1 %v4445_v42 }
 0x739   :  { %v3738_v52 = vadd.f32 %v3737_v61, %v3736_v50 }
 0x73a   :  { %v3739_v51 = vpop.f32.mrf.mxu0 }
 0x73b   :  { %3483 = vmatmul.mubr.msk.f32.gmra.mxu1 %vm627_vm0, %v3738_v52 }
 0x73c   :  { %v3740_v63 = vpop.f32.mrf.mxu0  ;;  %2016 = vmatprep.mubr.f32.mxu1 %v4445_v42 }
 0x73d   :  { %v3741_v25 = vadd.f32 %v3740_v63, %v3739_v51 }
 0x73f   :  { %3484 = vmatmul.mubr.msk.f32.gmra.mxu1 %vm627_vm0, %v3741_v25 }
 0x740   :  { %2264 = vmatprep.mubr.f32.mxu1 %v4445_v42 }
 0x7e3   :  { %v1976_v58 = vpop.f32.mrf.mxu1 }
 0x7e4   :  { %v2023_v22 = vmul.f32 0.03125, %v1976_v58 }
 0x7e5   :  { %v1978_v62 = vpop.f32.mrf.mxu1 }
 0x7e6   :  { %v2024_v3 = vmul.f32 0.03125, %v1978_v62  ;;  %v5502_v37 = vsub.f32 %v5404_v13, %v2023_v22 }
 0x7e7   :  { %v1982_v7 = vpop.f32.mrf.mxu1 }
 0x7e8   :  { %v5505_v4 = vsub.f32 %v5406_v20, %v2024_v3  ;;  %v2025_v43 = vmul.f32 0.03125, %v1982_v7  ;;  %v2055_v54 = vmul.f32 %v5502_v37, %v5502_v37 }
 0x7e9   :  { %v1984_v39 = vpop.f32.mrf.mxu1 }
 0x7ea   :  { %v2026_v29 = vmul.f32 0.03125, %v1984_v39  ;;  %v2056_v6 = vmul.f32 %v5505_v4, %v5505_v4  ;;  %v5512_v60 = vsub.f32 %v5409_v23, %v2025_v43 }
 0x7eb   :  { %v1988_v55 = vpop.f32.mrf.mxu1 }
 0x7ec   :  { %v5515_v13 = vsub.f32 %v5413_v0, %v2026_v29  ;;  %v2027_v1 = vmul.f32 0.03125, %v1988_v55  ;;  %2135 = vmatprep.mubr.f32.mxu0 %v2056_v6  ;;  %v2057_v23 = vmul.f32 %v5512_v60, %v5512_v60 }
 0x7ed   :  { %v1990_v20 = vpop.f32.mrf.mxu1  ;;  %2136 = vmatmul.mubr.f32.vlgmr.msra.gmra.mxu0 %v2055_v54 }
 0x7ee   :  { %v2028_v38 = vmul.f32 0.03125, %v1990_v20  ;;  %v2058_v5 = vmul.f32 %v5515_v13, %v5515_v13  ;;  %v5520_v49 = vsub.f32 %v5418_v16, %v2027_v1  ;;  %v3968_v20 = vld [vmem:[#allocation13 + $0x70] ss:$8 sps:$4 sm:$0xff]  }
 0x7ef   :  { %v1994_v8 = vpop.f32.mrf.mxu1 }
 0x7f0   :  { %v5525_v40 = vsub.f32 %v5423_v24, %v2028_v38  ;;  %v2029_v0 = vmul.f32 0.03125, %v1994_v8  ;;  %2140 = vmatprep.mubr.f32.mxu0 %v2058_v5  ;;  %v2059_v17 = vmul.f32 %v5520_v49, %v5520_v49  ;;  %v3970_v38 = vld [vmem:[#allocation13 + $0x74] ss:$8 sps:$4 sm:$0xff]   ;;  %v3971_v5 = vld [vmem:[#allocation13 + $0x60] ss:$8 sps:$4 sm:$0xff]  }
 0x7f1   :  { %v1996_v10 = vpop.f32.mrf.mxu1  ;;  %2141 = vmatmul.mubr.f32.gmra.mxu0 %v2057_v23  ;;  %2693 = vmatprep.subr.bf16.mxu0 %v3970_v38  ;;  %v3976_v8 = vld [vmem:[#allocation13 + $0x54] ss:$8 sps:$4 sm:$0xff]   ;;  %v3979_v23 = vld [vmem:[#allocation13 + $0x44] ss:$8 sps:$4 sm:$0xff]  }
 0x7f2   :  { %v2030_v11 = vmul.f32 0.03125, %v1996_v10  ;;  %v2060_v14 = vmul.f32 %v5525_v40, %v5525_v40  ;;  %v5530_v21 = vsub.f32 %v5428_v15, %v2029_v0  ;;  %2694 = vmatpush1.bf16.msra.mxu0 %v3968_v20  ;;  %v3977_v0 = vld [vmem:[#allocation13 + $0x40] ss:$8 sps:$4 sm:$0xff]   ;;  %v3982_v10 = vld [vmem:[#allocation13 + $0x34] ss:$8 sps:$4 sm:$0xff]  }
 0x7f3   :  { %v2000_v16 = vpop.f32.mrf.mxu1  ;;  %v3989_v20 = vld [vmem:[#allocation13] ss:$8 sps:$4 sm:$0xff]   ;;  %v3994_v38 = vld [vmem:[#allocation13 + $0xf4] ss:$8 sps:$4 sm:$0xff]  }
 0x7f4   :  { %v5535_v26 = vsub.f32 %v5433_v41, %v2030_v11  ;;  %v2031_v24 = vmul.f32 0.03125, %v2000_v16  ;;  %2145 = vmatprep.mubr.f32.mxu0 %v2060_v14  ;;  %v2061_v47 = vmul.f32 %v5530_v21, %v5530_v21  ;;  %v3980_v11 = vld [vmem:[#allocation13 + $0x30] ss:$8 sps:$4 sm:$0xff]   ;;  %v3985_v14 = vld [vmem:[#allocation13 + $0x24] ss:$8 sps:$4 sm:$0xff]  }
 0x7f5   :  { %v2002_v30 = vpop.f32.mrf.mxu1  ;;  %2146 = vmatmul.mubr.f32.gmra.mxu0 %v2059_v17  ;;  %v3983_v16 = vld [vmem:[#allocation13 + $0x20] ss:$8 sps:$4 sm:$0xff]   ;;  %v3988_v17 = vld [vmem:[#allocation13 + $0x14] ss:$8 sps:$4 sm:$0xff]  }
 0x7f6   :  { %v2032_v44 = vmul.f32 0.03125, %v2002_v30  ;;  %v2062_v31 = vmul.f32 %v5535_v26, %v5535_v26  ;;  %v5540_v46 = vsub.f32 %v5438_v19, %v2031_v24  ;;  %v3986_v24 = vld [vmem:[#allocation13 + $0x10] ss:$8 sps:$4 sm:$0xff]  }
 0x7f7   :  { %v2006_v15 = vpop.f32.mrf.mxu1 }
 0x7f8   :  { %v5545_v32 = vsub.f32 %v5443_v57, %v2032_v44  ;;  %v2033_v41 = vmul.f32 0.03125, %v2006_v15  ;;  %2150 = vmatprep.mubr.f32.mxu0 %v2062_v31  ;;  %v2063_v63 = vmul.f32 %v5540_v46, %v5540_v46 }
 0x7f9   :  { %v2008_v50 = vpop.f32.mrf.mxu1  ;;  %2151 = vmatmul.mubr.f32.gmra.mxu0 %v2061_v47 }
 0x7fa   :  { %v2034_v61 = vmul.f32 0.03125, %v2008_v50  ;;  %v2064_v52 = vmul.f32 %v5545_v32, %v5545_v32  ;;  %v5550_v51 = vsub.f32 %v5448_v27, %v2033_v41 }
 0x7fb   :  { %v2012_v19 = vpop.f32.mrf.mxu1 }
 0x7fc   :  { %v5555_v25 = vsub.f32 %v5453_v48, %v2034_v61  ;;  %v2035_v57 = vmul.f32 0.03125, %v2012_v19  ;;  %2155 = vmatprep.mubr.f32.mxu0 %v2064_v52  ;;  %v2065_v7 = vmul.f32 %v5550_v51, %v5550_v51 }
 0x7fd   :  { %v2014_v58 = vpop.f32.mrf.mxu1  ;;  %2156 = vmatmul.mubr.f32.gmra.mxu0 %v2063_v63 }
 0x7fe   :  { %v2036_v22 = vmul.f32 0.03125, %v2014_v58  ;;  %v2066_v62 = vmul.f32 %v5555_v25, %v5555_v25  ;;  %v5560_v3 = vsub.f32 %v5458_v33, %v2035_v57 }
 0x7ff   :  { %v2018_v27 = vpop.f32.mrf.mxu1 }
 0x800   :  { %v5565_v43 = vsub.f32 %v5463_v35, %v2036_v22  ;;  %v2037_v48 = vmul.f32 0.03125, %v2018_v27  ;;  %2160 = vmatprep.mubr.f32.mxu0 %v2066_v62  ;;  %v2067_v33 = vmul.f32 %v5560_v3, %v5560_v3 }
 0x801   :  { %v2020_v39 = vpop.f32.mrf.mxu1  ;;  %2161 = vmatmul.mubr.f32.gmra.mxu0 %v2065_v7 }
 0x802   :  { %v2038_v29 = vmul.f32 0.03125, %v2020_v39  ;;  %v2068_v6 = vmul.f32 %v5565_v43, %v5565_v43  ;;  %v5570_v54 = vsub.f32 %v5468_v59, %v2037_v48  ;;  %v3973_v59 = vld [vmem:[#allocation13 + $0x64] ss:$8 sps:$4 sm:$0xff]   ;;  %v3960_v48 = vld [vmem:[%s5864_s12] sm:$0xff]   ;;  %v4446_v39 = vmov 0  }
 0x803   :  { %2695 = vmatprep.subr.bf16.mxu0 %v3973_v59  ;;  %v3992_v59 = vld [vmem:[#allocation13 + $0xf0] ss:$8 sps:$4 sm:$0xff]  }
 0x804   :  { %v5575_v55 = vsub.f32 %v5473_v36, %v2038_v29  ;;  %2165 = vmatprep.mubr.f32.mxu0 %v2068_v6  ;;  %v2069_v1 = vmul.f32 %v5570_v54, %v5570_v54  ;;  %2696 = vmatpush1.bf16.msra.mxu0 %v3971_v5  ;;  %v3974_v36 = vld [vmem:[#allocation13 + $0x50] ss:$8 sps:$4 sm:$0xff]   ;;  %v3961_v29 = vld [vmem:[%s5864_s12 + $0x8] sm:$0xff]  }
 0x805   :  { %2166 = vmatmul.mubr.f32.gmra.mxu0 %v2067_v33  ;;  %2697 = vmatprep.subr.bf16.mxu0 %v3976_v8  ;;  %v3963_v6 = vld [vmem:[%s5864_s12 + $0x18] sm:$0xff]   ;;  %v3964_v33 = vld [vmem:[%s5864_s12 + $0x20] sm:$0xff]   ;;  %v3997_v5 = vld [vmem:[#allocation13 + $0xe4] ss:$8 sps:$4 sm:$0xff]  }
 0x806   :  { %v2070_v35 = vmul.f32 %v5575_v55, %v5575_v55  ;;  %v3966_v8 = vld [vmem:[%s5864_s12 + $0x30] sm:$0xff]  }
 0x808   :  { %2170 = vmatprep.mubr.f32.mxu0 %v2070_v35  ;;  %2698 = vmatpush1.bf16.msra.mxu0 %v3974_v36  ;;  %v3991_v35 = vld [vmem:[#allocation13 + $0x4] ss:$8 sps:$4 sm:$0xff]   ;;  %v3995_v36 = vld [vmem:[#allocation13 + $0xe0] ss:$8 sps:$4 sm:$0xff]  }
 0x809   :  { %2171 = vmatmul.mubr.f32.gmra.mxu0 %v2069_v1  ;;  %2699 = vmatprep.subr.bf16.mxu0 %v3979_v23  ;;  %v3965_v1 = vld [vmem:[%s5864_s12 + $0x28] sm:$0xff]   ;;  %v4000_v23 = vld [vmem:[#allocation13 + $0xd4] ss:$8 sps:$4 sm:$0xff]  }
 0x80c   :  { %2700 = vmatpush1.bf16.msra.mxu0 %v3977_v0  ;;  %v3998_v0 = vld [vmem:[#allocation13 + $0xd0] ss:$8 sps:$4 sm:$0xff]  }
 0x80d   :  { %2701 = vmatprep.subr.bf16.mxu0 %v3982_v10  ;;  %v4003_v10 = vld [vmem:[#allocation13 + $0xc4] ss:$8 sps:$4 sm:$0xff]  }
 0x810   :  { %2702 = vmatpush1.bf16.msra.mxu0 %v3980_v11  ;;  %v3967_v11 = vld [vmem:[%s5864_s12 + $0x38] sm:$0xff]  }
 0x811   :  { %2703 = vmatprep.subr.bf16.mxu0 %v3985_v14  ;;  %v4001_v14 = vld [vmem:[#allocation13 + $0xc0] ss:$8 sps:$4 sm:$0xff]  }
 0x814   :  { %2704 = vmatpush1.bf16.msra.mxu0 %v3983_v16  ;;  %v4006_v16 = vld [vmem:[#allocation13 + $0xb4] ss:$8 sps:$4 sm:$0xff]  }
 0x815   :  { %2705 = vmatprep.subr.bf16.mxu0 %v3988_v17  ;;  %v4004_v17 = vld [vmem:[#allocation13 + $0xb0] ss:$8 sps:$4 sm:$0xff]  }
 0x818   :  { %2706 = vmatpush1.bf16.msra.mxu0 %v3986_v24  ;;  %v4009_v24 = vld [vmem:[#allocation13 + $0xa4] ss:$8 sps:$4 sm:$0xff]  }
 0x819   :  { %2707 = vmatprep.subr.bf16.mxu0 %v3991_v35 }
 0x81c   :  { %2708 = vmatpush1.bf16.msra.mxu0 %v3989_v20 }
 0x81d   :  { %2709 = vmatprep.subr.bf16.mxu0 %v3994_v38  ;;  %v2405_v38 = vld [vmem:[#allocation11] sm:$0x3] }
 0x820   :  { %2710 = vmatpush2.bf16.msra.mxu0 %v3992_v59 }
 0x821   :  { %2711 = vmatprep.subr.bf16.mxu0 %v3997_v5 }
 0x824   :  { %2712 = vmatpush2.bf16.msra.mxu0 %v3995_v36 }
 0x825   :  { %2713 = vmatprep.subr.bf16.mxu0 %v4000_v23 }
 0x828   :  { %2714 = vmatpush2.bf16.msra.mxu0 %v3998_v0 }
 0x829   :  { %2715 = vmatprep.subr.bf16.mxu0 %v4003_v10 }
 0x82c   :  { %2716 = vmatpush2.bf16.msra.mxu0 %v4001_v14  ;;  %v5643_v14 = vrot.slane %v2405_v38, %v5116_v18 }
 0x82d   :  { %2717 = vmatprep.subr.bf16.mxu0 %v4006_v16 }
 0x830   :  { %2718 = vmatpush2.bf16.msra.mxu0 %v4004_v17 }
 0x831   :  { %2719 = vmatprep.subr.bf16.mxu0 %v4009_v24 }
 0x8ad   :  { %v3774_v30 = vpop.f32.mrf.mxu0 }
 0x8af   :  { %v3775_v44 = vpop.f32.mrf.mxu0 }
 0x8b0   :  { %v3776_v31 = vadd.f32 %v3775_v44, %v3774_v30  ;;  %v4007_v30 = vld [vmem:[#allocation13 + $0xa0] ss:$8 sps:$4 sm:$0xff]   ;;  %v4012_v44 = vld [vmem:[#allocation13 + $0x94] ss:$8 sps:$4 sm:$0xff]  }
 0x8b1   :  { %v3777_v15 = vpop.f32.mrf.mxu0  ;;  %2720 = vmatpush2.bf16.msra.mxu0 %v4007_v30 }
 0x8b2   :  { %3485 = vmatmul.mubr.msk.f32.vlgmr.msra.gmra.mxu1 %vm627_vm0, %v3776_v31  ;;  %v4010_v31 = vld [vmem:[#allocation13 + $0x90] ss:$8 sps:$4 sm:$0xff]   ;;  %2721 = vmatprep.subr.bf16.mxu0 %v4012_v44 }
 0x8b3   :  { %2922 = vmatpush1.bf16.msra.mxu1 %v5399_v12  ;;  %v3778_v47 = vpop.f32.mrf.mxu0  ;;  %2270 = vmatprep.mubr.f32.mxu1 %v4445_v42 }
 0x8b4   :  { %v3779_v41 = vadd.f32 %v3778_v47, %v3777_v15  ;;  %2923 = vmatprep.subr.bf16.mxu1 %v5391_v2  ;;  %v4013_v15 = vld [vmem:[#allocation13 + $0x80] ss:$8 sps:$4 sm:$0xff]   ;;  %v4015_v47 = vld [vmem:[#allocation13 + $0x84] ss:$8 sps:$4 sm:$0xff]  }
 0x8b5   :  { %v3780_v50 = vpop.f32.mrf.mxu0  ;;  %2722 = vmatpush2.bf16.msra.mxu0 %v4010_v31  ;;  %v5648_v31 = vrot.slane %v2405_v38, %v5121_v28 }
 0x8b6   :  { %3486 = vmatmul.mubr.msk.f32.gmra.mxu1 %vm627_vm0, %v3779_v41  ;;  %2723 = vmatprep.subr.bf16.mxu0 %v4015_v47 }
 0x8b7   :  { %2924 = vmatpush1.bf16.msra.mxu1 %v5393_v45  ;;  %v3781_v61 = vpop.f32.mrf.mxu0  ;;  %2276 = vmatprep.mubr.f32.mxu1 %v4445_v42 }
 0x8b8   :  { %v3782_v52 = vadd.f32 %v3781_v61, %v3780_v50  ;;  %2925 = vmatprep.subr.bf16.mxu1 %v5385_v34 }
 0x8b9   :  { %v3783_v19 = vpop.f32.mrf.mxu0  ;;  %2724 = vmatpush2.bf16.msra.mxu0 %v4013_v15 }
 0x8ba   :  { %3487 = vmatmul.mubr.msk.f32.gmra.mxu1 %vm627_vm0, %v3782_v52 }
 0x8bb   :  { %2926 = vmatpush1.bf16.msra.mxu1 %v5387_v56  ;;  %v3784_v12 = vpop.f32.mrf.mxu0  ;;  %2282 = vmatprep.mubr.f32.mxu1 %v4445_v42 }
 0x8bc   :  { %v3785_v2 = vadd.f32 %v3784_v12, %v3783_v19  ;;  %2927 = vmatprep.subr.bf16.mxu1 %v5376_v53 }
 0x8bd   :  { %v3786_v63 = vpop.f32.mrf.mxu0 }
 0x8be   :  { %3488 = vmatmul.mubr.msk.f32.gmra.mxu1 %vm627_vm0, %v3785_v2 }
 0x8bf   :  { %2928 = vmatpush1.bf16.msra.mxu1 %v5378_v9  ;;  %v3787_v45 = vpop.f32.mrf.mxu0  ;;  %2288 = vmatprep.mubr.f32.mxu1 %v4445_v42 }
 0x8c0   :  { %v3788_v34 = vadd.f32 %v3787_v45, %v3786_v63 }
 0x8c1   :  { %v3789_v57 = vpop.f32.mrf.mxu0 }
 0x8c2   :  { %3489 = vmatmul.mubr.msk.f32.gmra.mxu1 %vm627_vm0, %v3788_v34 }
 0x8c3   :  { %v3790_v58 = vpop.f32.mrf.mxu0  ;;  %2294 = vmatprep.mubr.f32.mxu1 %v4445_v42 }
 0x8c4   :  { %v3791_v56 = vadd.f32 %v3790_v58, %v3789_v57 }
 0x8c5   :  { %v3792_v22 = vpop.f32.mrf.mxu0 }
 0x8c6   :  { %3490 = vmatmul.mubr.msk.f32.gmra.mxu1 %vm627_vm0, %v3791_v56 }
 0x8c7   :  { %v3793_v53 = vpop.f32.mrf.mxu0  ;;  %2300 = vmatprep.mubr.f32.mxu1 %v4445_v42 }
 0x8c8   :  { %v3794_v62 = vadd.f32 %v3793_v53, %v3792_v22 }
 0x8c9   :  { %v3795_v27 = vpop.f32.mrf.mxu0 }
 0x8ca   :  { %3491 = vmatmul.mubr.msk.f32.gmra.mxu1 %vm627_vm0, %v3794_v62 }
 0x8cb   :  { %v3796_v9 = vpop.f32.mrf.mxu0  ;;  %2306 = vmatprep.mubr.f32.mxu1 %v4445_v42  ;;  %v3962_v42 = vld [vmem:[%s5864_s12 + $0x10] sm:$0xff]  }
 0x8cc   :  { %v3797_v7 = vadd.f32 %v3796_v9, %v3795_v27 }
 0x8ce   :  { %3492 = vmatmul.mubr.msk.f32.gmra.mxu1 %vm627_vm0, %v3797_v7 }
 0x8cf   :  { %2945 = vmatprep.mubr.bf16.mxu1 %v4446_v39 }
 0x8d2   :  { %3533 = vmatmul.mubr.msk.bf16.vlgmr.msra.gmra.mxu1 %vm2888_vm2, %v3960_v48 }
 0x8d3   :  { %2955 = vmatprep.mubr.bf16.mxu1 %v4446_v39 }
 0x8da   :  { %3534 = vmatmul.mubr.msk.bf16.gmra.mxu1 %vm2888_vm2, %v3961_v29 }
 0x8db   :  { %2965 = vmatprep.mubr.bf16.mxu1 %v4446_v39 }
 0x8e2   :  { %3535 = vmatmul.mubr.msk.bf16.gmra.mxu1 %vm2888_vm2, %v3962_v42 }
 0x8e3   :  { %2975 = vmatprep.mubr.bf16.mxu1 %v4446_v39 }
 0x8ea   :  { %3536 = vmatmul.mubr.msk.bf16.gmra.mxu1 %vm2888_vm2, %v3963_v6 }
 0x8eb   :  { %2985 = vmatprep.mubr.bf16.mxu1 %v4446_v39 }
 0x8f2   :  { %3537 = vmatmul.mubr.msk.bf16.gmra.mxu1 %vm2888_vm2, %v3964_v33 }
 0x8f3   :  { %2995 = vmatprep.mubr.bf16.mxu1 %v4446_v39 }
 0x8fa   :  { %3538 = vmatmul.mubr.msk.bf16.gmra.mxu1 %vm2888_vm2, %v3965_v1 }
 0x8fb   :  { %3005 = vmatprep.mubr.bf16.mxu1 %v4446_v39 }
 0x902   :  { %3539 = vmatmul.mubr.msk.bf16.gmra.mxu1 %vm2888_vm2, %v3966_v8 }
 0x903   :  { %3015 = vmatprep.mubr.bf16.mxu1 %v4446_v39  ;;  %v2377_v39 = vld [vmem:[#allocation10] sm:$0x3] }
 0x904   :  { %v5636_v35 = vrot.slane %v2377_v39, %v5116_v18 }
 0x90a   :  { %3540 = vmatmul.mubr.msk.bf16.gmra.mxu1 %vm2888_vm2, %v3967_v11  ;;  %v5640_v11 = vrot.slane %v2377_v39, %v5121_v28 }
 0x972   :  { %v2266_v41 = vpop.f32.mrf.mxu1 }
 0x973   :  { %v2313_v50 = vmul.f32 0.03125, %v2266_v41 }
 0x974   :  { %v2268_v61 = vpop.f32.mrf.mxu1 }
 0x975   :  { %v2329_v52 = vadd.f32 1e-05, %v2313_v50  ;;  %v2314_v19 = vmul.f32 0.03125, %v2268_v61 }
 0x976   :  { %v2272_v12 = vpop.f32.mrf.mxu1 }
 0x977   :  { %4096 = vrsqrt.f32 %v2329_v52  ;;  %v2330_v2 = vadd.f32 1e-05, %v2314_v19  ;;  %v2315_v63 = vmul.f32 0.03125, %v2272_v12 }
 0x978   :  { %v2274_v45 = vpop.f32.mrf.mxu1 }
 0x979   :  { %4098 = vrsqrt.f32 %v2330_v2  ;;  %v2331_v34 = vadd.f32 1e-05, %v2315_v63  ;;  %v2316_v57 = vmul.f32 0.03125, %v2274_v45 }
 0x97a   :  { %v2278_v58 = vpop.f32.mrf.mxu1 }
 0x97b   :  { %4100 = vrsqrt.f32 %v2331_v34  ;;  %v2332_v56 = vadd.f32 1e-05, %v2316_v57  ;;  %v2317_v22 = vmul.f32 0.03125, %v2278_v58 }
 0x97c   :  { %v2280_v53 = vpop.f32.mrf.mxu1 }
 0x97d   :  { %4102 = vrsqrt.f32 %v2332_v56  ;;  %v2333_v62 = vadd.f32 1e-05, %v2317_v22  ;;  %v2318_v27 = vmul.f32 0.03125, %v2280_v53  ;;  %v4018_v53 = vld [vmem:[#allocation17 + $0x74] ss:$8 sps:$4 sm:$0xff]  }
 0x97e   :  { %v2284_v9 = vpop.f32.mrf.mxu1  ;;  %3294 = vmatprep.subr.bf16.mxu0 %v4018_v53 }
 0x97f   :  { %v2334_v7 = vadd.f32 1e-05, %v2318_v27  ;;  %v2319_v48 = vmul.f32 0.03125, %v2284_v9  ;;  %4104 = vrsqrt.f32 %v2333_v62 }
 0x980   :  { %v2286_v29 = vpop.f32.mrf.mxu1 }
 0x981   :  { %4106 = vrsqrt.f32 %v2334_v7  ;;  %v2335_v42 = vadd.f32 1e-05, %v2319_v48  ;;  %v2320_v6 = vmul.f32 0.03125, %v2286_v29 }
 0x982   :  { %v2290_v33 = vpop.f32.mrf.mxu1 }
 0x983   :  { %v2336_v1 = vadd.f32 1e-05, %v2320_v6  ;;  %v2321_v20 = vmul.f32 0.03125, %v2290_v33  ;;  %4108 = vrsqrt.f32 %v2335_v42 }
 0x984   :  { %v4097_v59 = vpop.eup %4096  ;;  %v2292_v5 = vpop.f32.mrf.mxu1 }
 0x985   :  { %v2361_v8 = vmul.f32 %v4097_v59, %v5502_v37  ;;  %4110 = vrsqrt.f32 %v2336_v1  ;;  %v2337_v36 = vadd.f32 1e-05, %v2321_v20  ;;  %v2322_v23 = vmul.f32 0.03125, %v2292_v5 }
 0x986   :  { %v4099_v0 = vpop.eup %4098  ;;  %v2296_v10 = vpop.f32.mrf.mxu1 }
 0x987   :  { %v2389_v16 = vmul.f32 %v5636_v35, %v2361_v8  ;;  %4112 = vrsqrt.f32 %v2337_v36  ;;  %v2338_v17 = vadd.f32 1e-05, %v2322_v23  ;;  %v2323_v24 = vmul.f32 0.03125, %v2296_v10 }
 0x988   :  { %v4101_v30 = vpop.eup %4100  ;;  %v2298_v44 = vpop.f32.mrf.mxu1  ;;  %v2362_v37 = vmul.f32 %v4099_v0, %v5505_v4 }
 0x989   :  { %v2363_v15 = vmul.f32 %v4101_v30, %v5512_v60  ;;  %4114 = vrsqrt.f32 %v2338_v17  ;;  %v2339_v47 = vadd.f32 1e-05, %v2323_v24  ;;  %v2324_v41 = vmul.f32 0.03125, %v2298_v44 }
 0x98a   :  { %v4103_v50 = vpop.eup %4102  ;;  %v2302_v61 = vpop.f32.mrf.mxu1  ;;  %v2390_v52 = vmul.f32 %v5640_v11, %v2362_v37  ;;  %v2417_v19 = vadd.f32 %v5643_v14, %v2389_v16 }
 0x98b   :  { %v2391_v12 = vmul.f32 %v5636_v35, %v2363_v15  ;;  %4116 = vrsqrt.f32 %v2339_v47  ;;  %v2340_v2 = vadd.f32 1e-05, %v2324_v41  ;;  %v2325_v63 = vmul.f32 0.03125, %v2302_v61 }
 0x98c   :  { %v2304_v4 = vpop.f32.mrf.mxu1  ;;  %v2364_v45 = vmul.f32 %v4103_v50, %v5515_v13  ;;  %v2418_v34 = vadd.f32 %v5648_v31, %v2390_v52  ;;  %vm2433_vm0 = vcmp.ge.f32.partialorder %v2417_v19, 0.0  ;;  %v2449_v60 = vmul.f32 0.01, %v2417_v19  ;;  %v4105_v57 = vpop.eup %4104  ;;  %v4016_v50 = vld [vmem:[#allocation17 + $0x70] ss:$8 sps:$4 sm:$0xff]  }
 0x98d   :  { %4118 = vrsqrt.f32 %v2340_v2  ;;  %v2341_v58 = vadd.f32 1e-05, %v2325_v63  ;;  %v2326_v56 = vmul.f32 0.03125, %v2304_v4  ;;  %v2419_v22 = vadd.f32 %v5643_v14, %v2391_v12  ;;  %v4021_v2 = vld [vmem:[#allocation17 + $0x64] ss:$8 sps:$4 sm:$0xff]  }
 0x98e   :  { %v4107_v62 = vpop.eup %4106  ;;  %v2308_v27 = vpop.f32.mrf.mxu1  ;;  %v2392_v9 = vmul.f32 %v5640_v11, %v2364_v45  ;;  %vm2434_vm3 = vcmp.ge.f32.partialorder %v2418_v34, 0.0  ;;  %v2450_v7 = vmul.f32 0.01, %v2418_v34  ;;  %v2465_v39 = vsel %vm2433_vm0, %v2417_v19, %v2449_v60 }
 0x98f   :  { %4120 = vrsqrt.f32 %v2341_v58  ;;  %v2342_v48 = vadd.f32 1e-05, %v2326_v56  ;;  %v2327_v13 = vmul.f32 0.03125, %v2308_v27  ;;  %vm2435_vm4 = vcmp.ge.f32.partialorder %v2419_v22, 0.0 }
 0x990   :  { %v2310_v29 = vpop.f32.mrf.mxu1  ;;  %v2420_v42 = vadd.f32 %v5648_v31, %v2392_v9  ;;  %v2451_v6 = vmul.f32 0.01, %v2419_v22  ;;  %v2366_v33 = vmul.f32 %v4107_v62, %v5525_v40  ;;  %v4109_v1 = vpop.eup %4108  ;;  %v2365_v59 = vmul.f32 %v4105_v57, %v5520_v49  ;;  %v4019_v62 = vld [vmem:[#allocation17 + $0x60] ss:$8 sps:$4 sm:$0xff]  }
 0x991   :  { %4122 = vrsqrt.f32 %v2342_v48  ;;  %v2343_v20 = vadd.f32 1e-05, %v2327_v13  ;;  %v2328_v38 = vmul.f32 0.03125, %v2310_v29  ;;  %v2466_v23 = vsel %vm2434_vm3, %v2418_v34, %v2450_v7  ;;  %v4024_v48 = vld [vmem:[#allocation17 + $0x54] ss:$8 sps:$4 sm:$0xff]  }
 0x992   :  { %v4111_v5 = vpop.eup %4110  ;;  %v5662_v8 = vpop.f32.mrf.mxu1  ;;  %vm2436_vm5 = vcmp.ge.f32.partialorder %v2420_v42, 0.0  ;;  %v2452_v36 = vmul.f32 0.01, %v2420_v42  ;;  %v2394_v0 = vmul.f32 %v5640_v11, %v2366_v33  ;;  %v2467_v16 = vsel %vm2435_vm4, %v2419_v22, %v2451_v6 }
 0x993   :  { %4124 = vrsqrt.f32 %v2343_v20  ;;  %v2344_v10 = vadd.f32 1e-05, %v2328_v38  ;;  %v2368_v40 = vmul.f32 %v4111_v5, %v5535_v26  ;;  %v2367_v44 = vmul.f32 %v4109_v1, %v5530_v21 }
 0x994   :  { %v4113_v17 = vpop.eup %4112  ;;  %v5668_v24 = vpop.f32.mrf.mxu1  ;;  %v2468_v30 = vsel %vm2436_vm5, %v2420_v42, %v2452_v36  ;;  %v2422_v49 = vadd.f32 %v5648_v31, %v2394_v0  ;;  %v2393_v37 = vmul.f32 %v5636_v35, %v2365_v59  ;;  %v2481_v26 = vpack.c.bf16 %v2467_v16, %v2465_v39  ;;  %v4022_v36 = vld [vmem:[#allocation17 + $0x50] ss:$8 sps:$4 sm:$0xff]  }
 0x995   :  { %4126 = vrsqrt.f32 %v2344_v10  ;;  %v2482_v15 = vpack.c.bf16 %v2468_v30, %v2466_v23  ;;  %v2396_v47 = vmul.f32 %v5640_v11, %v2368_v40  ;;  %v2369_v41 = vmul.f32 %v4113_v17, %v5540_v46  ;;  %v4027_v17 = vld [vmem:[#allocation17 + $0x44] ss:$8 sps:$4 sm:$0xff]  }
 0x996   :  { %v4115_v61 = vpop.eup %4114  ;;  %v5675_v52 = vpop.f32.mrf.mxu1  ;;  %v2395_v19 = vmul.f32 %v5636_v35, %v2367_v44  ;;  %v2421_v12 = vadd.f32 %v5643_v14, %v2393_v37  ;;  %v2454_v4 = vmul.f32 0.01, %v2422_v49  ;;  %vm2438_vm6 = vcmp.ge.f32.partialorder %v2422_v49, 0.0 }
 0x997   :  { %2725 = vmatprep.mubr.bf16.mxu0 %v2482_v15  ;;  %v3026_v21 = vpack.c.bf16 %v5675_v52, %v5662_v8  ;;  %v2424_v63 = vadd.f32 %v5648_v31, %v2396_v47  ;;  %v2370_v45 = vmul.f32 %v4115_v61, %v5545_v32  ;;  %v2397_v58 = vmul.f32 %v5636_v35, %v2369_v41 }
 0x998   :  { %v4117_v46 = vpop.eup %4116  ;;  %2726 = vmatmul.mubr.bf16.vlgmr.msra.gmra.mxu0 %v2481_v26  ;;  %v5683_v34 = vpop.f32.mrf.mxu1  ;;  %v2423_v60 = vadd.f32 %v5643_v14, %v2395_v19  ;;  %v2453_v57 = vmul.f32 0.01, %v2421_v12  ;;  %vm2437_vm8 = vcmp.ge.f32.partialorder %v2421_v12, 0.0  ;;  %v2470_v13 = vsel %vm2438_vm6, %v2422_v49, %v2454_v4  ;;  %v4025_v19 = vld [vmem:[#allocation17 + $0x40] ss:$8 sps:$4 sm:$0xff]  }
 0x999   :  { %v3027_v56 = vpack.c.bf16 %v5683_v34, %v5668_v24  ;;  %vm2440_vm7 = vcmp.ge.f32.partialorder %v2424_v63, 0.0  ;;  %v2456_v22 = vmul.f32 0.01, %v2424_v63  ;;  %v2398_v53 = vmul.f32 %v5640_v11, %v2370_v45  ;;  %3295 = vmatpush1.bf16.msra.mxu0 %v4016_v50  ;;  %v4030_v4 = vld [vmem:[#allocation17 + $0x34] ss:$8 sps:$4 sm:$0xff]   ;;  %v4162_v24 = vld [vmem:[%s5883_s28] sm:$0xff] }
 0x99a   :  { %v4119_v32 = vpop.eup %4118  ;;  %v5690_v27 = vpop.f32.mrf.mxu1  ;;  %vm2439_vm9 = vcmp.ge.f32.partialorder %v2423_v60, 0.0  ;;  %v2455_v9 = vmul.f32 0.01, %v2423_v60  ;;  %v2371_v7 = vmul.f32 %v4117_v46, %v5550_v51  ;;  %3296 = vmatprep.subr.bf16.mxu0 %v4021_v2  ;;  %v2425_v59 = vadd.f32 %v5643_v14, %v2397_v58 }
 0x99b   :  { %v2472_v39 = vsel %vm2440_vm7, %v2424_v63, %v2456_v22  ;;  %v2372_v29 = vmul.f32 %v4119_v32, %v5555_v25  ;;  %v2426_v42 = vadd.f32 %v5648_v31, %v2398_v53  ;;  %v2469_v51 = vsel %vm2437_vm8, %v2421_v12, %v2453_v57 }
 0x99c   :  { %v4121_v6 = vpop.eup %4120  ;;  %v5696_v33 = vpop.f32.mrf.mxu1  ;;  %v2484_v1 = vpack.c.bf16 %v2472_v39, %v2470_v13  ;;  %v2471_v20 = vsel %vm2439_vm9, %v2423_v60, %v2455_v9  ;;  %v2399_v38 = vmul.f32 %v5636_v35, %v2371_v7  ;;  %v2457_v47 = vmul.f32 0.01, %v2425_v59  ;;  %v4033_v13 = vld [vmem:[#allocation17 + $0x24] ss:$8 sps:$4 sm:$0xff]  }
 0x99d   :  { %v2400_v5 = vmul.f32 %v5640_v11, %v2372_v29  ;;  %3297 = vmatpush1.bf16.msra.mxu0 %v4019_v62  ;;  %v2483_v0 = vpack.c.bf16 %v2471_v20, %v2469_v51  ;;  %v2458_v10 = vmul.f32 0.01, %v2426_v42  ;;  %v2373_v40 = vmul.f32 %v4121_v6, %v5560_v3  ;;  %v4031_v6 = vld [vmem:[#allocation17 + $0x20] ss:$8 sps:$4 sm:$0xff]  }
 0x99e   :  { %v4123_v23 = vpop.eup %4122  ;;  %2735 = vmatprep.mubr.bf16.mxu0 %v2484_v1  ;;  %v5702_v25 = vpop.f32.mrf.mxu1  ;;  %v2427_v16 = vadd.f32 %v5643_v14, %v2399_v38  ;;  %3298 = vmatprep.subr.bf16.mxu0 %v4024_v48  ;;  %vm2442_vm10 = vcmp.ge.f32.partialorder %v2426_v42, 0.0  ;;  %vm2441_vm13 = vcmp.ge.f32.partialorder %v2425_v59, 0.0  ;;  %vm2826_vm0 = vcmask 0  }
 0x99f   :  { %v3028_v30 = vpack.c.bf16 %v5702_v25, %v5690_v27  ;;  %v2428_v49 = vadd.f32 %v5648_v31, %v2400_v5  ;;  %v2374_v44 = vmul.f32 %v4123_v23, %v5565_v43  ;;  %v2401_v50 = vmul.f32 %v5636_v35, %v2373_v40 }
 0x9a0   :  { %v4125_v37 = vpop.eup %4124  ;;  %2736 = vmatmul.mubr.bf16.gmra.mxu0 %v2483_v0  ;;  %v5710_v15 = vpop.f32.mrf.mxu1  ;;  %vm2443_vm11 = vcmp.ge.f32.partialorder %v2427_v16, 0.0  ;;  %v2459_v41 = vmul.f32 0.01, %v2427_v16  ;;  %v2474_v2 = vsel %vm2442_vm10, %v2426_v42, %v2458_v10  ;;  %v2473_v62 = vsel %vm2441_vm13, %v2425_v59, %v2457_v47  ;;  %v4034_v10 = vld [vmem:[#allocation17 + $0x10] ss:$8 sps:$4 sm:$0xff]  }
 0x9a1   :  { %v3029_v3 = vpack.c.bf16 %v5710_v15, %v5696_v33  ;;  %vm2444_vm12 = vcmp.ge.f32.partialorder %v2428_v49, 0.0  ;;  %v2460_v61 = vmul.f32 0.01, %v2428_v49  ;;  %v2402_v26 = vmul.f32 %v5640_v11, %v2374_v44  ;;  %3299 = vmatpush1.bf16.msra.mxu0 %v4022_v36  ;;  %v2521_v33 = vld [vmem:[#allocation14] sm:$0x3] }
 0x9a2   :  { %v4127_v12 = vpop.eup %4126  ;;  %v5716_v43 = vpop.f32.mrf.mxu1  ;;  %v2375_v63 = vmul.f32 %v4125_v37, %v5570_v54  ;;  %3300 = vmatprep.subr.bf16.mxu0 %v4027_v17  ;;  %v2475_v46 = vsel %vm2443_vm11, %v2427_v16, %v2459_v41  ;;  %v2429_v9 = vadd.f32 %v5643_v14, %v2401_v50  ;;  %v4028_v54 = vld [vmem:[#allocation17 + $0x30] ss:$8 sps:$4 sm:$0xff]   ;;  %v5763_v15 = vrot.slane %v2521_v33, %v5116_v18 }
 0x9a3   :  { %v2476_v45 = vsel %vm2444_vm12, %v2428_v49, %v2460_v61  ;;  %v2376_v60 = vmul.f32 %v4127_v12, %v5575_v55  ;;  %v2430_v57 = vadd.f32 %v5648_v31, %v2402_v26  ;;  %v2485_v48 = vpack.c.bf16 %v2475_v46, %v2473_v62 }
 0x9a4   :  { %v5723_v58 = vpop.f32.mrf.mxu1  ;;  %v2486_v22 = vpack.c.bf16 %v2476_v45, %v2474_v2  ;;  %v2403_v53 = vmul.f32 %v5636_v35, %v2375_v63  ;;  %v2461_v20 = vmul.f32 0.01, %v2429_v9  ;;  %vm2445_vm2 = vcmp.ge.f32.partialorder %v2429_v9, 0.0 }
 0x9a5   :  { %v2404_v32 = vmul.f32 %v5640_v11, %v2376_v60  ;;  %3301 = vmatpush1.bf16.msra.mxu0 %v4025_v19  ;;  %v2462_v29 = vmul.f32 0.01, %v2430_v57  ;;  %vm2446_vm14 = vcmp.ge.f32.partialorder %v2430_v57, 0.0 }
 0x9a6   :  { %2745 = vmatprep.mubr.bf16.mxu0 %v2486_v22  ;;  %v5728_v7 = vpop.f32.mrf.mxu1  ;;  %v2431_v55 = vadd.f32 %v5643_v14, %v2403_v53  ;;  %3302 = vmatprep.subr.bf16.mxu0 %v4030_v4  ;;  %v2477_v0 = vsel %vm2445_vm2, %v2429_v9, %v2461_v20 }
 0x9a7   :  { %v3030_v39 = vpack.c.bf16 %v5728_v7, %v5716_v43  ;;  %v2432_v35 = vadd.f32 %v5648_v31, %v2404_v32  ;;  %v4036_v31 = vld [vmem:[#allocation17 + $0x14] ss:$8 sps:$4 sm:$0xff]   ;;  %v2478_v59 = vsel %vm2446_vm14, %v2430_v57, %v2462_v29  ;;  %v4040_v29 = vld [vmem:[#allocation17 + $0xf0] ss:$8 sps:$4 sm:$0xff]  }
 0x9a8   :  { %2746 = vmatmul.mubr.bf16.gmra.mxu0 %v2485_v48  ;;  %v5734_v11 = vpop.f32.mrf.mxu1  ;;  %vm2447_vm15 = vcmp.ge.f32.partialorder %v2431_v55, 0.0  ;;  %v2463_v42 = vmul.f32 0.01, %v2431_v55  ;;  %v4037_v48 = vld [vmem:[#allocation17] ss:$8 sps:$4 sm:$0xff]  }
 0x9a9   :  { %v3031_v1 = vpack.c.bf16 %v5734_v11, %v5723_v58  ;;  %vm2448_vm1 = vcmp.ge.f32.partialorder %v2432_v35, 0.0  ;;  %v2464_v14 = vmul.f32 0.01, %v2432_v35  ;;  %3303 = vmatpush1.bf16.msra.mxu0 %v4028_v54  ;;  %v4039_v54 = vld [vmem:[#allocation17 + $0x4] ss:$8 sps:$4 sm:$0xff]   ;;  %v2828_v58 = vld [vmem:[#allocation16] sm:$0xff] }
 0x9aa   :  { %v5738_v38 = vpop.f32.mrf.mxu1  ;;  %3304 = vmatprep.subr.bf16.mxu0 %v4033_v13  ;;  %v2479_v5 = vsel %vm2447_vm15, %v2431_v55, %v2463_v42  ;;  %v4045_v42 = vld [vmem:[#allocation17 + $0xe4] ss:$8 sps:$4 sm:$0xff]   ;;  %v2830_v11 = vpack.c.bf16 %v2828_v58, %v2828_v58 }
 0x9ab   :  { %v2480_v51 = vsel %vm2448_vm1, %v2432_v35, %v2464_v14  ;;  %v2487_v40 = vpack.c.bf16 %v2479_v5, %v2477_v0  ;;  %v4042_v35 = vld [vmem:[#allocation17 + $0xf4] ss:$8 sps:$4 sm:$0xff]   ;;  %v4055_v0 = vld [vmem:[#allocation17 + $0xa0] ss:$8 sps:$4 sm:$0xff]  }
 0x9ac   :  { %v2979_v36 = vpop.f32.mrf.mxu1  ;;  %v2488_v23 = vpack.c.bf16 %v2480_v51, %v2478_v59  ;;  %v4051_v59 = vld [vmem:[#allocation17 + $0xc4] ss:$8 sps:$4 sm:$0xff]   ;;  %v4049_v51 = vld [vmem:[#allocation17 + $0xc0] ss:$8 sps:$4 sm:$0xff]   ;;  %v4054_v5 = vld [vmem:[#allocation17 + $0xb4] ss:$8 sps:$4 sm:$0xff]  }
 0x9ad   :  { %3305 = vmatpush1.bf16.msra.mxu0 %v4031_v6  ;;  %v4043_v6 = vld [vmem:[#allocation17 + $0xe0] ss:$8 sps:$4 sm:$0xff]  }
 0x9ae   :  { %2755 = vmatprep.mubr.bf16.mxu0 %v2488_v23  ;;  %v5740_v16 = vpop.f32.mrf.mxu1  ;;  %3306 = vmatprep.subr.bf16.mxu0 %v4036_v31  ;;  %v4046_v31 = vld [vmem:[#allocation17 + $0xd0] ss:$8 sps:$4 sm:$0xff]  }
 0x9af   :  { %v3032_v17 = vpack.c.bf16 %v5740_v16, %v5738_v38  ;;  %v4048_v38 = vld [vmem:[#allocation17 + $0xd4] ss:$8 sps:$4 sm:$0xff]   ;;  %v4052_v23 = vld [vmem:[#allocation17 + $0xb0] ss:$8 sps:$4 sm:$0xff]  }
 0x9b0   :  { %2756 = vmatmul.mubr.bf16.gmra.mxu0 %v2487_v40  ;;  %v2983_v49 = vpop.f32.mrf.mxu1  ;;  %v4060_v16 = vld [vmem:[#allocation17 + $0x94] ss:$8 sps:$4 sm:$0xff]   ;;  %v4063_v40 = vld [vmem:[#allocation17 + $0x84] ss:$8 sps:$4 sm:$0xff]  }
 0x9b1   :  { %3307 = vmatpush1.bf16.msra.mxu0 %v4034_v10  ;;  %v3033_v20 = vpack.c.bf16 %v2983_v49, %v2979_v36  ;;  %v4057_v36 = vld [vmem:[#allocation17 + $0xa4] ss:$8 sps:$4 sm:$0xff]   ;;  %v4058_v10 = vld [vmem:[#allocation17 + $0x90] ss:$8 sps:$4 sm:$0xff]  }
 0x9b2   :  { %v2987_v44 = vpop.f32.mrf.mxu1  ;;  %3308 = vmatprep.subr.bf16.mxu0 %v4039_v54  ;;  %v2829_v49 = vld [vmem:[#allocation16 + $0x8] sm:$0xff] }
 0x9b4   :  { %v2989_v37 = vpop.f32.mrf.mxu1 }
 0x9b5   :  { %3309 = vmatpush1.bf16.msra.mxu0 %v4037_v48 }
 0x9b6   :  { %v2991_v47 = vpop.f32.mrf.mxu1  ;;  %3310 = vmatprep.subr.bf16.mxu0 %v4042_v35  ;;  %v4168_v35 = vld [vmem:[%s5883_s28 + $0x30] sm:$0xff] }
 0x9b7   :  { %v3034_v14 = vpack.c.bf16 %v2991_v47, %v2987_v44  ;;  %v2831_v44 = vpack.c.bf16 %v2829_v49, %v2829_v49 }
 0x9b8   :  { %v2993_v41 = vpop.f32.mrf.mxu1 }
 0x9b9   :  { %v3035_v13 = vpack.c.bf16 %v2993_v41, %v2989_v37  ;;  %3311 = vmatpush2.bf16.msra.mxu0 %v4040_v29  ;;  %3081 = vmatprep.mubr.bf16.mxu1 %v2831_v44  ;;  %v4164_v37 = vld [vmem:[%s5883_s28 + $0x10] sm:$0xff] }
 0x9ba   :  { %v2997_v50 = vpop.f32.mrf.mxu1  ;;  %3312 = vmatprep.subr.bf16.mxu0 %v4045_v42  ;;  %3326 = vmatprep.mubr.bf16.mxu0 %v2831_v44  ;;  %v4171_v44 = vld [vmem:[%s5883_s28 + $0x48] sm:$0xff] }
 0x9bc   :  { %v2999_v61 = vpop.f32.mrf.mxu1 }
 0x9bd   :  { %3313 = vmatpush2.bf16.msra.mxu0 %v4043_v6 }
 0x9be   :  { %v3001_v26 = vpop.f32.mrf.mxu1  ;;  %3314 = vmatprep.subr.bf16.mxu0 %v4048_v38  ;;  %v4169_v38 = vld [vmem:[%s5883_s28 + $0x38] sm:$0xff] }
 0x9bf   :  { %v3036_v55 = vpack.c.bf16 %v3001_v26, %v2997_v50 }
 0x9c0   :  { %v3003_v19 = vpop.f32.mrf.mxu1 }
 0x9c1   :  { %v3037_v9 = vpack.c.bf16 %v3003_v19, %v2999_v61  ;;  %3315 = vmatpush2.bf16.msra.mxu0 %v4046_v31  ;;  %v4165_v19 = vld [vmem:[%s5883_s28 + $0x18] sm:$0xff] }
 0x9c2   :  { %v3007_v12 = vpop.f32.mrf.mxu1  ;;  %3316 = vmatprep.subr.bf16.mxu0 %v4051_v59 }
 0x9c4   :  { %v3009_v2 = vpop.f32.mrf.mxu1 }
 0x9c5   :  { %3317 = vmatpush2.bf16.msra.mxu0 %v4049_v51 }
 0x9c6   :  { %v3011_v63 = vpop.f32.mrf.mxu1  ;;  %3318 = vmatprep.subr.bf16.mxu0 %v4054_v5 }
 0x9c7   :  { %v3038_v32 = vpack.c.bf16 %v3011_v63, %v3007_v12 }
 0x9c8   :  { %v3013_v4 = vpop.f32.mrf.mxu1 }
 0x9c9   :  { %v3039_v53 = vpack.c.bf16 %v3013_v4, %v3009_v2  ;;  %3319 = vmatpush2.bf16.msra.mxu0 %v4052_v23 }
 0x9ca   :  { %v3017_v45 = vpop.f32.mrf.mxu1  ;;  %3320 = vmatprep.subr.bf16.mxu0 %v4057_v36  ;;  %v4170_v36 = vld [vmem:[%s5883_s28 + $0x40] sm:$0xff] }
 0x9cc   :  { %v3019_v46 = vpop.f32.mrf.mxu1 }
 0x9cd   :  { %3321 = vmatpush2.bf16.msra.mxu0 %v4055_v0 }
 0x9ce   :  { %v3021_v60 = vpop.f32.mrf.mxu1  ;;  %3322 = vmatprep.subr.bf16.mxu0 %v4060_v16 }
 0x9cf   :  { %v3040_v57 = vpack.c.bf16 %v3021_v60, %v3017_v45 }
 0x9d0   :  { %v3023_v22 = vpop.f32.mrf.mxu1 }
 0x9d1   :  { %v3041_v62 = vpack.c.bf16 %v3023_v22, %v3019_v46  ;;  %3323 = vmatpush2.bf16.msra.mxu0 %v4058_v10  ;;  %v4166_v46 = vld [vmem:[%s5883_s28 + $0x20] sm:$0xff] }
 0x9d2   :  { %3324 = vmatprep.subr.bf16.mxu0 %v4063_v40 }
 0x9d3   :  { %3049 = vmatprep.subr.bf16.mxu1 %v3041_v62 }
 0x9d4   :  { %3050 = vmatpush1.bf16.xpose.msra.mxu1 %v3040_v57 }
 0x9d5   :  { %3051 = vmatprep.subr.bf16.mxu1 %v3039_v53 }
 0x9dc   :  { %3052 = vmatpush1.bf16.xpose.msra.mxu1 %v3038_v32  ;;  %v4167_v32 = vld [vmem:[%s5883_s28 + $0x28] sm:$0xff] }
 0x9dd   :  { %3053 = vmatprep.subr.bf16.mxu1 %v3037_v9 }
 0x9e4   :  { %3054 = vmatpush1.bf16.xpose.msra.mxu1 %v3036_v55 }
 0x9e5   :  { %3055 = vmatprep.subr.bf16.mxu1 %v3035_v13 }
 0x9ec   :  { %3056 = vmatpush1.bf16.xpose.msra.mxu1 %v3034_v14 }
 0x9ed   :  { %3057 = vmatprep.subr.bf16.mxu1 %v3033_v20 }
 0x9f4   :  { %3058 = vmatpush1.bf16.xpose.msra.mxu1 %v3032_v17  ;;  %v4061_v17 = vld [vmem:[#allocation17 + $0x80] ss:$8 sps:$4 sm:$0xff]  }
 0x9f5   :  { %3059 = vmatprep.subr.bf16.mxu1 %v3031_v1  ;;  %3325 = vmatpush2.bf16.msra.mxu0 %v4061_v17 }
 0x9f8   :  { %3327 = vmatmul.mubr.bf16.vlgmr.msra.gmra.mxu0 %v2830_v11 }
 0x9fc   :  { %3060 = vmatpush1.bf16.xpose.msra.mxu1 %v3030_v39 }
 0x9fd   :  { %3061 = vmatprep.subr.bf16.mxu1 %v3029_v3  ;;  %v5766_v3 = vrot.slane %v2521_v33, %v5121_v28 }
 0xa04   :  { %3062 = vmatpush1.bf16.xpose.msra.mxu1 %v3028_v30 }
 0xa05   :  { %3063 = vmatprep.subr.bf16.mxu1 %v3027_v56 }
 0xa0c   :  { %3064 = vmatpush1.bf16.xpose.msra.mxu1 %v3026_v21  ;;  %v4163_v21 = vld [vmem:[%s5883_s28 + $0x8] sm:$0xff] }
 0xa13   :  { %3082 = vmatmul.mubr.bf16.vlgmr.msra.gmra.mxu1 %v2830_v11 }
 0xa58   :  { %v2727_v43 = vpop.f32.mrf.mxu0 }
 0xa59   :  { %v2728_v27 = vadd.f32 %v2727_v43, %v5763_v15 }
 0xa5a   :  { %v2729_v25 = vpop.f32.mrf.mxu0 }
 0xa5b   :  { %v2766_v34 = vsub.f32 %v2728_v27, %v4162_v24  ;;  %v2730_v8 = vadd.f32 %v2729_v25, %v5766_v3  ;;  %v4172_v27 = vld [vmem:[%s5883_s28 + $0x50] sm:$0xff] }
 0xa5c   :  { %v2731_v52 = vpop.f32.mrf.mxu0 }
 0xa5d   :  { %v2767_v56 = vsub.f32 %v2730_v8, %v4163_v21  ;;  %v2732_v30 = vadd.f32 %v2731_v52, %v5763_v15  ;;  %v2782_v39 = vmul.f32 %v2766_v34, %v2766_v34  ;;  %v4173_v21 = vld [vmem:[%s5883_s28 + $0x58] sm:$0xff] }
 0xa5e   :  { %v2733_v7 = vpop.f32.mrf.mxu0 }
 0xa5f   :  { %v2783_v1 = vmul.f32 %v2767_v56, %v2767_v56  ;;  %v2768_v47 = vsub.f32 %v2732_v30, %v4164_v37  ;;  %v2734_v41 = vadd.f32 %v2733_v7, %v5766_v3  ;;  %v4174_v37 = vld [vmem:[%s5883_s28 + $0x60] sm:$0xff] }
 0xa60   :  { %v2737_v50 = vpop.f32.mrf.mxu0 }
 0xa61   :  { %v2798_v61 = vadd.f32 %v2783_v1, %v2782_v39  ;;  %v2784_v26 = vmul.f32 %v2768_v47, %v2768_v47  ;;  %v2769_v12 = vsub.f32 %v2734_v41, %v4165_v19  ;;  %v2738_v2 = vadd.f32 %v2737_v50, %v5763_v15  ;;  %v4175_v19 = vld [vmem:[%s5883_s28 + $0x68] sm:$0xff] }
 0xa62   :  { %v2739_v63 = vpop.f32.mrf.mxu0 }
 0xa63   :  { %v2799_v4 = vadd.f32 %v2798_v61, %v2784_v26  ;;  %v2785_v45 = vmul.f32 %v2769_v12, %v2769_v12  ;;  %v2770_v60 = vsub.f32 %v2738_v2, %v4166_v46  ;;  %v2740_v57 = vadd.f32 %v2739_v63, %v5766_v3  ;;  %v4176_v46 = vld [vmem:[%s5883_s28 + $0x70] sm:$0xff] }
 0xa64   :  { %v2741_v22 = vpop.f32.mrf.mxu0 }
 0xa65   :  { %v2800_v53 = vadd.f32 %v2799_v4, %v2785_v45  ;;  %v2786_v62 = vmul.f32 %v2770_v60, %v2770_v60  ;;  %v2771_v9 = vsub.f32 %v2740_v57, %v4167_v32  ;;  %v2742_v54 = vadd.f32 %v2741_v22, %v5763_v15 }
 0xa66   :  { %v2743_v48 = vpop.f32.mrf.mxu0 }
 0xa67   :  { %v2801_v55 = vadd.f32 %v2800_v53, %v2786_v62  ;;  %v2787_v13 = vmul.f32 %v2771_v9, %v2771_v9  ;;  %v2772_v29 = vsub.f32 %v2742_v54, %v4168_v35  ;;  %v2744_v42 = vadd.f32 %v2743_v48, %v5766_v3  ;;  %v4177_v53 = vld [vmem:[%s5883_s28 + $0x78] sm:$0xff]  ;;  %v3122_v48 = vld [vmem:[%s5866_s14] sm:$0x3] }
 0xa68   :  { %v2747_v6 = vpop.f32.mrf.mxu0 }
 0xa69   :  { %v2802_v14 = vadd.f32 %v2801_v55, %v2787_v13  ;;  %v2788_v20 = vmul.f32 %v2772_v29, %v2772_v29  ;;  %v2773_v31 = vsub.f32 %v2744_v42, %v4169_v38  ;;  %v2748_v59 = vadd.f32 %v2747_v6, %v5763_v15 }
 0xa6a   :  { %v2749_v51 = vpop.f32.mrf.mxu0  ;;  %v3127_v55 = vrot.slane %v3122_v48, %v5116_v18  ;;  %v3131_v13 = vrot.slane %v3122_v48, %v5121_v28  ;;  %v3541_v18 = vld [vmem:[%s5867_s15] ss:$0 sm:$0xff] }
 0xa6b   :  { %v2803_v5 = vadd.f32 %v2802_v14, %v2788_v20  ;;  %v2789_v23 = vmul.f32 %v2773_v31, %v2773_v31  ;;  %v2774_v0 = vsub.f32 %v2748_v59, %v4170_v36  ;;  %v2750_v10 = vadd.f32 %v2749_v51, %v5766_v3 }
 0xa6c   :  { %v2751_v16 = vpop.f32.mrf.mxu0 }
 0xa6d   :  { %v2804_v40 = vadd.f32 %v2803_v5, %v2789_v23  ;;  %v2790_v49 = vmul.f32 %v2774_v0, %v2774_v0  ;;  %v2775_v17 = vsub.f32 %v2750_v10, %v4171_v44  ;;  %v2752_v58 = vadd.f32 %v2751_v16, %v5763_v15 }
 0xa6e   :  { %v2753_v11 = vpop.f32.mrf.mxu0 }
 0xa6f   :  { %v2805_v33 = vadd.f32 %v2804_v40, %v2790_v49  ;;  %v2791_v43 = vmul.f32 %v2775_v17, %v2775_v17  ;;  %v2776_v25 = vsub.f32 %v2752_v58, %v4172_v27  ;;  %v2754_v24 = vadd.f32 %v2753_v11, %v5766_v3 }
 0xa70   :  { %v2757_v34 = vpop.f32.mrf.mxu0 }
 0xa71   :  { %v2806_v8 = vadd.f32 %v2805_v33, %v2791_v43  ;;  %v2792_v52 = vmul.f32 %v2776_v25, %v2776_v25  ;;  %v2777_v56 = vsub.f32 %v2754_v24, %v4173_v21  ;;  %v2758_v30 = vadd.f32 %v2757_v34, %v5763_v15 }
 0xa72   :  { %v2759_v7 = vpop.f32.mrf.mxu0 }
 0xa73   :  { %v2807_v39 = vadd.f32 %v2806_v8, %v2792_v52  ;;  %v2793_v1 = vmul.f32 %v2777_v56, %v2777_v56  ;;  %v2778_v47 = vsub.f32 %v2758_v30, %v4174_v37  ;;  %v2760_v41 = vadd.f32 %v2759_v7, %v5766_v3 }
 0xa74   :  { %v2761_v50 = vpop.f32.mrf.mxu0 }
 0xa75   :  { %v2808_v61 = vadd.f32 %v2807_v39, %v2793_v1  ;;  %v2794_v26 = vmul.f32 %v2778_v47, %v2778_v47  ;;  %v2779_v12 = vsub.f32 %v2760_v41, %v4175_v19  ;;  %v2762_v2 = vadd.f32 %v2761_v50, %v5763_v15 }
 0xa76   :  { %v2763_v63 = vpop.f32.mrf.mxu0 }
 0xa77   :  { %v2809_v4 = vadd.f32 %v2808_v61, %v2794_v26  ;;  %v2795_v45 = vmul.f32 %v2779_v12, %v2779_v12  ;;  %v2780_v60 = vsub.f32 %v2762_v2, %v4176_v46  ;;  %v2764_v57 = vadd.f32 %v2763_v63, %v5766_v3 }
 0xa79   :  { %v2796_v22 = vmul.f32 %v2780_v60, %v2780_v60  ;;  %v2781_v62 = vsub.f32 %v2764_v57, %v4177_v53  ;;  %v2810_v32 = vadd.f32 %v2809_v4, %v2795_v45 }
 0xa7b   :  { %v2797_v9 = vmul.f32 %v2781_v62, %v2781_v62  ;;  %v2811_v54 = vadd.f32 %v2810_v32, %v2796_v22 }
 0xa7d   :  { %v2812_v15 = vadd.f32 %v2811_v54, %v2797_v9 }
 0xa7f   :  { %2813 = vadd.xlane.f32.xlu0 %v2812_v15 }
 0xab8   :  { %v3328_v3 = vpop.f32.mrf.mxu0 }
 0xab9   :  { %v3329_v35 = vadd.f32 %v3328_v3, %v3127_v55 }
 0xaba   :  { %v3330_v29 = vpop.f32.mrf.mxu0 }
 0xabb   :  { %3335 = vst [vmem:[%s5871_s19] sm:$0xff] %v3329_v35  ;;  %v3331_v42 = vadd.f32 %v3330_v29, %v3131_v13 }
 0xabc   :  { %v3332_v6 = vpop.f32.mrf.mxu0 }
 0xabd   :  { %3336 = vst [vmem:[%s5871_s19 + $0x8] sm:$0xff] %v3331_v42  ;;  %s4447_s19 = smov [#allocation20]  }
 0xabe   :  { %v3333_v14 = vpop.f32.mrf.mxu0  ;;  %s3347_s8 = sshll.u32 %s4447_s19, 4  ;;  %s3348_s8 = int_to_ptr.vmem [resolvable:$true] %s3347_s8 }
 0xabf   :  { %s4398_s0 = scalar_lea.vmem %s3348_s8, 16  ;;  %p4403_p0 = scmp.lt.s32.totalorder %s3348_s8, %s3348_s8 }
 0xac0   :  { %p4399_p13 = scmp.ne.s32.totalorder %s3348_s8, %s4398_s0 }
 0xad3   :  { %v3083_v20 = vpop.f32.mrf.mxu1 }
 0xad4   :  { %v3084_v28 = vadd.f32 %v3541_v18, %v3083_v20 }
 0xad5   :  { %v3085_v38 = vpop.f32.mrf.mxu1 }
 0xad6   :  { %3089 = vst [vmem:[%s5870_s18] sm:$0xff] %v3084_v28  ;;  %s4402_s18 = scalar_lea.vmem %s3348_s8, 32 }
 0xad7   :  { %v3086_v31 = vpop.f32.mrf.mxu1  ;;  %p4404_p1 = scmp.lt.s32.totalorder %s4402_s18, %s4398_s0 }
 0xad9   :  { %v3087_v59 = vpop.f32.mrf.mxu1  ;;  %p4405_p2 = por %p4404_p1, %p4403_p0 }
 0xadb   :  { %p4406_p3 = pnand %p4405_p2, %p4399_p13 }
 0xb08   :  { %v2814_v51 = vpop.xlane.xlu0 %2813 }
 0xb09   :  { %v2815_v5 = vrot.slane %v2814_v51, 4 }
 0xb0b   :  { %v2816_v23 = vadd.f32 %v2815_v5, %v2814_v51 }
 0xb0d   :  { %v2817_v36 = vrot.slane %v2816_v23, 2 }
 0xb0f   :  { %v2818_v0 = vadd.f32 %v2817_v36, %v2816_v23 }
 0xb11   :  { %v2819_v10 = vrot.slane %v2818_v0, 1 }
 0xb13   :  { %v2820_v16 = vadd.f32 %v2819_v10, %v2818_v0 }
 0xb15   :  { %3798 = vpush %v2820_v16 }
 0xb46   :  { %s3799_s15 = spop %3798 }
 0xb47   :  { %s2824_s29 = smul.f32 6.1035156e-05, %s3799_s15 }
 0xb49   :  { %v2825_v40 = vstv %s2824_s29 }
 0xb4a   :  { %2827 = vst.msk [vmem:[#allocation20] sm:$0x1] %vm2826_vm0, %v2825_v40 }
 0xb4b   :  { %4409 = shalt.err (!%p4406_p3)
}
 0xb4c   :  { %3350 = dma.vmem_to_hbm [thread:$0]  %s3348_s8, 16, %s5872_s20, [#allocation4]  }
 0xb4d   :  { %4430 = dma.done.wait [#allocation4], 16  }
 0xb4e   :  { %4431 = vsyncadd [#allocation4], 4294967280 }
 0xb4f   :  { %3358 = vsyncpa [#allocation3], 1 }
 0xb50   :  { %3359 = vsyncpa [#allocation6], 1 }
 0xb51   :  { %3360 = vsyncpa [#allocation9], 1 }
 0xb52   :  { %3361 = vsyncpa [#allocation12], 1 }
 0xb53   :  { %3362 = vsyncpa [#allocation15], 1 }
 0xb54   :  { %3363 = vsyncpa [#allocation18], 1 }
 0xb55   :  { %3364 = vsyncpa [#allocation4], 1 }

</bundles_post_ra>
